<compile_context>
chip_gen: v7x
topology: tpu7x:2x2x1
jax: 0.10.0
libtpu: 0.0.40
codegen_flags: <defaults>
</compile_context>

<pallas_src>
import jax
import jax.numpy as jnp
from jax.experimental import pallas as pl
from jax.experimental.pallas import tpu as pltpu

_EPS = 1e-6    # Python floats only: jnp constants are created inside the kernel
_NEG = -1e30   # body so nothing jax-valued is captured by the closure.


def _make_kernel(n_pad: int, n_real: int, k_fg: int, nbr_roi: int, m_bg: int):
    """Kernel closed over *Python* scalars only (no jax.Array constants)."""
    N = n_pad
    padded = n_real < N
    bf16 = jnp.bfloat16
    f32 = jnp.float32

    def kernel(cam_r_ref, gfg_r_ref, gbg_r_ref,
               cam_c_ref, gfg_c_ref, gbg_c_ref,
               lt_ref, fg_ref, bg_ref):
        # row-oriented (1, N) and column-oriented (N, 1) copies of the inputs.
        cam_r = cam_r_ref[0]
        gfg_r = gfg_r_ref[0]
        gbg_r = gbg_r_ref[0]
        cam_c = cam_c_ref[0]
        gfg_c = gfg_c_ref[0]
        gbg_c = gbg_c_ref[0]
        lt_b = lt_ref[...]                        # (N, N) bf16, lt_b[i, j] = (i < j)

        ones_r = jnp.ones((1, N), dtype=bf16)
        ones_c = jnp.ones((N, 1), dtype=bf16)

        # p = (cam + eps) / (sum(cam) + n_real*eps); padded lanes add 0 to the sum.
        s = jnp.sum(cam_r, axis=1, keepdims=True) + (_EPS * n_real)     # (1, 1)
        p_r = (cam_r + _EPS) / s                                        # (1, N)
        p_c = (cam_c + _EPS) / s                                        # (N, 1)
        # Elementwise ops are value-deterministic, so the row/column copies of
        # p (and of every key below) are bit-identical per position -> the rank
        # counts below stay exact permutations.

        if padded:
            valid_r = jax.lax.broadcasted_iota(jnp.int32, (1, N), 1) < n_real
            valid_c = jax.lax.broadcasted_iota(jnp.int32, (N, 1), 0) < n_real

        # --- foreground: Gumbel-top-k == multinomial w/o replacement --------
        kf_r = jnp.log(p_r) + gfg_r
        kf_c = jnp.log(p_c) + gfg_c
        if padded:
            kf_r = jnp.where(valid_r, kf_r, _NEG)
            kf_c = jnp.where(valid_c, kf_c, _NEG)
        # Continuous Gumbel keys are distinct w.p. 1, so a single '>' is a
        # strict order; tied pad lanes all land at rank n_real >= k_fg and are
        # therefore never selected.
        c_b = (kf_c > kf_r).astype(bf16)                                # (N, N)
        rank_fg = jnp.dot(ones_r, c_b, preferred_element_type=f32)     # (1, N)
        fg_ref[0] = (rank_fg < k_fg).astype(jnp.int32)

        # --- background ------------------------------------------------------
        q_r = 1.0 - p_r
        q_c = 1.0 - p_c
        q_sr = jnp.where(valid_r, q_r, _NEG) if padded else q_r
        q_sc = jnp.where(valid_c, q_c, _NEG) if padded else q_c
        # Descending-sort rank of q with index tie-break (cam-value ties are
        # plausible).  gt/eq are disjoint so d_b is exactly {0,1} in bf16.
        gt_b = (q_sc > q_sr).astype(bf16)
        eq_b = (q_sc == q_sr).astype(bf16)
        d_b = gt_b + eq_b * lt_b                                        # (N, N)
        srank_r = jnp.dot(ones_r, d_b, preferred_element_type=f32)     # (1, N)
        beats_c = jnp.dot(d_b, ones_c, preferred_element_type=f32)     # (N, 1)
        srank_c = (N - 1.0) - beats_c        # strict total order => N-1-#beaten
        marker_r = srank_r < nbr_roi                                    # (1, N)
        marker_c = srank_c < nbr_roi                                    # (N, 1)

        # row-major rank within the ROI (position of j in torch.nonzero order)
        rrank_r = jnp.dot(marker_r.astype(bf16), lt_b,
                          preferred_element_type=f32)                   # (1, N)

        # Gumbel keys: ROI-restricted on the row side, unrestricted on the
        # column side.  For a ROI member i, non-ROI / pad columns sit at _NEG,
        # so #beaten = (N - nbr_roi) + (nbr_roi - 1 - within_roi_rank(i)).
        kb_r = jnp.where(marker_r, jnp.log(q_r) + gbg_r, _NEG)          # (1, N)
        kb_c = jnp.log(q_c) + gbg_c                                     # (N, 1)
        e_b = (kb_c > kb_r).astype(bf16)                                # (N, N)
        kbeats_c = jnp.dot(e_b, ones_c, preferred_element_type=f32)    # (N, 1)
        krank_c = (N - 1.0) - kbeats_c       # within-ROI rank for ROI members
        selected_c = marker_c & (krank_c < m_bg)                        # (N, 1)

        # original indexing quirk: the selected *sorted ranks* index the ROI
        # positions enumerated in row-major order.
        member_b = (selected_c & (srank_c == rrank_r)).astype(bf16)    # (N, N)
        hit_r = jnp.dot(ones_r, member_b, preferred_element_type=f32)  # (1, N)
        bg_ref[0] = (marker_r & (hit_r > 0.5)).astype(jnp.int32)

    return kernel


def _proba_area_batched(cam_r, gfg_r, gbg_r, cam_c, gfg_c, gbg_c, lt_b, *,
                        n_real, k_fg, nbr_roi, m_bg):
    """Rows: (B,1,N) f32; columns: (B,N,1) f32; lt_b: (N,N) bf16."""
    B = cam_r.shape[0]
    n_pad = cam_r.shape[-1]
    row = pl.BlockSpec((1, 1, n_pad), lambda b: (b, 0, 0))
    col = pl.BlockSpec((1, n_pad, 1), lambda b: (b, 0, 0))
    cst = pl.BlockSpec((n_pad, n_pad), lambda b: (0, 0))   # constant block: DMA'd once
    # live set ~ a few bf16 (N,N) matrices + double-buffered blocks; cap for 64-MiB parts
    vmem_bytes = int(min(max(20 * n_pad * n_pad + (4 << 20), 16 << 20), 48 << 20))
    return pl.pallas_call(
        _make_kernel(n_pad, n_real, k_fg, nbr_roi, m_bg),
        out_shape=(jax.ShapeDtypeStruct((B, 1, n_pad), jnp.int32),
                   jax.ShapeDtypeStruct((B, 1, n_pad), jnp.int32)),
        grid=(B,),
        in_specs=[row, row, row, col, col, col, cst],
        out_specs=(row, row),
        compiler_params=pltpu.CompilerParams(
            dimension_semantics=("parallel",),   # batch axis: megacore-shardable
            vmem_limit_bytes=vmem_bytes),
    )(cam_r, gfg_r, gbg_r, cam_c, gfg_c, gbg_c, lt_b)


def _proba_area_core(cam_b, key, *, min_, max_, min_p):
    B, h, w = cam_b.shape
    n_real = h * w
    n_pad = max(128, ((n_real + 127) // 128) * 128)   # lane-dense rows/outputs

    k_fg = min(max_, n_real)            # _ProbaSampler num_samples
    nbr_roi = int(min_p * n_real)       # _ProbaAreaSampler ROI size
    m_bg = min(min_, nbr_roi)           # _ProbaAreaSampler num_samples

    k1, k2 = jax.random.split(key)
    gfg = jax.random.gumbel(k1, (B, n_pad), dtype=jnp.float32)
    gbg = jax.random.gumbel(k2, (B, n_pad), dtype=jnp.float32)

    cam_flat = cam_b.reshape(B, n_real).astype(jnp.float32)   # row-major .view(h*w)
    if n_pad != n_real:
        cam_flat = jnp.pad(cam_flat, ((0, 0), (0, n_pad - n_real)))

    # Row (B,1,N) and column (B,N,1) replicas of the same values: the column
    # copies feed the sublane axis of the pairwise-compare matrices so the
    # kernel never materializes an (N,N) broadcast+transpose.
    cam_r, gfg_r, gbg_r = [x.reshape(B, 1, n_pad) for x in (cam_flat, gfg, gbg)]
    cam_c, gfg_c, gbg_c = [x.reshape(B, n_pad, 1) for x in (cam_flat, gfg, gbg)]

    ar = jnp.arange(n_pad, dtype=jnp.int32)
    lt_b = (ar[:, None] < ar[None, :]).astype(jnp.bfloat16)   # (N,N) {0,1}

    fg_flat, bg_flat = _proba_area_batched(
        cam_r, gfg_r, gbg_r, cam_c, gfg_c, gbg_c, lt_b,
        n_real=n_real, k_fg=k_fg, nbr_roi=nbr_roi, m_bg=m_bg)

    fg = fg_flat[:, 0, :n_real].reshape(B, h, w)
    bg = bg_flat[:, 0, :n_real].reshape(B, h, w)
    return fg, bg


def proba_area_one_sample(cam, key, *, min_: int, max_: int, min_p: float,
                          neg_samples_partial: bool = False):
    """Faithful port of _ProbaAreaOneSample.forward for a single (H, W) cam."""
    assert cam.ndim == 2
    assert isinstance(min_, int) and isinstance(max_, int)
    assert min_ >= 0 and max_ >= 0 and min_ + max_ > 0
    assert isinstance(min_p, float) and 0.0 <= min_p <= 1.0
    if min_ > 0:
        assert min_p > 0.0
    # NOTE: assumes a non-negative CAM (same assumption as the torch original).
    fg, bg = _proba_area_core(cam[None], key, min_=min_, max_=max_, min_p=min_p)
    if neg_samples_partial:
        return bg[0]
    return fg[0], bg[0]


def proba_area_batch(cams, key, *, min_: int, max_: int, min_p: float):
    """Batched variant: cams (B,H,W) -> (fg, bg) each (B,H,W).  The batch axis
    is a 'parallel' grid dimension, so B >= 2 uses both TensorCores on v7x."""
    assert cams.ndim == 3
    return _proba_area_core(cams, key, min_=min_, max_=max_, min_p=min_p)


if __name__ == "__main__":
    key = jax.random.PRNGKey(0)
    kcam, ksamp, kbatch = jax.random.split(key, 3)

    h, w = 16, 16
    min_, max_, min_p = 3, 5, 0.25
    N = h * w
    nbr_roi = int(min_p * N)

    # single-sample call: matches the torch module's forward signature.
    cam = jax.random.uniform(kcam, (h, w), dtype=jnp.float32)
    fg, bg = proba_area_one_sample(cam, ksamp, min_=min_, max_=max_, min_p=min_p)
    jax.block_until_ready((fg, bg))
    assert fg.shape == (h, w) and bg.shape == (h, w)
    assert int(fg.sum()) == min(max_, N), int(fg.sum())
    assert int(bg.sum()) == min(min_, nbr_roi), int(bg.sum())
    assert int(jnp.max(fg)) <= 1 and int(jnp.max(bg)) <= 1

    # batched call (B=2): exercises the 'parallel' batch grid axis (2 TCs on v7x).
    cams = jax.random.uniform(kcam, (2, h, w), dtype=jnp.float32)
    fg_b, bg_b = proba_area_batch(cams, kbatch, min_=min_, max_=max_, min_p=min_p)
    jax.block_until_ready((fg_b, bg_b))
    assert fg_b.shape == (2, h, w) and bg_b.shape == (2, h, w)
    for b in range(2):
        assert int(fg_b[b].sum()) == min(max_, N), int(fg_b[b].sum())
        assert int(bg_b[b].sum()) == min(min_, nbr_roi), int(bg_b[b].sum())

    print("KERNEL_OK")
</pallas_src>

<mosaic_0001>
module attributes {stable_mosaic.version = 11 : i64} {
  func.func @kernel(%arg0: i32, %arg1: memref<1x1x256xf32, #tpu.memory_space<vmem>>, %arg2: memref<1x1x256xf32, #tpu.memory_space<vmem>>, %arg3: memref<1x1x256xf32, #tpu.memory_space<vmem>>, %arg4: memref<1x256x1xf32, #tpu.memory_space<vmem>>, %arg5: memref<1x256x1xf32, #tpu.memory_space<vmem>>, %arg6: memref<1x256x1xf32, #tpu.memory_space<vmem>>, %arg7: memref<256x256xbf16, #tpu.memory_space<vmem>>, %arg8: memref<1x1x256xi32, #tpu.memory_space<vmem>>, %arg9: memref<1x1x256xi32, #tpu.memory_space<vmem>>) attributes {dimension_semantics = [#tpu.dimension_semantics<parallel>], iteration_bounds = array<i64: 1>, scalar_prefetch = 0 : i64, scratch_operands = 0 : i64, tpu.core_type = #tpu.core_type<tc>, window_params = [{transform_indices = @transform_0, window_bounds = array<i64: 1, 1, 256>}, {transform_indices = @transform_1, window_bounds = array<i64: 1, 1, 256>}, {transform_indices = @transform_2, window_bounds = array<i64: 1, 1, 256>}, {transform_indices = @transform_3, window_bounds = array<i64: 1, 256, 1>}, {transform_indices = @transform_4, window_bounds = array<i64: 1, 256, 1>}, {transform_indices = @transform_5, window_bounds = array<i64: 1, 256, 1>}, {pipeline_mode = #tpu.pipeline_mode<synchronous>, transform_indices = @transform_6, window_bounds = array<i64: 256, 256>}, {transform_indices = @transform_7, window_bounds = array<i64: 1, 1, 256>}, {transform_indices = @transform_8, window_bounds = array<i64: 1, 1, 256>}]} {
    %c0 = arith.constant 0 : index
    %c0_0 = arith.constant 0 : index
    %c0_1 = arith.constant 0 : index
    %0 = vector.load %arg1[%c0, %c0_0, %c0_1] : memref<1x1x256xf32, #tpu.memory_space<vmem>>, vector<1x1x256xf32>
    %1 = vector.shape_cast %0 : vector<1x1x256xf32> to vector<1x256xf32>
    %c0_2 = arith.constant 0 : index
    %c0_3 = arith.constant 0 : index
    %c0_4 = arith.constant 0 : index
    %2 = vector.load %arg2[%c0_2, %c0_3, %c0_4] : memref<1x1x256xf32, #tpu.memory_space<vmem>>, vector<1x1x256xf32>
    %3 = vector.shape_cast %2 : vector<1x1x256xf32> to vector<1x256xf32>
    %c0_5 = arith.constant 0 : index
    %c0_6 = arith.constant 0 : index
    %c0_7 = arith.constant 0 : index
    %4 = vector.load %arg3[%c0_5, %c0_6, %c0_7] : memref<1x1x256xf32, #tpu.memory_space<vmem>>, vector<1x1x256xf32>
    %5 = vector.shape_cast %4 : vector<1x1x256xf32> to vector<1x256xf32>
    %c0_8 = arith.constant 0 : index
    %c0_9 = arith.constant 0 : index
    %c0_10 = arith.constant 0 : index
    %6 = vector.load %arg4[%c0_8, %c0_9, %c0_10] : memref<1x256x1xf32, #tpu.memory_space<vmem>>, vector<1x256x1xf32>
    %7 = vector.shape_cast %6 : vector<1x256x1xf32> to vector<256x1xf32>
    %c0_11 = arith.constant 0 : index
    %c0_12 = arith.constant 0 : index
    %c0_13 = arith.constant 0 : index
    %8 = vector.load %arg5[%c0_11, %c0_12, %c0_13] : memref<1x256x1xf32, #tpu.memory_space<vmem>>, vector<1x256x1xf32>
    %9 = vector.shape_cast %8 : vector<1x256x1xf32> to vector<256x1xf32>
    %c0_14 = arith.constant 0 : index
    %c0_15 = arith.constant 0 : index
    %c0_16 = arith.constant 0 : index
    %10 = vector.load %arg6[%c0_14, %c0_15, %c0_16] : memref<1x256x1xf32, #tpu.memory_space<vmem>>, vector<1x256x1xf32>
    %11 = vector.shape_cast %10 : vector<1x256x1xf32> to vector<256x1xf32>
    %c0_17 = arith.constant 0 : index
    %c0_18 = arith.constant 0 : index
    %12 = vector.load %arg7[%c0_17, %c0_18] : memref<256x256xbf16, #tpu.memory_space<vmem>>, vector<256x256xbf16>
    %cst = arith.constant 1.000000e+00 : bf16
    %13 = vector.broadcast %cst : bf16 to vector<1x256xbf16>
    %cst_19 = arith.constant 1.000000e+00 : bf16
    %14 = vector.broadcast %cst_19 : bf16 to vector<256x1xbf16>
    %cst_20 = arith.constant dense<0.000000e+00> : vector<1xf32>
    %15 = vector.multi_reduction <add>, %1, %cst_20 [1] : vector<1x256xf32> to vector<1xf32>
    %16 = vector.shape_cast %15 : vector<1xf32> to vector<1x1xf32>
    %cst_21 = arith.constant 2.560000e-04 : f32
    %17 = vector.broadcast %cst_21 : f32 to vector<1x1xf32>
    %18 = arith.addf %16, %17 : vector<1x1xf32>
    %cst_22 = arith.constant 9.99999997E-7 : f32
    %19 = vector.broadcast %cst_22 : f32 to vector<1x256xf32>
    %20 = arith.addf %1, %19 : vector<1x256xf32>
    %21 = vector.broadcast %18 : vector<1x1xf32> to vector<1x256xf32>
    %22 = arith.divf %20, %21 : vector<1x256xf32>
    %cst_23 = arith.constant 9.99999997E-7 : f32
    %23 = vector.broadcast %cst_23 : f32 to vector<256x1xf32>
    %24 = arith.addf %7, %23 : vector<256x1xf32>
    %25 = vector.broadcast %18 : vector<1x1xf32> to vector<256x1xf32>
    %26 = arith.divf %24, %25 : vector<256x1xf32>
    %27 = math.log %22 : vector<1x256xf32>
    %28 = arith.addf %27, %3 : vector<1x256xf32>
    %29 = math.log %26 : vector<256x1xf32>
    %30 = arith.addf %29, %9 : vector<256x1xf32>
    %31 = vector.broadcast %30 : vector<256x1xf32> to vector<256x256xf32>
    %32 = vector.broadcast %28 : vector<1x256xf32> to vector<256x256xf32>
    %33 = arith.cmpf ogt, %31, %32 : vector<256x256xf32>
    %34 = arith.extui %33 : vector<256x256xi1> to vector<256x256xi32>
    %35 = arith.sitofp %34 : vector<256x256xi32> to vector<256x256xf32>
    %36 = arith.truncf %35 : vector<256x256xf32> to vector<256x256xbf16>
    %cst_24 = arith.constant dense<0.000000e+00> : vector<1x256xf32>
    %37 = tpu.matmul %13, %36, %cst_24 {dimension_numbers = #tpu.dot_dimension_numbers<[1], [0], [0], [1], [0, 0, 1, 1], [], []>} : vector<1x256xbf16>, vector<256x256xbf16>, vector<1x256xf32> -> vector<1x256xf32>
    %cst_25 = arith.constant 5.000000e+00 : f32
    %38 = vector.broadcast %cst_25 : f32 to vector<1x256xf32>
    %39 = arith.cmpf olt, %37, %38 : vector<1x256xf32>
    %40 = arith.extui %39 : vector<1x256xi1> to vector<1x256xi32>
    %c0_26 = arith.constant 0 : index
    %c0_27 = arith.constant 0 : index
    %c0_28 = arith.constant 0 : index
    %41 = vector.load %arg8[%c0_26, %c0_27, %c0_28] : memref<1x1x256xi32, #tpu.memory_space<vmem>>, vector<1x1x256xi32>
    %42 = vector.shape_cast %41 : vector<1x1x256xi32> to vector<1x256xi32>
    %43 = vector.shape_cast %40 : vector<1x256xi32> to vector<1x1x256xi32>
    tpu.vector_store %arg8[%c0_26, %c0_27, %c0_28], %43 {strides = array<i32>} : memref<1x1x256xi32, #tpu.memory_space<vmem>>, vector<1x1x256xi32>,
    %cst_29 = arith.constant 1.000000e+00 : f32
    %44 = vector.broadcast %cst_29 : f32 to vector<1x256xf32>
    %45 = arith.subf %44, %22 : vector<1x256xf32>
    %cst_30 = arith.constant 1.000000e+00 : f32
    %46 = vector.broadcast %cst_30 : f32 to vector<256x1xf32>
    %47 = arith.subf %46, %26 : vector<256x1xf32>
    %48 = vector.broadcast %47 : vector<256x1xf32> to vector<256x256xf32>
    %49 = vector.broadcast %45 : vector<1x256xf32> to vector<256x256xf32>
    %50 = arith.cmpf ogt, %48, %49 : vector<256x256xf32>
    %51 = arith.extui %50 : vector<256x256xi1> to vector<256x256xi32>
    %52 = arith.sitofp %51 : vector<256x256xi32> to vector<256x256xf32>
    %53 = arith.truncf %52 : vector<256x256xf32> to vector<256x256xbf16>
    %54 = vector.broadcast %47 : vector<256x1xf32> to vector<256x256xf32>
    %55 = vector.broadcast %45 : vector<1x256xf32> to vector<256x256xf32>
    %56 = arith.cmpf oeq, %54, %55 : vector<256x256xf32>
    %57 = arith.extui %56 : vector<256x256xi1> to vector<256x256xi32>
    %58 = arith.sitofp %57 : vector<256x256xi32> to vector<256x256xf32>
    %59 = arith.truncf %58 : vector<256x256xf32> to vector<256x256xbf16>
    %60 = arith.mulf %59, %12 : vector<256x256xbf16>
    %61 = arith.addf %53, %60 : vector<256x256xbf16>
    %cst_31 = arith.constant dense<0.000000e+00> : vector<1x256xf32>
    %62 = tpu.matmul %13, %61, %cst_31 {dimension_numbers = #tpu.dot_dimension_numbers<[1], [0], [0], [1], [0, 0, 1, 1], [], []>} : vector<1x256xbf16>, vector<256x256xbf16>, vector<1x256xf32> -> vector<1x256xf32>
    %cst_32 = arith.constant dense<0.000000e+00> : vector<256x1xf32>
    %63 = tpu.matmul %61, %14, %cst_32 {dimension_numbers = #tpu.dot_dimension_numbers<[1], [0], [0], [1], [0, 0, 1, 1], [], []>} : vector<256x256xbf16>, vector<256x1xbf16>, vector<256x1xf32> -> vector<256x1xf32>
    %cst_33 = arith.constant 2.550000e+02 : f32
    %64 = vector.broadcast %cst_33 : f32 to vector<256x1xf32>
    %65 = arith.subf %64, %63 : vector<256x1xf32>
    %cst_34 = arith.constant 6.400000e+01 : f32
    %66 = vector.broadcast %cst_34 : f32 to vector<1x256xf32>
    %67 = arith.cmpf olt, %62, %66 : vector<1x256xf32>
    %cst_35 = arith.constant 6.400000e+01 : f32
    %68 = vector.broadcast %cst_35 : f32 to vector<256x1xf32>
    %69 = arith.cmpf olt, %65, %68 : vector<256x1xf32>
    %70 = arith.extui %67 : vector<1x256xi1> to vector<1x256xi32>
    %71 = arith.sitofp %70 : vector<1x256xi32> to vector<1x256xf32>
    %72 = arith.truncf %71 : vector<1x256xf32> to vector<1x256xbf16>
    %cst_36 = arith.constant dense<0.000000e+00> : vector<1x256xf32>
    %73 = tpu.matmul %72, %12, %cst_36 {dimension_numbers = #tpu.dot_dimension_numbers<[1], [0], [0], [1], [0, 0, 1, 1], [], []>} : vector<1x256xbf16>, vector<256x256xbf16>, vector<1x256xf32> -> vector<1x256xf32>
    %74 = math.log %45 : vector<1x256xf32>
    %75 = arith.addf %74, %5 : vector<1x256xf32>
    %cst_37 = arith.constant -1.000000e+30 : f32
    %76 = vector.broadcast %cst_37 : f32 to vector<1x256xf32>
    %77 = arith.select %67, %75, %76 : vector<1x256xi1>, vector<1x256xf32>
    %78 = math.log %47 : vector<256x1xf32>
    %79 = arith.addf %78, %11 : vector<256x1xf32>
    %80 = vector.broadcast %79 : vector<256x1xf32> to vector<256x256xf32>
    %81 = vector.broadcast %77 : vector<1x256xf32> to vector<256x256xf32>
    %82 = arith.cmpf ogt, %80, %81 : vector<256x256xf32>
    %83 = arith.extui %82 : vector<256x256xi1> to vector<256x256xi32>
    %84 = arith.sitofp %83 : vector<256x256xi32> to vector<256x256xf32>
    %85 = arith.truncf %84 : vector<256x256xf32> to vector<256x256xbf16>
    %cst_38 = arith.constant dense<0.000000e+00> : vector<256x1xf32>
    %86 = tpu.matmul %85, %14, %cst_38 {dimension_numbers = #tpu.dot_dimension_numbers<[1], [0], [0], [1], [0, 0, 1, 1], [], []>} : vector<256x256xbf16>, vector<256x1xbf16>, vector<256x1xf32> -> vector<256x1xf32>
    %cst_39 = arith.constant 2.550000e+02 : f32
    %87 = vector.broadcast %cst_39 : f32 to vector<256x1xf32>
    %88 = arith.subf %87, %86 : vector<256x1xf32>
    %cst_40 = arith.constant 3.000000e+00 : f32
    %89 = vector.broadcast %cst_40 : f32 to vector<256x1xf32>
    %90 = arith.cmpf olt, %88, %89 : vector<256x1xf32>
    %91 = arith.andi %69, %90 : vector<256x1xi1>
    %92 = vector.broadcast %65 : vector<256x1xf32> to vector<256x256xf32>
    %93 = vector.broadcast %73 : vector<1x256xf32> to vector<256x256xf32>
    %94 = arith.cmpf oeq, %92, %93 : vector<256x256xf32>
    %95 = vector.broadcast %91 : vector<256x1xi1> to vector<256x256xi1>
    %96 = arith.andi %95, %94 : vector<256x256xi1>
    %97 = arith.extui %96 : vector<256x256xi1> to vector<256x256xi32>
    %98 = arith.sitofp %97 : vector<256x256xi32> to vector<256x256xf32>
    %99 = arith.truncf %98 : vector<256x256xf32> to vector<256x256xbf16>
    %cst_41 = arith.constant dense<0.000000e+00> : vector<1x256xf32>
    %100 = tpu.matmul %13, %99, %cst_41 {dimension_numbers = #tpu.dot_dimension_numbers<[1], [0], [0], [1], [0, 0, 1, 1], [], []>} : vector<1x256xbf16>, vector<256x256xbf16>, vector<1x256xf32> -> vector<1x256xf32>
    %cst_42 = arith.constant 5.000000e-01 : f32
    %101 = vector.broadcast %cst_42 : f32 to vector<1x256xf32>
    %102 = arith.cmpf ogt, %100, %101 : vector<1x256xf32>
    %103 = arith.andi %67, %102 : vector<1x256xi1>
    %104 = arith.extui %103 : vector<1x256xi1> to vector<1x256xi32>
    %c0_43 = arith.constant 0 : index
    %c0_44 = arith.constant 0 : index
    %c0_45 = arith.constant 0 : index
    %105 = vector.load %arg9[%c0_43, %c0_44, %c0_45] : memref<1x1x256xi32, #tpu.memory_space<vmem>>, vector<1x1x256xi32>
    %106 = vector.shape_cast %105 : vector<1x1x256xi32> to vector<1x256xi32>
    %107 = vector.shape_cast %104 : vector<1x256xi32> to vector<1x1x256xi32>
    tpu.vector_store %arg9[%c0_43, %c0_44, %c0_45], %107 {strides = array<i32>} : memref<1x1x256xi32, #tpu.memory_space<vmem>>, vector<1x1x256xi32>,
    return
  }
  func.func @transform_0(%arg0: i32) -> (i32, i32, i32) {
    %c0_i32 = arith.constant 0 : i32
    %c0_i32_0 = arith.constant 0 : i32
    %c0_i32_1 = arith.constant 0 : i32
    return %arg0, %c0_i32, %c0_i32_0 : i32, i32, i32
  }
  func.func @transform_1(%arg0: i32) -> (i32, i32, i32) {
    %c0_i32 = arith.constant 0 : i32
    %c0_i32_0 = arith.constant 0 : i32
    %c0_i32_1 = arith.constant 0 : i32
    return %arg0, %c0_i32, %c0_i32_0 : i32, i32, i32
  }
  func.func @transform_2(%arg0: i32) -> (i32, i32, i32) {
    %c0_i32 = arith.constant 0 : i32
    %c0_i32_0 = arith.constant 0 : i32
    %c0_i32_1 = arith.constant 0 : i32
    return %arg0, %c0_i32, %c0_i32_0 : i32, i32, i32
  }
  func.func @transform_3(%arg0: i32) -> (i32, i32, i32) {
    %c0_i32 = arith.constant 0 : i32
    %c0_i32_0 = arith.constant 0 : i32
    %c0_i32_1 = arith.constant 0 : i32
    return %arg0, %c0_i32, %c0_i32_0 : i32, i32, i32
  }
  func.func @transform_4(%arg0: i32) -> (i32, i32, i32) {
    %c0_i32 = arith.constant 0 : i32
    %c0_i32_0 = arith.constant 0 : i32
    %c0_i32_1 = arith.constant 0 : i32
    return %arg0, %c0_i32, %c0_i32_0 : i32, i32, i32
  }
  func.func @transform_5(%arg0: i32) -> (i32, i32, i32) {
    %c0_i32 = arith.constant 0 : i32
    %c0_i32_0 = arith.constant 0 : i32
    %c0_i32_1 = arith.constant 0 : i32
    return %arg0, %c0_i32, %c0_i32_0 : i32, i32, i32
  }
  func.func @transform_6(%arg0: i32) -> (i32, i32) {
    %c0_i32 = arith.constant 0 : i32
    %c0_i32_0 = arith.constant 0 : i32
    %c0_i32_1 = arith.constant 0 : i32
    return %c0_i32, %c0_i32_0 : i32, i32
  }
  func.func @transform_7(%arg0: i32) -> (i32, i32, i32) {
    %c0_i32 = arith.constant 0 : i32
    %c0_i32_0 = arith.constant 0 : i32
    %c0_i32_1 = arith.constant 0 : i32
    return %arg0, %c0_i32, %c0_i32_0 : i32, i32, i32
  }
  func.func @transform_8(%arg0: i32) -> (i32, i32, i32) {
    %c0_i32 = arith.constant 0 : i32
    %c0_i32_0 = arith.constant 0 : i32
    %c0_i32_1 = arith.constant 0 : i32
    return %arg0, %c0_i32, %c0_i32_0 : i32, i32, i32
  }
}

</mosaic_0001>

<bundles_post_ra>
// kernel: tpu_custom_call.1
= control target key start
LH: loop header
LB: loop body
LE: loop exit
PB: predicated region body
PF: predicated region fallthrough
CT: control target
= control target key end

     0   :  { %14 = vsyncpa [#allocation3], 0  ;;  %v7051_v0 = vlaneseq  ;;  %vm174_vm0 = vcmask 1040384   ;;  %s7042_s0 = inlined_call_operand.vmem [shape: f32[1,1,256], index: 0, kind: input, shape index: {}]   ;;  %s7043_s1 = inlined_call_operand.vmem [shape: f32[1,1,256], index: 1, kind: input, shape index: {}]   ;;  %s7044_s2 = inlined_call_operand.vmem [shape: f32[1,1,256], index: 2, kind: input, shape index: {}]   ;;  %s7045_s3 = inlined_call_operand.vmem [shape: f32[1,256,1], index: 3, kind: input, shape index: {}]   ;;  %s7046_s4 = inlined_call_operand.vmem [shape: f32[1,256,1], index: 4, kind: input, shape index: {}]   ;;  %s7047_s5 = inlined_call_operand.vmem [shape: f32[1,256,1], index: 5, kind: input, shape index: {}]   ;;  %s7048_s6 = inlined_call_operand.vmem [shape: bf16[256,256], index: 6, kind: input, shape index: {}]   ;;  %s7049_s7 = inlined_call_operand.hbm [shape: s32[1,1,256], index: 7, kind: output, shape index: {0}]   ;;  %s7050_s8 = inlined_call_operand.hbm [shape: s32[1,1,256], index: 8, kind: output, shape index: {1}]  }
   0x1   :  { %v32_v1 = vld [vmem:[%s7042_s0] sm:$0x3] }
   0x2   :  { %v4552_v2 = vshrl.u32 %v7051_v0, 7 }
   0x4   :  { %7112 = vst [vmem:[#allocation8_spill] sm:$0xff] %v4552_v2  ;;  %v4555_v3 = vsub.s32 0, %v4552_v2  ;;  %v4558_v4 = vsub.s32 1, %v4552_v2 }
   0x6   :  { %7113 = vst [vmem:[#allocation9_spill] sm:$0xff] %v4555_v3  ;;  %7114 = vst [vmem:[#allocation10_spill] sm:$0xff] %v4558_v4  ;;  %v167_v5 = vrot.slane %v32_v1, %v4555_v3  ;;  %v171_v6 = vrot.slane %v32_v1, %v4558_v4 }
   0x8   :  { %v175_v7 = vsel %vm174_vm0, %v167_v5, 0.0  ;;  %v176_v8 = vsel %vm174_vm0, %v171_v6, 0.0 }
   0x9   :  { %v177_v9 = vadd.f32 %v176_v8, %v175_v7 }
   0xb   :  { %178 = vadd.xlane.f32.xlu0 %v177_v9 }
   0xc   :  { %15 = vsyncpa [#allocation5], 0  ;;  %v7052_v10 = vmov 0   ;;  %v36_v14 = vld [vmem:[%s7045_s3 + $0x8] sm:$0xff]  ;;  %v35_v15 = vld [vmem:[%s7045_s3] sm:$0xff] }
   0xd   :  { %4259 = vset.pattern.permute.xlu1 %v7052_v10  ;;  %4258 = vset.pattern.permute.xlu0 %v7052_v10  ;;  %v37_v16 = vld [vmem:[%s7045_s3 + $0x10] sm:$0xff]  ;;  %v48_v17 = vld [vmem:[%s7045_s3 + $0x68] sm:$0xff]  ;;  %v181_v18 = vadd.f32 1e-06, %v32_v1  ;;  %v191_v19 = vadd.f32 1e-06, %v36_v14 }
   0xe   :  { %v190_v20 = vadd.f32 1e-06, %v35_v15  ;;  %v192_v21 = vadd.f32 1e-06, %v37_v16  ;;  %v203_v22 = vadd.f32 1e-06, %v48_v17 }
   0xf   :  { %v38_v23 = vld [vmem:[%s7045_s3 + $0x18] sm:$0xff]  ;;  %v39_v35 = vld [vmem:[%s7045_s3 + $0x20] sm:$0xff]  ;;  %v52_v36 = vld [vmem:[%s7045_s3 + $0x88] sm:$0xff] }
  0x10   :  { %v50_v24 = vld [vmem:[%s7045_s3 + $0x78] sm:$0xff]  ;;  %v193_v29 = vadd.f32 1e-06, %v38_v23  ;;  %v194_v37 = vadd.f32 1e-06, %v39_v35  ;;  %v40_v43 = vld [vmem:[%s7045_s3 + $0x28] sm:$0xff] }
  0x11   :  { %v205_v30 = vadd.f32 1e-06, %v50_v24  ;;  %v207_v38 = vadd.f32 1e-06, %v52_v36  ;;  %v54_v44 = vld [vmem:[%s7045_s3 + $0x98] sm:$0xff]  ;;  %v41_v51 = vld [vmem:[%s7045_s3 + $0x30] sm:$0xff] }
  0x12   :  { %v195_v45 = vadd.f32 1e-06, %v40_v43  ;;  %v209_v46 = vadd.f32 1e-06, %v54_v44  ;;  %v56_v52 = vld [vmem:[%s7045_s3 + $0xa8] sm:$0xff]  ;;  %v42_v59 = vld [vmem:[%s7045_s3 + $0x38] sm:$0xff] }
  0x13   :  { %v196_v53 = vadd.f32 1e-06, %v41_v51  ;;  %v211_v54 = vadd.f32 1e-06, %v56_v52  ;;  %v58_v60 = vld [vmem:[%s7045_s3 + $0xb8] sm:$0xff]  ;;  %v43_v7 = vld [vmem:[%s7045_s3 + $0x40] sm:$0xff] }
  0x14   :  { %v197_v61 = vadd.f32 1e-06, %v42_v59  ;;  %v213_v62 = vadd.f32 1e-06, %v58_v60  ;;  %v60_v8 = vld [vmem:[%s7045_s3 + $0xc8] sm:$0xff]  ;;  %v62_v17 = vld [vmem:[%s7045_s3 + $0xd8] sm:$0xff] }
  0x15   :  { %v198_v9 = vadd.f32 1e-06, %v43_v7  ;;  %v44_v16 = vld [vmem:[%s7045_s3 + $0x48] sm:$0xff]  ;;  %v45_v24 = vld [vmem:[%s7045_s3 + $0x50] sm:$0xff]  ;;  %v46_v44 = vld [vmem:[%s7045_s3 + $0x58] sm:$0xff] }
  0x16   :  { %v47_v60 = vld [vmem:[%s7045_s3 + $0x60] sm:$0xff]  ;;  %v70_v0 = vld [vmem:[%s7046_s4 + $0x18] sm:$0xff] }
  0x17   :  { %v55_v10 = vld [vmem:[%s7045_s3 + $0xa0] sm:$0xff] }
  0x98   :  { %v179_v11 = vpop.xlane.xlu0 %178 }
  0x99   :  { %v180_v12 = vadd.f32 0.000256, %v179_v11  ;;  %v215_v11 = vadd.f32 1e-06, %v60_v8 }
  0x9b   :  { %v186_v13 = vrot.slane %v180_v12, %v4555_v3 }
  0x9d   :  { %4308 = vrcp.f32 %v186_v13 }
  0xa7   :  { %v4583_v25 = vpop.eup %4308 }
  0xa8   :  { %v4586_v26 = vmul.f32 %v4583_v25, %v181_v18  ;;  %v4589_v27 = vmul.f32 %v4583_v25, %v191_v19  ;;  %v4592_v28 = vmul.f32 %v4583_v25, %v190_v20  ;;  %v4597_v33 = vmul.f32 %v4583_v25, %v192_v21 }
  0xa9   :  { %v4600_v34 = vmul.f32 %v4583_v25, %v203_v22  ;;  %v4615_v41 = vmul.f32 %v4583_v25, %v193_v29  ;;  %v4618_v42 = vmul.f32 %v4583_v25, %v205_v30  ;;  %v4633_v49 = vmul.f32 %v4583_v25, %v194_v37  ;;  %v64_v29 = vld [vmem:[%s7045_s3 + $0xe8] sm:$0xff] }
  0xaa   :  { %v820_v31 = vsub.f32 1.0, %v4589_v27  ;;  %v819_v32 = vsub.f32 1.0, %v4592_v28  ;;  %v821_v39 = vsub.f32 1.0, %v4597_v33  ;;  %v4636_v50 = vmul.f32 %v4583_v25, %v207_v38 }
  0xab   :  { %v832_v40 = vsub.f32 1.0, %v4600_v34  ;;  %v822_v47 = vsub.f32 1.0, %v4615_v41  ;;  %v834_v48 = vsub.f32 1.0, %v4618_v42  ;;  %v823_v55 = vsub.f32 1.0, %v4633_v49 }
  0xac   :  { %858 = vperm.xlu1 %4259, %v820_v31   ;;  %853 = vperm.xlu0 %4258, %v819_v32   ;;  %v836_v56 = vsub.f32 1.0, %v4636_v50  ;;  %v4651_v57 = vmul.f32 %v4583_v25, %v195_v45  ;;  %v4654_v58 = vmul.f32 %v4583_v25, %v209_v46  ;;  %v4669_v5 = vmul.f32 %v4583_v25, %v196_v53  ;;  %v66_v45 = vld [vmem:[%s7045_s3 + $0xf8] sm:$0xff] }
  0xad   :  { %v4672_v6 = vmul.f32 %v4583_v25, %v211_v54  ;;  %v4687_v14 = vmul.f32 %v4583_v25, %v197_v61  ;;  %v4690_v15 = vmul.f32 %v4583_v25, %v213_v62  ;;  %v199_v18 = vadd.f32 1e-06, %v44_v16 }
  0xae   :  { %v824_v63 = vsub.f32 1.0, %v4651_v57  ;;  %v838_v1 = vsub.f32 1.0, %v4654_v58  ;;  %v825_v12 = vsub.f32 1.0, %v4669_v5  ;;  %v217_v19 = vadd.f32 1e-06, %v62_v17 }
  0xaf   :  { %v840_v13 = vsub.f32 1.0, %v4672_v6  ;;  %v826_v20 = vsub.f32 1.0, %v4687_v14  ;;  %v842_v21 = vsub.f32 1.0, %v4690_v15  ;;  %v4705_v22 = vmul.f32 %v4583_v25, %v198_v9 }
  0xb0   :  { %863 = vperm.xlu1 %4259, %v821_v39   ;;  %918 = vperm.xlu0 %4258, %v832_v40   ;;  %v4708_v23 = vmul.f32 %v4583_v25, %v215_v11  ;;  %4310 = vlog2.f32 %v4589_v27  ;;  %v200_v30 = vadd.f32 1e-06, %v45_v24  ;;  %v219_v35 = vadd.f32 1e-06, %v64_v29  ;;  %v49_v11 = vld [vmem:[%s7045_s3 + $0x70] sm:$0xff] }
  0xb1   :  { %v827_v36 = vsub.f32 1.0, %v4705_v22  ;;  %v4724_v38 = vmul.f32 %v4583_v25, %v199_v18  ;;  %v4727_v43 = vmul.f32 %v4583_v25, %v217_v19  ;;  %4312 = vlog2.f32 %v4615_v41 }
  0xb2   :  { %v844_v37 = vsub.f32 1.0, %v4708_v23  ;;  %v201_v46 = vadd.f32 1e-06, %v46_v44  ;;  %v221_v51 = vadd.f32 1e-06, %v66_v45  ;;  %v4743_v54 = vmul.f32 %v4583_v25, %v200_v30  ;;  %v51_v30 = vld [vmem:[%s7045_s3 + $0x80] sm:$0xff] }
  0xb3   :  { %v828_v52 = vsub.f32 1.0, %v4724_v38  ;;  %v846_v53 = vsub.f32 1.0, %v4727_v43  ;;  %v4746_v59 = vmul.f32 %v4583_v25, %v219_v35  ;;  %4314 = vlog2.f32 %v4651_v57  ;;  %v68_v44 = vld [vmem:[%s7046_s4 + $0x8] sm:$0xff] }
  0xb4   :  { %868 = vperm.xlu1 %4259, %v822_v47   ;;  %928 = vperm.xlu0 %4258, %v834_v48   ;;  %v202_v61 = vadd.f32 1e-06, %v47_v60  ;;  %v7060_v62 = vsub.f32 1.0, %v4743_v54  ;;  %v4759_v8 = vmul.f32 %v4583_v25, %v201_v46  ;;  %v4762_v9 = vmul.f32 %v4583_v25, %v221_v51 }
  0xb5   :  { %v7058_v7 = vsub.f32 1.0, %v4746_v59  ;;  %4316 = vlog2.f32 %v4687_v14  ;;  %v204_v17 = vadd.f32 1e-06, %v49_v11  ;;  %v206_v45 = vadd.f32 1e-06, %v51_v30  ;;  %v53_v11 = vld [vmem:[%s7045_s3 + $0x90] sm:$0xff] }
  0xb6   :  { %v7056_v18 = vsub.f32 1.0, %v4759_v8  ;;  %v7054_v19 = vsub.f32 1.0, %v4762_v9  ;;  %v4775_v24 = vmul.f32 %v4583_v25, %v202_v61  ;;  %4318 = vlog2.f32 %v4724_v38 }
  0xb7   :  { %v4790_v60 = vmul.f32 %v4583_v25, %v204_v17  ;;  %4320 = vlog2.f32 %v4759_v8 }
  0xb8   :  { %873 = vperm.xlu1 %4259, %v823_v55   ;;  %938 = vperm.xlu0 %4258, %v836_v56   ;;  %v7055_v46 = vsub.f32 1.0, %v4775_v24  ;;  %4322 = vlog2.f32 %v4600_v34  ;;  %v84_v34 = vld [vmem:[%s7046_s4 + $0x88] sm:$0xff] }
  0xb9   :  { %v7057_v17 = vsub.f32 1.0, %v4790_v60  ;;  %4324 = vlog2.f32 %v4618_v42 }
  0xba   :  { %v4311_v16 = vpop.eup %4310  ;;  %4326 = vlog2.f32 %v4586_v26 }
  0xbb   :  { %v265_v29 = vmul.f32 0.6931472, %v4311_v16  ;;  %v4313_v35 = vpop.eup %4312  ;;  %4328 = vlog2.f32 %v4636_v50 }
  0xbc   :  { %878 = vperm.xlu1 %4259, %v824_v63   ;;  %948 = vperm.xlu0 %4258, %v838_v1   ;;  %v269_v61 = vmul.f32 0.6931472, %v4313_v35  ;;  %v4803_v35 = vmul.f32 %v4583_v25, %v206_v45  ;;  %4330 = vlog2.f32 %v820_v31  ;;  %v63_v31 = vld [vmem:[%s7045_s3 + $0xe0] sm:$0xff] }
  0xbd   :  { %v327_v51 = vadd.f32 %v265_v29, %v68_v44  ;;  %v4315_v16 = vpop.eup %4314  ;;  %v208_v29 = vadd.f32 1e-06, %v53_v11  ;;  %4332 = vlog2.f32 %v4592_v28 }
  0xbe   :  { %v329_v30 = vadd.f32 %v269_v61, %v70_v0  ;;  %v273_v44 = vmul.f32 0.6931472, %v4315_v16  ;;  %v210_v0 = vadd.f32 1e-06, %v55_v10  ;;  %v7059_v45 = vsub.f32 1.0, %v4803_v35  ;;  %v57_v16 = vld [vmem:[%s7045_s3 + $0xb0] sm:$0xff] }
  0xbf   :  { %v4816_v61 = vmul.f32 %v4583_v25, %v208_v29  ;;  %v212_v10 = vadd.f32 1e-06, %v57_v16  ;;  %v61_v16 = vld [vmem:[%s7045_s3 + $0xd0] sm:$0xff]  ;;  %4334 = vlog2.f32 %v4654_v58  ;;  %v94_v58 = vld [vmem:[%s7046_s4 + $0xd8] sm:$0xff] }
  0xc0   :  { %883 = vperm.xlu1 %4259, %v825_v12   ;;  %958 = vperm.xlu0 %4258, %v840_v13   ;;  %4336 = vlog2.f32 %v819_v32 }
  0xc1   :  { %4338 = vlog2.f32 %v4597_v33 }
  0xc2   :  { %4340 = vlog2.f32 %v4672_v6  ;;  %v96_v6 = vld [vmem:[%s7046_s4 + $0xe8] sm:$0xff] }
  0xc3   :  { %4342 = vlog2.f32 %v821_v39 }
  0xc4   :  { %888 = vperm.xlu1 %4259, %v826_v20   ;;  %968 = vperm.xlu0 %4258, %v842_v21   ;;  %4344 = vlog2.f32 %v832_v40 }
  0xc5   :  { %4346 = vlog2.f32 %v4690_v15  ;;  %v98_v15 = vld [vmem:[%s7046_s4 + $0xf8] sm:$0xff] }
  0xc8   :  { %893 = vperm.xlu1 %4259, %v827_v36   ;;  %978 = vperm.xlu0 %4258, %v844_v37  }
  0xcc   :  { %898 = vperm.xlu1 %4259, %v828_v52   ;;  %988 = vperm.xlu0 %4258, %v846_v53  }
  0xd0   :  { %903 = vperm.xlu1 %4259, %v7060_v62   ;;  %998 = vperm.xlu0 %4258, %v7058_v7  }
  0xd4   :  { %908 = vperm.xlu1 %4259, %v7056_v18   ;;  %1008 = vperm.xlu0 %4258, %v7054_v19   ;;  %v4317_v19 = vpop.eup %4316  ;;  %4348 = vlog2.f32 %v822_v47 }
  0xd5   :  { %v277_v11 = vmul.f32 0.6931472, %v4317_v19  ;;  %v4319_v18 = vpop.eup %4318  ;;  %v4829_v19 = vmul.f32 %v4583_v25, %v210_v0  ;;  %4350 = vlog2.f32 %v4633_v49 }
  0xd6   :  { %v4321_v7 = vpop.eup %4320  ;;  %4352 = vlog2.f32 %v4708_v23  ;;  %v100_v23 = vld [vmem:[%s7047_s5 + $0x8] sm:$0xff] }
  0xd7   :  { %v4323_v62 = vpop.eup %4322  ;;  %4354 = vlog2.f32 %v834_v48 }
  0xd8   :  { %913 = vperm.xlu1 %4259, %v7055_v46   ;;  %365 = vperm.xlu0 %4258, %v327_v51   ;;  %v72_v46 = vld [vmem:[%s7046_s4 + $0x28] sm:$0xff]  ;;  %v289_v27 = vmul.f32 0.6931472, %v4323_v62  ;;  %v218_v62 = vadd.f32 1e-06, %v63_v31 }
  0xd9   :  { %v331_v51 = vadd.f32 %v273_v44, %v72_v46  ;;  %v837_v46 = vsub.f32 1.0, %v4816_v61  ;;  %v59_v44 = vld [vmem:[%s7045_s3 + $0xc0] sm:$0xff] }
  0xdc   :  { %923 = vperm.xlu1 %4259, %v7057_v17   ;;  %375 = vperm.xlu0 %4258, %v329_v30   ;;  %v74_v17 = vld [vmem:[%s7046_s4 + $0x38] sm:$0xff]  ;;  %v281_v30 = vmul.f32 0.6931472, %v4319_v18  ;;  %v7061_v18 = vsub.f32 1.0, %v4829_v19 }
  0xdd   :  { %v333_v29 = vadd.f32 %v277_v11, %v74_v17  ;;  %v214_v17 = vadd.f32 1e-06, %v59_v44  ;;  %v285_v11 = vmul.f32 0.6931472, %v4321_v7  ;;  %v216_v7 = vadd.f32 1e-06, %v61_v16  ;;  %v4325_v44 = vpop.eup %4324 }
  0xde   :  { %v293_v32 = vmul.f32 0.6931472, %v4325_v44  ;;  %v4896_v44 = vmul.f32 %v4583_v25, %v218_v62  ;;  %4356 = vlog2.f32 %v4669_v5 }
  0xdf   :  { %v4877_v28 = vmul.f32 %v4583_v25, %v216_v7 }
  0xe0   :  { %933 = vperm.xlu1 %4259, %v7059_v45   ;;  %385 = vperm.xlu0 %4258, %v331_v51   ;;  %v76_v45 = vld [vmem:[%s7046_s4 + $0x48] sm:$0xff]  ;;  %v4843_v51 = vmul.f32 %v4583_v25, %v212_v10 }
  0xe1   :  { %v335_v0 = vadd.f32 %v281_v30, %v76_v45  ;;  %v4859_v30 = vmul.f32 %v4583_v25, %v214_v17  ;;  %v4873_v17 = vpop.eup %4326  ;;  %v845_v33 = vsub.f32 1.0, %v4877_v28  ;;  %4358 = vlog2.f32 %v4727_v43 }
  0xe2   :  { %v7062_v45 = vsub.f32 1.0, %v4843_v51 }
  0xe4   :  { %943 = vperm.xlu1 %4259, %v837_v46   ;;  %395 = vperm.xlu0 %4258, %v333_v29   ;;  %v78_v29 = vld [vmem:[%s7046_s4 + $0x58] sm:$0xff] }
  0xe5   :  { %v337_v10 = vadd.f32 %v285_v11, %v78_v29  ;;  %v843_v11 = vsub.f32 1.0, %v4859_v30  ;;  %v65_v29 = vld [vmem:[%s7045_s3 + $0xf0] sm:$0xff] }
  0xe8   :  { %953 = vperm.xlu1 %4259, %v7061_v18   ;;  %405 = vperm.xlu0 %4258, %v335_v0   ;;  %v80_v0 = vld [vmem:[%s7046_s4 + $0x68] sm:$0xff]  ;;  %v4329_v18 = vpop.eup %4328  ;;  %4360 = vlog2.f32 %v823_v55 }
  0xe9   :  { %v339_v16 = vadd.f32 %v289_v27, %v80_v0  ;;  %v4891_v7 = vpop.eup %4330  ;;  %v220_v27 = vadd.f32 1e-06, %v65_v29  ;;  %v297_v0 = vmul.f32 0.6931472, %v4329_v18  ;;  %v7063_v18 = vsub.f32 1.0, %v4896_v44  ;;  %v86_v29 = vld [vmem:[%s7046_s4 + $0x98] sm:$0xff] }
  0xea   :  { %v4333_v31 = vpop.eup %4332  ;;  %4362 = vlog2.f32 %v4705_v22  ;;  %v2028_v22 = vmul.f32 0.6931472, %v4891_v7  ;;  %v7115_v7 = vsub.f32 1.0, %v4743_v54 }
  0xeb   :  { %v4911_v41 = vmul.f32 %v4583_v25, %v220_v27  ;;  %v263_v27 = vmul.f32 0.6931472, %v4333_v31  ;;  %4364 = vlog2.f32 %v4746_v59 }
  0xec   :  { %963 = vperm.xlu1 %4259, %v7062_v45   ;;  %415 = vperm.xlu0 %4258, %v337_v10   ;;  %v82_v10 = vld [vmem:[%s7046_s4 + $0x78] sm:$0xff]  ;;  %v4335_v45 = vpop.eup %4334  ;;  %4366 = vlog2.f32 %v836_v56 }
  0xed   :  { %v341_v39 = vadd.f32 %v293_v32, %v82_v10  ;;  %v4906_v40 = vpop.eup %4336  ;;  %v301_v47 = vmul.f32 0.6931472, %v4335_v45  ;;  %v849_v45 = vsub.f32 1.0, %v4911_v41  ;;  %4368 = vlog2.f32 %v4743_v54 }
  0xee   :  { %v4339_v62 = vpop.eup %4338  ;;  %4370 = vlog2.f32 %v4762_v9  ;;  %v2090_v54 = vadd.f32 %v2028_v22, %v100_v23  ;;  %v114_v23 = vld [vmem:[%s7047_s5 + $0x78] sm:$0xff] }
  0xef   :  { %v4341_v32 = vpop.eup %4340  ;;  %v345_v42 = vadd.f32 %v301_v47, %v86_v29  ;;  %4372 = vlog2.f32 %v824_v63 }
  0xf0   :  { %973 = vperm.xlu1 %4259, %v843_v11   ;;  %425 = vperm.xlu0 %4258, %v339_v16   ;;  %v343_v16 = vadd.f32 %v297_v0, %v84_v34  ;;  %v4921_v10 = vpop.eup %4342  ;;  %v305_v48 = vmul.f32 0.6931472, %v4341_v32  ;;  %v88_v0 = vld [vmem:[%s7046_s4 + $0xa8] sm:$0xff]  ;;  %v67_v34 = vld [vmem:[%s7046_s4] sm:$0xff]  ;;  %v267_v32 = vmul.f32 0.6931472, %v4339_v62  ;;  %4374 = vlog2.f32 %v838_v1 }
  0xf1   :  { %v4924_v25 = vpop.eup %4344  ;;  %v326_v31 = vadd.f32 %v263_v27, %v67_v34  ;;  %v92_v34 = vld [vmem:[%s7046_s4 + $0xc8] sm:$0xff]  ;;  %4376 = vlog2.f32 %v4775_v24  ;;  %v73_v1 = vld [vmem:[%s7046_s4 + $0x30] sm:$0xff] }
  0xf2   :  { %v347_v55 = vadd.f32 %v305_v48, %v88_v0 }
  0xf4   :  { %983 = vperm.xlu1 %4259, %v845_v33   ;;  %435 = vperm.xlu0 %4258, %v341_v39   ;;  %v4347_v39 = vpop.eup %4346  ;;  %4378 = vlog2.f32 %v825_v12 }
  0xf5   :  { %v309_v47 = vmul.f32 0.6931472, %v4347_v39 }
  0xf8   :  { %993 = vperm.xlu1 %4259, %v7063_v18   ;;  %445 = vperm.xlu0 %4258, %v343_v16   ;;  %v4938_v16 = vpop.eup %4348  ;;  %v90_v18 = vld [vmem:[%s7046_s4 + $0xb8] sm:$0xff]  ;;  %4380 = vlog2.f32 %v840_v13  ;;  %v75_v13 = vld [vmem:[%s7046_s4 + $0x40] sm:$0xff] }
  0xf9   :  { %v4351_v49 = vpop.eup %4350  ;;  %v349_v27 = vadd.f32 %v309_v47, %v90_v18  ;;  %4382 = vlog2.f32 %v4790_v60  ;;  %v2032_v43 = vmul.f32 0.6931472, %v4938_v16  ;;  %v81_v16 = vld [vmem:[%s7046_s4 + $0x70] sm:$0xff] }
  0xfa   :  { %v4353_v29 = vpop.eup %4352  ;;  %v271_v39 = vmul.f32 0.6931472, %v4351_v49  ;;  %4384 = vlog2.f32 %v826_v20 }
  0xfb   :  { %v4950_v48 = vpop.eup %4354  ;;  %v313_v56 = vmul.f32 0.6931472, %v4353_v29  ;;  %4386 = vlog2.f32 %v842_v21  ;;  %v77_v21 = vld [vmem:[%s7046_s4 + $0x50] sm:$0xff] }
  0xfc   :  { %1003 = vperm.xlu1 %4259, %v849_v45   ;;  %455 = vperm.xlu0 %4258, %v345_v42   ;;  %v69_v42 = vld [vmem:[%s7046_s4 + $0x10] sm:$0xff]  ;;  %v4357_v62 = vpop.eup %4356  ;;  %4388 = vlog2.f32 %v4803_v35  ;;  %v2056_v22 = vmul.f32 0.6931472, %v4950_v48 }
  0xfd   :  { %v328_v50 = vadd.f32 %v267_v32, %v69_v42  ;;  %v4359_v0 = vpop.eup %4358  ;;  %v351_v57 = vadd.f32 %v313_v56, %v92_v34  ;;  %v275_v47 = vmul.f32 0.6931472, %v4357_v62  ;;  %4390 = vlog2.f32 %v827_v36 }
  0xfe   :  { %v4963_v18 = vpop.eup %4360  ;;  %4392 = vlog2.f32 %v844_v37  ;;  %v79_v37 = vld [vmem:[%s7046_s4 + $0x60] sm:$0xff] }
  0xff   :  { %v4363_v49 = vpop.eup %4362  ;;  %v332_v12 = vadd.f32 %v275_v47, %v73_v1  ;;  %4394 = vlog2.f32 %v4816_v61 }
 0x100   :  { %465 = vperm.xlu0 %4258, %v347_v55   ;;  %360 = vperm.xlu1 %4259, %v326_v31   ;;  %v71_v55 = vld [vmem:[%s7046_s4 + $0x20] sm:$0xff]  ;;  %v317_v31 = vmul.f32 0.6931472, %v4359_v0  ;;  %v4365_v32 = vpop.eup %4364  ;;  %4396 = vlog2.f32 %v828_v52  ;;  %v260_v52 = vmul.f32 0.6931472, %v4873_v17  ;;  %v102_v17 = vld [vmem:[%s7047_s5 + $0x18] sm:$0xff] }
 0x101   :  { %v330_v63 = vadd.f32 %v271_v39, %v71_v55  ;;  %v4976_v29 = vpop.eup %4366  ;;  %v321_v62 = vmul.f32 0.6931472, %v4365_v32  ;;  %4398 = vlog2.f32 %v846_v53  ;;  %v33_v32 = vld [vmem:[%s7043_s1] sm:$0x3] }
 0x102   :  { %v4369_v42 = vpop.eup %4368  ;;  %v353_v5 = vadd.f32 %v317_v31, %v94_v58  ;;  %4400 = vlog2.f32 %v7115_v7  ;;  %v7116_v58 = vsub.f32 1.0, %v4746_v59  ;;  %v7119_v59 = vsub.f32 1.0, %v4762_v9 }
 0x103   :  { %v355_v14 = vadd.f32 %v321_v62, %v96_v6  ;;  %v283_v34 = vmul.f32 0.6931472, %v4369_v42  ;;  %v5039_v62 = vsub.f32 1.0, %v4586_v26  ;;  %v7064_v6 = vmov 1065369472  }
 0x104   :  { %475 = vperm.xlu0 %4258, %v349_v27   ;;  %370 = vperm.xlu1 %4259, %v328_v50   ;;  %v279_v27 = vmul.f32 0.6931472, %v4363_v49  ;;  %v4371_v50 = vpop.eup %4370  ;;  %4402 = vlog2.f32 %v4829_v19  ;;  %v7120_v26 = vsub.f32 1.0, %v4775_v24  ;;  %v2092_v9 = vadd.f32 %v2032_v43, %v102_v17 }
 0x105   :  { %v4373_v56 = vpop.eup %4372  ;;  %v325_v0 = vmul.f32 0.6931472, %v4371_v50  ;;  %4404 = vlog2.f32 %v7116_v58  ;;  %7118 = vst [vmem:[#allocation11_spill] sm:$0xff] %v5039_v62  ;;  %1726 = vmatprep.mubr.bf16.mxu1 %v7064_v6  ;;  %785 = vmatprep.mubr.bf16.mxu0 %v7064_v6  ;;  %v5064_v24 = vrot.slane %v5039_v62, %v4558_v4  ;;  %v118_v58 = vld [vmem:[%s7047_s5 + $0x98] sm:$0xff]  ;;  %v5100_v17 = vadd.f32 %v2056_v22, %v114_v23 }
 0x106   :  { %v4990_v39 = vpop.eup %4374  ;;  %v334_v20 = vadd.f32 %v279_v27, %v75_v13  ;;  %v2036_v50 = vmul.f32 0.6931472, %v4373_v56  ;;  %v83_v56 = vld [vmem:[%s7046_s4 + $0x80] sm:$0xff]  ;;  %v2034_v23 = vmul.f32 0.6931472, %v4963_v18  ;;  %v126_v18 = vld [vmem:[%s7047_s5 + $0xd8] sm:$0xff] }
 0x107   :  { %v4377_v55 = vpop.eup %4376  ;;  %v2064_v7 = vmul.f32 0.6931472, %v4990_v39  ;;  %v85_v39 = vld [vmem:[%s7046_s4 + $0x90] sm:$0xff] }
 0x108   :  { %485 = vperm.xlu0 %4258, %v351_v57   ;;  %380 = vperm.xlu1 %4259, %v330_v63   ;;  %v5002_v49 = vpop.eup %4378  ;;  %v357_v57 = vadd.f32 %v325_v0, %v98_v15  ;;  %v336_v63 = vadd.f32 %v283_v34, %v77_v21  ;;  %v287_v31 = vmul.f32 0.6931472, %v4377_v55  ;;  %v5060_v15 = vrot.slane %v5039_v62, %v4555_v3 }
 0x109   :  { %v5006_v36 = vpop.eup %4380  ;;  %v2052_v21 = vmul.f32 0.6931472, %v4924_v25 }
 0x10a   :  { %v4383_v47 = vpop.eup %4382  ;;  %v338_v1 = vadd.f32 %v287_v31, %v79_v37  ;;  %v2060_v37 = vmul.f32 0.6931472, %v4976_v29  ;;  %v106_v29 = vld [vmem:[%s7047_s5 + $0x38] sm:$0xff] }
 0x10b   :  { %v4385_v38 = vpop.eup %4384  ;;  %v291_v42 = vmul.f32 0.6931472, %v4383_v47  ;;  %v112_v47 = vld [vmem:[%s7047_s5 + $0x68] sm:$0xff] }
 0x10c   :  { %495 = vperm.xlu0 %4258, %v353_v5   ;;  %390 = vperm.xlu1 %4259, %v332_v12   ;;  %v5023_v53 = vpop.eup %4386  ;;  %v7117_v12 = vsub.f32 1.0, %v4759_v8  ;;  %v261_v8 = vadd.f32 %v260_v52, %v33_v32  ;;  %v2040_v52 = vmul.f32 0.6931472, %v4385_v38  ;;  %v116_v32 = vld [vmem:[%s7047_s5 + $0x88] sm:$0xff]  ;;  %v2026_v38 = vmul.f32 0.6931472, %v4906_v40 }
 0x10d   :  { %v4389_v5 = vpop.eup %4388 }
 0x10e   :  { %4406 = vlog2.f32 %v7117_v12  ;;  %v5043_v27 = vpop.eup %4390  ;;  %v295_v0 = vmul.f32 0.6931472, %v4389_v5  ;;  %v5098_v12 = vadd.f32 %v2052_v21, %v112_v47  ;;  %v103_v47 = vld [vmem:[%s7047_s5 + $0x20] sm:$0xff] }
 0x10f   :  { %4408 = vlog2.f32 %v7119_v59  ;;  %v5048_v13 = vpop.eup %4392  ;;  %v99_v59 = vld [vmem:[%s7047_s5] sm:$0xff] }
 0x110   :  { %505 = vperm.xlu0 %4258, %v355_v14   ;;  %400 = vperm.xlu1 %4259, %v334_v20   ;;  %4410 = vlog2.f32 %v4843_v51  ;;  %v340_v14 = vadd.f32 %v291_v42, %v81_v16  ;;  %v104_v20 = vld [vmem:[%s7047_s5 + $0x28] sm:$0xff]  ;;  %v4395_v34 = vpop.eup %4394  ;;  %v342_v48 = vadd.f32 %v295_v0, %v83_v56  ;;  %v2030_v42 = vmul.f32 0.6931472, %v4921_v10  ;;  %v87_v56 = vld [vmem:[%s7046_s4 + $0xa0] sm:$0xff] }
 0x111   :  { %4412 = vlog2.f32 %v7120_v26  ;;  %v4397_v55 = vpop.eup %4396  ;;  %v2094_v31 = vadd.f32 %v2036_v50, %v104_v20  ;;  %v299_v43 = vmul.f32 0.6931472, %v4395_v34  ;;  %v2068_v16 = vmul.f32 0.6931472, %v5006_v36  ;;  %v120_v36 = vld [vmem:[%s7047_s5 + $0xa8] sm:$0xff] }
 0x112   :  { %4414 = vlog2.f32 %v4859_v30  ;;  %v2044_v10 = vmul.f32 0.6931472, %v4397_v55  ;;  %v5110_v50 = vadd.f32 %v2060_v37, %v116_v32  ;;  %v5112_v26 = vadd.f32 %v2064_v7, %v118_v58  ;;  %v108_v34 = vld [vmem:[%s7047_s5 + $0x48] sm:$0xff]  ;;  %v105_v37 = vld [vmem:[%s7047_s5 + $0x30] sm:$0xff] }
 0x113   :  { %4416 = vlog2.f32 %v4877_v28  ;;  %v2096_v20 = vadd.f32 %v2040_v52, %v106_v29  ;;  %v344_v0 = vadd.f32 %v299_v43, %v85_v39  ;;  %v5125_v22 = vadd.f32 %v2026_v38, %v99_v59  ;;  %v124_v32 = vld [vmem:[%s7047_s5 + $0xc8] sm:$0xff]  ;;  %v107_v38 = vld [vmem:[%s7047_s5 + $0x40] sm:$0xff] }
 0x114   :  { %515 = vperm.xlu0 %4258, %v357_v57   ;;  %410 = vperm.xlu1 %4259, %v336_v63   ;;  %v4399_v57 = vpop.eup %4398  ;;  %v5069_v63 = vrot.slane %v261_v8, %v4555_v3  ;;  %4418 = vlog2.f32 %v4896_v44  ;;  %v2038_v7 = vmul.f32 0.6931472, %v5002_v49  ;;  %v5140_v52 = vadd.f32 %v2068_v16, %v120_v36  ;;  %v4262_v28 = vld [vmem:[%s7048_s6] ss:$8 sps:$4 sm:$0xff]  }
 0x115   :  { %v4401_v25 = vpop.eup %4400  ;;  %v2072_v43 = vmul.f32 0.6931472, %v5023_v53  ;;  %v2076_v58 = vmul.f32 0.6931472, %v5048_v13  ;;  %v7122_v49 = vsub.f32 1.0, %v4803_v35  ;;  %v2098_v29 = vadd.f32 %v2044_v10, %v108_v34  ;;  %v110_v53 = vld [vmem:[%s7047_s5 + $0x58] sm:$0xff] }
 0x116   :  { %v2080_v39 = vmul.f32 0.6931472, %v4399_v57  ;;  %v109_v13 = vld [vmem:[%s7047_s5 + $0x50] sm:$0xff]  ;;  %v128_v10 = vld [vmem:[%s7047_s5 + $0xe8] sm:$0xff]  ;;  %v4498_v30 = vmov 0.0  }
 0x117   :  { %v89_v57 = vld [vmem:[%s7046_s4 + $0xb0] sm:$0xff] }
 0x118   :  { %2128 = vperm.xlu0 %4258, %v2090_v54   ;;  %420 = vperm.xlu1 %4259, %v338_v1   ;;  %v4403_v54 = vpop.eup %4402  ;;  %v5087_v1 = vrot.slane %v261_v8, %v4558_v4  ;;  %v101_v8 = vld [vmem:[%s7047_s5 + $0x10] sm:$0xff]  ;;  %v5189_v34 = vadd.f32 %v2080_v39, %v126_v18 }
 0x119   :  { %v4405_v5 = vpop.eup %4404  ;;  %v303_v55 = vmul.f32 0.6931472, %v4403_v54  ;;  %v2042_v54 = vmul.f32 0.6931472, %v5043_v27 }
 0x11a   :  { %v4407_v40 = vpop.eup %4406  ;;  %v2084_v35 = vmul.f32 0.6931472, %v4405_v5 }
 0x11b   :  { %v346_v16 = vadd.f32 %v303_v55, %v87_v56  ;;  %v2048_v27 = vmul.f32 0.6931472, %v4407_v40  ;;  %v7123_v40 = vsub.f32 1.0, %v4829_v19  ;;  %v5178_v5 = vadd.f32 %v2042_v54, %v107_v38 }
 0x11c   :  { %2138 = vperm.xlu0 %4258, %v2092_v9   ;;  %430 = vperm.xlu1 %4259, %v340_v14   ;;  %v4409_v9 = vpop.eup %4408  ;;  %v7121_v14 = vsub.f32 1.0, %v4790_v60  ;;  %v5130_v60 = vadd.f32 %v2030_v42, %v101_v8  ;;  %v2046_v42 = vmul.f32 0.6931472, %v4401_v25  ;;  %v5167_v8 = vadd.f32 %v2034_v23, %v103_v47 }
 0x11d   :  { %v4411_v21 = vpop.eup %4410  ;;  %v2088_v36 = vmul.f32 0.6931472, %v4409_v9  ;;  %v111_v9 = vld [vmem:[%s7047_s5 + $0x60] sm:$0xff]  ;;  %v5187_v19 = vadd.f32 %v2076_v58, %v124_v32  ;;  %v7124_v55 = vsub.f32 1.0, %v4843_v51  ;;  %v5195_v47 = vadd.f32 %v2084_v35, %v128_v10 }
 0x11e   :  { %4420 = vlog2.f32 %v7121_v14  ;;  %v307_v59 = vmul.f32 0.6931472, %v4411_v21  ;;  %v5191_v56 = vadd.f32 %v2046_v42, %v109_v13  ;;  %v2100_v21 = vadd.f32 %v2048_v27, %v110_v53  ;;  %v91_v51 = vld [vmem:[%s7046_s4 + $0xc0] sm:$0xff]  ;;  %v93_v27 = vld [vmem:[%s7046_s4 + $0xd0] sm:$0xff] }
 0x11f   :  { %4422 = vlog2.f32 %v7122_v49  ;;  %v95_v35 = vld [vmem:[%s7046_s4 + $0xe0] sm:$0xff] }
 0x120   :  { %2148 = vperm.xlu0 %4258, %v2094_v31   ;;  %440 = vperm.xlu1 %4259, %v342_v48   ;;  %v122_v31 = vld [vmem:[%s7047_s5 + $0xb8] sm:$0xff]  ;;  %v4413_v48 = vpop.eup %4412  ;;  %4424 = vlog2.f32 %v837_v46  ;;  %v5176_v46 = vadd.f32 %v2038_v7, %v105_v37 }
 0x121   :  { %v2050_v14 = vmul.f32 0.6931472, %v4413_v48  ;;  %v4415_v25 = vpop.eup %4414  ;;  %4426 = vlog2.f32 %v7123_v40  ;;  %v5174_v61 = vadd.f32 %v2072_v43, %v122_v31  ;;  %v348_v31 = vadd.f32 %v307_v59, %v89_v57 }
 0x122   :  { %4428 = vlog2.f32 %v4911_v41  ;;  %v311_v48 = vmul.f32 0.6931472, %v4415_v25 }
 0x123   :  { %4430 = vlog2.f32 %v7124_v55  ;;  %v5201_v32 = vadd.f32 %v2050_v14, %v111_v9 }
 0x124   :  { %2158 = vperm.xlu0 %4258, %v2096_v20   ;;  %450 = vperm.xlu1 %4259, %v344_v0   ;;  %v130_v20 = vld [vmem:[%s7047_s5 + $0xf8] sm:$0xff]  ;;  %v4417_v0 = vpop.eup %4416  ;;  %4432 = vlog2.f32 %v843_v11 }
 0x125   :  { %v4419_v23 = vpop.eup %4418  ;;  %v5199_v43 = vadd.f32 %v2088_v36, %v130_v20  ;;  %v315_v18 = vmul.f32 0.6931472, %v4417_v0  ;;  %4434 = vlog2.f32 %v845_v33 }
 0x126   :  { %v319_v39 = vmul.f32 0.6931472, %v4419_v23 }
 0x127   :  { %v352_v9 = vadd.f32 %v315_v18, %v93_v27 }
 0x128   :  { %2168 = vperm.xlu0 %4258, %v2098_v29   ;;  %460 = vperm.xlu1 %4259, %v346_v16   ;;  %v4421_v58 = vpop.eup %4420  ;;  %v4260_v29 = vld [vmem:[%s7048_s6 + $0x4] ss:$8 sps:$4 sm:$0xff]   ;;  %v350_v16 = vadd.f32 %v311_v48, %v91_v51  ;;  %v354_v55 = vadd.f32 %v319_v39, %v95_v35 }
 0x129   :  { %v5219_v38 = vpop.eup %4422  ;;  %v2054_v57 = vmul.f32 0.6931472, %v4421_v58 }
 0x12a   :  { %v5237_v25 = vpop.eup %4424 }
 0x12b   :  { %v859_v37 = vpop.permute.xlu1 %858  ;;  %v854_v7 = vpop.permute.xlu0 %853 }
 0x12c   :  { %2178 = vperm.xlu0 %4258, %v2100_v21   ;;  %470 = vperm.xlu1 %4259, %v348_v31   ;;  %vm1023_vm1 = vcmp.gt.f32.partialorder %v854_v7, %v5064_v24  ;;  %vm1025_vm2 = vcmp.gt.f32.partialorder %v859_v37, %v5064_v24  ;;  %vm1247_vm3 = vcmp.eq.f32.partialorder %v854_v7, %v5064_v24  ;;  %v5246_v33 = vpop.eup %4426 }
 0x12d   :  { %v3606_v11 = vsel %vm1023_vm1, 1.0, %v4498_v30  ;;  %v3608_v54 = vsel %vm1025_vm2, 1.0, %v4498_v30  ;;  %vm1249_vm4 = vcmp.eq.f32.partialorder %v859_v37, %v5064_v24  ;;  %v3670_v49 = vsel %vm1247_vm3, 1.0, %v4498_v30  ;;  %v4429_v21 = vpop.eup %4428 }
 0x12e   :  { %v3672_v53 = vsel %vm1249_vm4, 1.0, %v4498_v30  ;;  %vm1022_vm5 = vcmp.gt.f32.partialorder %v854_v7, %v5060_v15  ;;  %vm1024_vm6 = vcmp.gt.f32.partialorder %v859_v37, %v5060_v15  ;;  %vm1246_vm7 = vcmp.eq.f32.partialorder %v854_v7, %v5060_v15  ;;  %v5257_v58 = vpop.eup %4430 }
 0x12f   :  { %v5221_v13 = vpop.permute.xlu1 %863  ;;  %v5223_v42 = vpop.permute.xlu0 %918  ;;  %v1439_v59 = vpack.c.bf16 %v3672_v53, %v3670_v49  ;;  %v1215_v10 = vpack.c.bf16 %v3608_v54, %v3606_v11  ;;  %v3605_v36 = vsel %vm1022_vm5, 1.0, %v4498_v30  ;;  %v3607_v14 = vsel %vm1024_vm6, 1.0, %v4498_v30  ;;  %v113_v54 = vld [vmem:[%s7047_s5 + $0x70] sm:$0xff] }
 0x130   :  { %2188 = vperm.xlu0 %4258, %v5098_v12   ;;  %vm1251_vm8 = vcmp.eq.f32.partialorder %v5221_v13, %v5064_v24  ;;  %480 = vperm.xlu1 %4259, %v350_v16   ;;  %vm1248_vm9 = vcmp.eq.f32.partialorder %v859_v37, %v5060_v15  ;;  %v3669_v20 = vsel %vm1246_vm7, 1.0, %v4498_v30  ;;  %v7125_v12 = vsub.f32 1.0, %v4896_v44  ;;  %v5268_v51 = vpop.eup %4432 }
 0x131   :  { %v1631_v40 = vmul.bf16 %v4260_v29, %v1439_v59  ;;  %v3671_v0 = vsel %vm1248_vm9, 1.0, %v4498_v30  ;;  %vm1250_vm10 = vcmp.eq.f32.partialorder %v5221_v13, %v5060_v15  ;;  %v1214_v7 = vpack.c.bf16 %v3607_v14, %v3605_v36  ;;  %v97_v59 = vld [vmem:[%s7046_s4 + $0xf0] sm:$0xff] }
 0x132   :  { %4436 = vlog2.f32 %v7125_v12  ;;  %v1438_v48 = vpack.c.bf16 %v3671_v0, %v3669_v20  ;;  %vm1027_vm13 = vcmp.gt.f32.partialorder %v5221_v13, %v5064_v24  ;;  %v3674_v44 = vsel %vm1251_vm8, 1.0, %v4498_v30  ;;  %v4265_v14 = vld [vmem:[%s7048_s6 + $0x10] ss:$8 sps:$4 sm:$0xff]   ;;  %v4435_v0 = vpop.eup %4434 }
 0x133   :  { %v869_v31 = vpop.permute.xlu1 %868  ;;  %v5253_v23 = vpop.permute.xlu0 %928  ;;  %v5255_v37 = vadd.bf16 %v1631_v40, %v1215_v10  ;;  %v323_v49 = vmul.f32 0.6931472, %v4429_v21  ;;  %vm1026_vm0 = vcmp.gt.f32.partialorder %v5221_v13, %v5060_v15  ;;  %v3610_v35 = vsel %vm1027_vm13, 1.0, %v4498_v30 }
 0x134   :  { %vm1252_vm11 = vcmp.eq.f32.partialorder %v869_v31, %v5060_v15  ;;  %vm1253_vm12 = vcmp.eq.f32.partialorder %v869_v31, %v5064_v24  ;;  %2198 = vperm.xlu0 %4258, %v5100_v17   ;;  %490 = vperm.xlu1 %4259, %v352_v9   ;;  %v1630_v18 = vmul.bf16 %v4262_v28, %v1438_v48  ;;  %v4263_v17 = vld [vmem:[%s7048_s6 + $0x14] ss:$8 sps:$4 sm:$0xff]   ;;  %v3673_v20 = vsel %vm1250_vm10, 1.0, %v4498_v30 }
 0x135   :  { %1694 = vmatprep.subr.bf16.mxu1 %v5255_v37  ;;  %vm1029_vm14 = vcmp.gt.f32.partialorder %v869_v31, %v5064_v24  ;;  %v3676_v11 = vsel %vm1253_vm12, 1.0, %v4498_v30  ;;  %vm1028_vm15 = vcmp.gt.f32.partialorder %v869_v31, %v5060_v15  ;;  %v3675_v36 = vsel %vm1252_vm11, 1.0, %v4498_v30 }
 0x136   :  { %v3612_v29 = vsel %vm1029_vm14, 1.0, %v4498_v30  ;;  %v1441_v53 = vpack.c.bf16 %v3676_v11, %v3674_v44  ;;  %v5283_v39 = vadd.bf16 %v1630_v18, %v1214_v7  ;;  %v3611_v10 = vsel %vm1028_vm15, 1.0, %v4498_v30  ;;  %v4268_v11 = vld [vmem:[%s7048_s6 + $0x20] ss:$8 sps:$4 sm:$0xff]  }
 0x137   :  { %v874_v16 = vpop.permute.xlu1 %873  ;;  %v5285_v27 = vpop.permute.xlu0 %938  ;;  %v1217_v40 = vpack.c.bf16 %v3612_v29, %v3610_v35  ;;  %v5307_v28 = vadd.f32 %v2054_v57, %v113_v54  ;;  %v3609_v9 = vsel %vm1026_vm0, 1.0, %v4498_v30  ;;  %4438 = vlog2.f32 %v849_v45 }
 0x138   :  { %vm1255_vm1 = vcmp.eq.f32.partialorder %v874_v16, %v5064_v24  ;;  %2208 = vperm.xlu0 %4258, %v5110_v50   ;;  %1695 = vmatpush1.bf16.msra.mxu1 %v5283_v39  ;;  %vm1254_vm2 = vcmp.eq.f32.partialorder %v874_v16, %v5060_v15  ;;  %v1633_v12 = vmul.bf16 %v4263_v17, %v1441_v53  ;;  %v2058_v57 = vmul.f32 0.6931472, %v5219_v38 }
 0x139   :  { %500 = vperm.xlu1 %4259, %v354_v55   ;;  %v1440_v50 = vpack.c.bf16 %v3675_v36, %v3673_v20  ;;  %v356_v21 = vadd.f32 %v323_v49, %v97_v59  ;;  %v1216_v31 = vpack.c.bf16 %v3611_v10, %v3609_v9  ;;  %vm1031_vm3 = vcmp.gt.f32.partialorder %v874_v16, %v5064_v24  ;;  %v115_v10 = vld [vmem:[%s7047_s5 + $0x80] sm:$0xff] }
 0x13a   :  { %v5318_v48 = vadd.bf16 %v1633_v12, %v1217_v40  ;;  %v3678_v13 = vsel %vm1255_vm1, 1.0, %v4498_v30  ;;  %vm1030_vm6 = vcmp.gt.f32.partialorder %v874_v16, %v5060_v15  ;;  %v3677_v41 = vsel %vm1254_vm2, 1.0, %v4498_v30 }
 0x13b   :  { %v879_v7 = vpop.permute.xlu1 %878  ;;  %v1632_v44 = vmul.bf16 %v4265_v14, %v1440_v50  ;;  %v5331_v45 = vpop.permute.xlu0 %948  ;;  %v3614_v59 = vsel %vm1031_vm3, 1.0, %v4498_v30  ;;  %v2062_v36 = vmul.f32 0.6931472, %v5237_v25  ;;  %v2066_v14 = vmul.f32 0.6931472, %v5246_v33 }
 0x13c   :  { %v4437_v55 = vpop.eup %4436  ;;  %vm1256_vm4 = vcmp.eq.f32.partialorder %v879_v7, %v5060_v15  ;;  %vm1257_vm5 = vcmp.eq.f32.partialorder %v879_v7, %v5064_v24  ;;  %2218 = vperm.xlu0 %4258, %v5112_v26   ;;  %1696 = vmatprep.subr.bf16.mxu1 %v5318_v48  ;;  %vm1033_vm7 = vcmp.gt.f32.partialorder %v879_v7, %v5064_v24  ;;  %v4266_v26 = vld [vmem:[%s7048_s6 + $0x24] ss:$8 sps:$4 sm:$0xff]   ;;  %v3613_v20 = vsel %vm1030_vm6, 1.0, %v4498_v30 }
 0x13d   :  { %510 = vperm.xlu1 %4259, %v356_v21   ;;  %v5334_v38 = vadd.bf16 %v1632_v44, %v1216_v31  ;;  %v3680_v18 = vsel %vm1257_vm5, 1.0, %v4498_v30  ;;  %vm1032_vm8 = vcmp.gt.f32.partialorder %v879_v7, %v5060_v15  ;;  %v3616_v17 = vsel %vm1033_vm7, 1.0, %v4498_v30 }
 0x13e   :  { %v1443_v54 = vpack.c.bf16 %v3680_v18, %v3678_v13  ;;  %v3615_v49 = vsel %vm1032_vm8, 1.0, %v4498_v30  ;;  %v3679_v29 = vsel %vm1256_vm4, 1.0, %v4498_v30  ;;  %v1219_v40 = vpack.c.bf16 %v3616_v17, %v3614_v59  ;;  %v5406_v18 = vld [vmem:[%s7048_s6 + $0x34] ss:$8 sps:$4 sm:$0xff]  }
 0x13f   :  { %1697 = vmatpush1.bf16.msra.mxu1 %v5334_v38  ;;  %v884_v53 = vpop.permute.xlu1 %883  ;;  %v1442_v35 = vpack.c.bf16 %v3679_v29, %v3677_v41  ;;  %v2070_v12 = vmul.f32 0.6931472, %v5257_v58  ;;  %v1218_v50 = vpack.c.bf16 %v3615_v49, %v3613_v20  ;;  %v2074_v33 = vmul.f32 0.6931472, %v5268_v51  ;;  %v117_v58 = vld [vmem:[%s7047_s5 + $0x90] sm:$0xff]  ;;  %v123_v41 = vld [vmem:[%s7047_s5 + $0xc0] sm:$0xff] }
 0x140   :  { %vm1259_vm9 = vcmp.eq.f32.partialorder %v884_v53, %v5064_v24  ;;  %2228 = vperm.xlu0 %4258, %v5140_v52   ;;  %vm1258_vm10 = vcmp.eq.f32.partialorder %v884_v53, %v5060_v15  ;;  %v1635_v9 = vmul.bf16 %v4266_v26, %v1443_v54  ;;  %v2078_v21 = vmul.f32 0.6931472, %v4435_v0  ;;  %v5370_v52 = vpop.permute.xlu0 %958  ;;  %v125_v20 = vld [vmem:[%s7047_s5 + $0xd0] sm:$0xff] }
 0x141   :  { %2123 = vperm.xlu1 %4259, %v5125_v22   ;;  %v1634_v25 = vmul.bf16 %v4268_v11, %v1442_v35  ;;  %v2082_v31 = vmul.f32 0.6931472, %v4437_v55  ;;  %v5368_v7 = vadd.f32 %v2058_v57, %v115_v10  ;;  %vm1035_vm11 = vcmp.gt.f32.partialorder %v884_v53, %v5064_v24  ;;  %v4439_v51 = vpop.eup %4438  ;;  %v119_v57 = vld [vmem:[%s7047_s5 + $0xa0] sm:$0xff]  ;;  %v121_v55 = vld [vmem:[%s7047_s5 + $0xb0] sm:$0xff] }
 0x142   :  { %v5372_v16 = vadd.bf16 %v1635_v9, %v1219_v40  ;;  %v3682_v22 = vsel %vm1259_vm9, 1.0, %v4498_v30  ;;  %vm1034_vm14 = vcmp.gt.f32.partialorder %v884_v53, %v5060_v15  ;;  %v3681_v0 = vsel %vm1258_vm10, 1.0, %v4498_v30  ;;  %v5413_v11 = vld [vmem:[%s7048_s6 + $0x30] ss:$8 sps:$4 sm:$0xff]   ;;  %v127_v9 = vld [vmem:[%s7047_s5 + $0xe0] sm:$0xff] }
 0x143   :  { %v889_v44 = vpop.permute.xlu1 %888  ;;  %v5374_v13 = vadd.bf16 %v1634_v25, %v1218_v50  ;;  %v3618_v59 = vsel %vm1035_vm11, 1.0, %v4498_v30  ;;  %v5421_v35 = vadd.f32 %v2062_v36, %v117_v58  ;;  %v5423_v10 = vadd.f32 %v2066_v14, %v119_v57 }
 0x144   :  { %vm1260_vm12 = vcmp.eq.f32.partialorder %v889_v44, %v5060_v15  ;;  %vm1261_vm13 = vcmp.eq.f32.partialorder %v889_v44, %v5064_v24  ;;  %2238 = vperm.xlu0 %4258, %v5174_v61   ;;  %1698 = vmatprep.subr.bf16.mxu1 %v5372_v16  ;;  %vm1037_vm15 = vcmp.gt.f32.partialorder %v889_v44, %v5064_v24  ;;  %v3617_v36 = vsel %vm1034_vm14, 1.0, %v4498_v30 }
 0x145   :  { %2133 = vperm.xlu1 %4259, %v5130_v60   ;;  %v3684_v61 = vsel %vm1261_vm13, 1.0, %v4498_v30  ;;  %vm1036_vm0 = vcmp.gt.f32.partialorder %v889_v44, %v5060_v15  ;;  %v3683_v26 = vsel %vm1260_vm12, 1.0, %v4498_v30  ;;  %1699 = vmatpush1.bf16.msra.mxu1 %v5374_v13  ;;  %v3620_v60 = vsel %vm1037_vm15, 1.0, %v4498_v30 }
 0x146   :  { %v1445_v17 = vpack.c.bf16 %v3684_v61, %v3682_v22  ;;  %v3619_v54 = vsel %vm1036_vm0, 1.0, %v4498_v30  ;;  %v1444_v49 = vpack.c.bf16 %v3683_v26, %v3681_v0  ;;  %v5425_v40 = vadd.f32 %v2070_v12, %v121_v55  ;;  %v5440_v12 = vpop.permute.xlu0 %968  ;;  %v5485_v55 = vld [vmem:[%s7048_s6 + $0x40] ss:$8 sps:$4 sm:$0xff]  }
 0x147   :  { %v894_v29 = vpop.permute.xlu1 %893  ;;  %v1221_v50 = vpack.c.bf16 %v3620_v60, %v3618_v59  ;;  %v5438_v14 = vadd.f32 %v2074_v33, %v123_v41  ;;  %v1220_v44 = vpack.c.bf16 %v3619_v54, %v3617_v36  ;;  %v5446_v58 = vmul.f32 0.6931472, %v4439_v51  ;;  %v5478_v51 = vld [vmem:[%s7048_s6 + $0x44] ss:$8 sps:$4 sm:$0xff]  }
 0x148   :  { %vm1263_vm1 = vcmp.eq.f32.partialorder %v894_v29, %v5064_v24  ;;  %2248 = vperm.xlu0 %4258, %v5187_v19   ;;  %vm1262_vm2 = vcmp.eq.f32.partialorder %v894_v29, %v5060_v15  ;;  %v1637_v25 = vmul.bf16 %v5406_v18, %v1445_v17  ;;  %v1636_v22 = vmul.bf16 %v5413_v11, %v1444_v49 }
 0x149   :  { %2143 = vperm.xlu1 %4259, %v5167_v8   ;;  %vm1273_vm3 = vcmp.eq.f32.partialorder %v5223_v42, %v5064_v24  ;;  %v5450_v19 = vadd.f32 %v2078_v21, %v125_v20  ;;  %v5452_v53 = vadd.f32 %v2082_v31, %v127_v9  ;;  %vm1039_vm4 = vcmp.gt.f32.partialorder %v894_v29, %v5064_v24 }
 0x14a   :  { %v5454_v0 = vadd.bf16 %v1637_v25, %v1221_v50  ;;  %v5456_v57 = vadd.bf16 %v1636_v22, %v1220_v44  ;;  %v3686_v8 = vsel %vm1263_vm1, 1.0, %v4498_v30  ;;  %vm1272_vm5 = vcmp.eq.f32.partialorder %v5223_v42, %v5060_v15  ;;  %v5490_v60 = vpop.permute.xlu0 %978 }
 0x14b   :  { %v899_v33 = vpop.permute.xlu1 %898  ;;  %vm1038_vm8 = vcmp.gt.f32.partialorder %v894_v29, %v5060_v15  ;;  %v3685_v21 = vsel %vm1262_vm2, 1.0, %v4498_v30  ;;  %v3622_v54 = vsel %vm1039_vm4, 1.0, %v4498_v30  ;;  %vm1049_vm11 = vcmp.gt.f32.partialorder %v5223_v42, %v5064_v24 }
 0x14c   :  { %vm1264_vm6 = vcmp.eq.f32.partialorder %v899_v33, %v5060_v15  ;;  %vm1265_vm7 = vcmp.eq.f32.partialorder %v899_v33, %v5064_v24  ;;  %2258 = vperm.xlu0 %4258, %v5189_v34   ;;  %1700 = vmatprep.subr.bf16.mxu1 %v5454_v0  ;;  %vm1041_vm9 = vcmp.gt.f32.partialorder %v899_v33, %v5064_v24  ;;  %v3621_v49 = vsel %vm1038_vm8, 1.0, %v4498_v30 }
 0x14d   :  { %2153 = vperm.xlu1 %4259, %v5176_v46   ;;  %v3688_v31 = vsel %vm1265_vm7, 1.0, %v4498_v30  ;;  %vm1040_vm10 = vcmp.gt.f32.partialorder %v899_v33, %v5060_v15  ;;  %v3687_v34 = vsel %vm1264_vm6, 1.0, %v4498_v30  ;;  %1701 = vmatpush1.bf16.msra.mxu1 %v5456_v57  ;;  %v3624_v46 = vsel %vm1041_vm9, 1.0, %v4498_v30 }
 0x14e   :  { %v1447_v41 = vpack.c.bf16 %v3688_v31, %v3686_v8  ;;  %v3623_v61 = vsel %vm1040_vm10, 1.0, %v4498_v30  ;;  %v1446_v26 = vpack.c.bf16 %v3687_v34, %v3685_v21  ;;  %vm1048_vm12 = vcmp.gt.f32.partialorder %v5223_v42, %v5060_v15  ;;  %v5538_v8 = vld [vmem:[%s7048_s6 + $0x54] ss:$8 sps:$4 sm:$0xff]   ;;  %v5547_v34 = vld [vmem:[%s7048_s6 + $0x50] ss:$8 sps:$4 sm:$0xff]  }
 0x14f   :  { %v904_v17 = vpop.permute.xlu1 %903  ;;  %vm1277_vm13 = vcmp.eq.f32.partialorder %v5253_v23, %v5064_v24  ;;  %v1223_v59 = vpack.c.bf16 %v3624_v46, %v3622_v54  ;;  %v1222_v20 = vpack.c.bf16 %v3623_v61, %v3621_v49  ;;  %v5513_v50 = vsel %vm1049_vm11, 1.0, %v4498_v30  ;;  %v5578_v42 = vld [vmem:[%s7048_s6 + $0x64] ss:$8 sps:$4 sm:$0xff]  }
 0x150   :  { %vm1267_vm14 = vcmp.eq.f32.partialorder %v904_v17, %v5064_v24  ;;  %2268 = vperm.xlu0 %4258, %v5195_v47   ;;  %vm1266_vm15 = vcmp.eq.f32.partialorder %v904_v17, %v5060_v15  ;;  %v1639_v29 = vmul.bf16 %v5478_v51, %v1447_v41  ;;  %v1638_v9 = vmul.bf16 %v5485_v55, %v1446_v26 }
 0x151   :  { %2163 = vperm.xlu1 %4259, %v5178_v5   ;;  %vm1043_vm0 = vcmp.gt.f32.partialorder %v904_v17, %v5064_v24  ;;  %vm1042_vm1 = vcmp.gt.f32.partialorder %v904_v17, %v5060_v15  ;;  %v3696_v47 = vsel %vm1273_vm3, 1.0, %v4498_v30  ;;  %v5520_v36 = vsel %vm1048_vm12, 1.0, %v4498_v30 }
 0x152   :  { %vm1276_vm2 = vcmp.eq.f32.partialorder %v5253_v23, %v5060_v15  ;;  %v5524_v25 = vadd.bf16 %v1639_v29, %v1223_v59  ;;  %v5526_v44 = vadd.bf16 %v1638_v9, %v1222_v20  ;;  %v3626_v22 = vsel %vm1043_vm0, 1.0, %v4498_v30 }
 0x153   :  { %v909_v5 = vpop.permute.xlu1 %908  ;;  %v3690_v33 = vsel %vm1267_vm14, 1.0, %v4498_v30  ;;  %v3625_v21 = vsel %vm1042_vm1, 1.0, %v4498_v30  ;;  %v3689_v31 = vsel %vm1266_vm15, 1.0, %v4498_v30  ;;  %vm1281_vm6 = vcmp.eq.f32.partialorder %v5285_v27, %v5064_v24 }
 0x154   :  { %vm1268_vm4 = vcmp.eq.f32.partialorder %v909_v5, %v5060_v15  ;;  %vm1269_vm3 = vcmp.eq.f32.partialorder %v909_v5, %v5064_v24  ;;  %2278 = vperm.xlu0 %4258, %v5199_v43   ;;  %v5551_v43 = vpop.permute.xlu0 %988  ;;  %1702 = vmatprep.subr.bf16.mxu1 %v5524_v25  ;;  %vm1045_vm7 = vcmp.gt.f32.partialorder %v909_v5, %v5064_v24  ;;  %v3695_v20 = vsel %vm1272_vm5, 1.0, %v4498_v30 }
 0x155   :  { %2173 = vperm.xlu1 %4259, %v5191_v56   ;;  %v3692_v46 = vsel %vm1269_vm3, 1.0, %v4498_v30  ;;  %vm1044_vm8 = vcmp.gt.f32.partialorder %v909_v5, %v5060_v15  ;;  %v3691_v41 = vsel %vm1268_vm4, 1.0, %v4498_v30  ;;  %1703 = vmatpush1.bf16.msra.mxu1 %v5526_v44  ;;  %v3628_v61 = vsel %vm1045_vm7, 1.0, %v4498_v30 }
 0x156   :  { %v1449_v26 = vpack.c.bf16 %v3692_v46, %v3690_v33  ;;  %v3627_v17 = vsel %vm1044_vm8, 1.0, %v4498_v30  ;;  %v1448_v54 = vpack.c.bf16 %v3691_v41, %v3689_v31  ;;  %v1225_v56 = vpack.c.bf16 %v3628_v61, %v3626_v22  ;;  %v5585_v33 = vld [vmem:[%s7048_s6 + $0x60] ss:$8 sps:$4 sm:$0xff]  }
 0x157   :  { %v914_v49 = vpop.permute.xlu1 %913  ;;  %v1224_v59 = vpack.c.bf16 %v3627_v17, %v3625_v21  ;;  %vm1053_vm9 = vcmp.gt.f32.partialorder %v5253_v23, %v5064_v24  ;;  %vm1052_vm0 = vcmp.gt.f32.partialorder %v5253_v23, %v5060_v15  ;;  %vm1057_vm3 = vcmp.gt.f32.partialorder %v5285_v27, %v5064_v24 }
 0x158   :  { %vm1270_vm10 = vcmp.eq.f32.partialorder %v914_v49, %v5060_v15  ;;  %vm1271_vm11 = vcmp.eq.f32.partialorder %v914_v49, %v5064_v24  ;;  %v1641_v29 = vmul.bf16 %v5538_v8, %v1449_v26  ;;  %v1640_v9 = vmul.bf16 %v5547_v34, %v1448_v54  ;;  %v5592_v41 = vpop.permute.xlu0 %998 }
 0x159   :  { %2183 = vperm.xlu1 %4259, %v5201_v32   ;;  %vm1047_vm12 = vcmp.gt.f32.partialorder %v914_v49, %v5064_v24  ;;  %v3694_v5 = vsel %vm1271_vm11, 1.0, %v4498_v30  ;;  %vm1046_vm5 = vcmp.gt.f32.partialorder %v914_v49, %v5060_v15  ;;  %v3693_v22 = vsel %vm1270_vm10, 1.0, %v4498_v30 }
 0x15a   :  { %v5587_v21 = vadd.bf16 %v1641_v29, %v1225_v56  ;;  %v5589_v32 = vadd.bf16 %v1640_v9, %v1224_v59  ;;  %v3630_v31 = vsel %vm1047_vm12, 1.0, %v4498_v30  ;;  %v1451_v46 = vpack.c.bf16 %v3696_v47, %v3694_v5  ;;  %v5618_v9 = vld [vmem:[%s7048_s6 + $0x74] ss:$8 sps:$4 sm:$0xff]  }
 0x15b   :  { %v924_v61 = vpop.permute.xlu1 %923  ;;  %v3629_v26 = vsel %vm1046_vm5, 1.0, %v4498_v30  ;;  %v1450_v17 = vpack.c.bf16 %v3695_v20, %v3693_v22  ;;  %v3636_v54 = vsel %vm1053_vm9, 1.0, %v4498_v30  ;;  %v3700_v49 = vsel %vm1277_vm13, 1.0, %v4498_v30 }
 0x15c   :  { %7126 = vst [vmem:[#allocation12_spill] sm:$0xff] %v5587_v21  ;;  %7127 = vst [vmem:[#allocation13_spill] sm:$0xff] %v5589_v32  ;;  %vm1274_vm14 = vcmp.eq.f32.partialorder %v924_v61, %v5060_v15  ;;  %vm1275_vm15 = vcmp.eq.f32.partialorder %v924_v61, %v5064_v24  ;;  %1704 = vmatprep.subr.bf16.mxu1 %v5587_v21  ;;  %v1227_v47 = vpack.c.bf16 %v5513_v50, %v3630_v31 }
 0x15d   :  { %2193 = vperm.xlu1 %4259, %v5307_v28   ;;  %1705 = vmatpush1.bf16.msra.mxu1 %v5589_v32  ;;  %v1643_v56 = vmul.bf16 %v5578_v42, %v1451_v46  ;;  %v1226_v59 = vpack.c.bf16 %v5520_v36, %v3629_v26  ;;  %v1642_v20 = vmul.bf16 %v5585_v33, %v1450_v17  ;;  %v3698_v29 = vsel %vm1275_vm15, 1.0, %v4498_v30 }
 0x15e   :  { %vm1051_vm13 = vcmp.gt.f32.partialorder %v924_v61, %v5064_v24  ;;  %v1453_v50 = vpack.c.bf16 %v3700_v49, %v3698_v29  ;;  %vm1050_vm1 = vcmp.gt.f32.partialorder %v924_v61, %v5060_v15  ;;  %v3699_v28 = vsel %vm1276_vm2, 1.0, %v4498_v30  ;;  %v5642_v49 = vpop.permute.xlu0 %1008 }
 0x15f   :  { %v934_v36 = vpop.permute.xlu1 %933  ;;  %v5626_v5 = vadd.bf16 %v1643_v56, %v1227_v47  ;;  %v5628_v22 = vadd.bf16 %v1642_v20, %v1226_v59  ;;  %v3634_v31 = vsel %vm1051_vm13, 1.0, %v4498_v30  ;;  %v3697_v46 = vsel %vm1274_vm14, 1.0, %v4498_v30  ;;  %v5651_v56 = vld [vmem:[%s7048_s6 + $0x70] ss:$8 sps:$4 sm:$0xff]   ;;  %v5657_v20 = vld [vmem:[%s7048_s6 + $0x84] ss:$8 sps:$4 sm:$0xff]  }
 0x160   :  { %vm1279_vm4 = vcmp.eq.f32.partialorder %v934_v36, %v5064_v24  ;;  %v3633_v26 = vsel %vm1050_vm1, 1.0, %v4498_v30  ;;  %v3704_v17 = vsel %vm1281_vm6, 1.0, %v4498_v30  ;;  %vm1278_vm2 = vcmp.eq.f32.partialorder %v934_v36, %v5060_v15 }
 0x161   :  { %7128 = vst [vmem:[#allocation14_spill] sm:$0xff] %v5626_v5  ;;  %7129 = vst [vmem:[#allocation15_spill] sm:$0xff] %v5628_v22  ;;  %2203 = vperm.xlu1 %4259, %v5368_v7   ;;  %1706 = vmatprep.subr.bf16.mxu1 %v5626_v5  ;;  %v1229_v61 = vpack.c.bf16 %v3636_v54, %v3634_v31  ;;  %v1645_v47 = vmul.bf16 %v5618_v9, %v1453_v50  ;;  %v3702_v59 = vsel %vm1279_vm4, 1.0, %v4498_v30  ;;  %v6056_v5 = vld [vmem:[%s7048_s6 + $0xe0] ss:$8 sps:$4 sm:$0xff]  }
 0x162   :  { %1707 = vmatpush1.bf16.msra.mxu1 %v5628_v22  ;;  %v1452_v7 = vpack.c.bf16 %v3699_v28, %v3697_v46  ;;  %vm1055_vm6 = vcmp.gt.f32.partialorder %v934_v36, %v5064_v24  ;;  %v1455_v54 = vpack.c.bf16 %v3704_v17, %v3702_v59  ;;  %vm1054_vm7 = vcmp.gt.f32.partialorder %v934_v36, %v5060_v15  ;;  %v5701_v36 = vpop.permute.xlu0 %365 }
 0x163   :  { %vm1280_vm8 = vcmp.eq.f32.partialorder %v5285_v27, %v5060_v15  ;;  %v944_v29 = vpop.permute.xlu1 %943  ;;  %v5664_v50 = vadd.bf16 %v1645_v47, %v1229_v61  ;;  %v3635_v31 = vsel %vm1052_vm0, 1.0, %v4498_v30  ;;  %v3638_v6 = vsel %vm1055_vm6, 1.0, %v4498_v30  ;;  %v5688_v47 = vld [vmem:[%s7048_s6 + $0x80] ss:$8 sps:$4 sm:$0xff]  }
 0x164   :  { %v1228_v2 = vpack.c.bf16 %v3635_v31, %v3633_v26  ;;  %v3640_v28 = vsel %vm1057_vm3, 1.0, %v4498_v30  ;;  %vm1056_vm9 = vcmp.gt.f32.partialorder %v5285_v27, %v5060_v15  ;;  %v3637_v46 = vsel %vm1054_vm7, 1.0, %v4498_v30 }
 0x165   :  { %7130 = vst [vmem:[#allocation16_spill] sm:$0xff] %v5664_v50  ;;  %2213 = vperm.xlu1 %4259, %v5421_v35   ;;  %1708 = vmatprep.subr.bf16.mxu1 %v5664_v50  ;;  %v1644_v23 = vmul.bf16 %v5651_v56, %v1452_v7  ;;  %v1231_v17 = vpack.c.bf16 %v3640_v28, %v3638_v6  ;;  %v3701_v26 = vsel %vm1278_vm2, 1.0, %v4498_v30  ;;  %v129_v35 = vld [vmem:[%s7047_s5 + $0xf0] sm:$0xff]  ;;  %v3703_v6 = vsel %vm1280_vm8, 1.0, %v4498_v30 }
 0x166   :  { %v1647_v61 = vmul.bf16 %v5657_v20, %v1455_v54  ;;  %vm1285_vm10 = vcmp.eq.f32.partialorder %v5331_v45, %v5064_v24  ;;  %vm1283_vm11 = vcmp.eq.f32.partialorder %v944_v29, %v5064_v24  ;;  %vm1059_vm12 = vcmp.gt.f32.partialorder %v944_v29, %v5064_v24 }
 0x167   :  { %v5703_v59 = vadd.bf16 %v1644_v23, %v1228_v2  ;;  %v954_v7 = vpop.permute.xlu1 %953  ;;  %v3639_v31 = vsel %vm1056_vm9, 1.0, %v4498_v30  ;;  %v1454_v28 = vpack.c.bf16 %v3703_v6, %v3701_v26  ;;  %vm1282_vm5 = vcmp.eq.f32.partialorder %v944_v29, %v5060_v15 }
 0x168   :  { %v5705_v54 = vadd.bf16 %v1647_v61, %v1231_v17  ;;  %v1230_v3 = vpack.c.bf16 %v3639_v31, %v3637_v46  ;;  %vm1061_vm14 = vcmp.gt.f32.partialorder %v5331_v45, %v5064_v24  ;;  %v5715_v4 = vadd.f32 %v5446_v58, %v129_v35  ;;  %v5731_v58 = vld [vmem:[%s7048_s6 + $0x94] ss:$8 sps:$4 sm:$0xff]   ;;  %v5762_v31 = vpop.permute.xlu0 %375 }
 0x169   :  { %7131 = vst [vmem:[#allocation17_spill] sm:$0xff] %v5703_v59  ;;  %1709 = vmatpush1.bf16.msra.mxu1 %v5703_v59  ;;  %2223 = vperm.xlu1 %4259, %v5423_v10   ;;  %v1646_v2 = vmul.bf16 %v5688_v47, %v1454_v28  ;;  %v3642_v23 = vsel %vm1059_vm12, 1.0, %v4498_v30  ;;  %v3706_v27 = vsel %vm1283_vm11, 1.0, %v4498_v30  ;;  %v3708_v46 = vsel %vm1285_vm10, 1.0, %v4498_v30 }
 0x16a   :  { %7132 = vst [vmem:[#allocation18_spill] sm:$0xff] %v5705_v54  ;;  %vm1284_vm15 = vcmp.eq.f32.partialorder %v5331_v45, %v5060_v15  ;;  %1710 = vmatprep.subr.bf16.mxu1 %v5705_v54  ;;  %v1457_v10 = vpack.c.bf16 %v3708_v46, %v3706_v27  ;;  %vm1058_vm0 = vcmp.gt.f32.partialorder %v944_v29, %v5060_v15  ;;  %v3644_v26 = vsel %vm1061_vm14, 1.0, %v4498_v30 }
 0x16b   :  { %vm1287_vm13 = vcmp.eq.f32.partialorder %v954_v7, %v5064_v24  ;;  %v5738_v17 = vadd.bf16 %v1646_v2, %v1230_v3  ;;  %v5740_v61 = vpop.permute.xlu1 %963  ;;  %v3705_v35 = vsel %vm1282_vm5, 1.0, %v4498_v30  ;;  %vm1288_vm1 = vcmp.eq.f32.partialorder %v5370_v52, %v5060_v15  ;;  %v5758_v3 = vld [vmem:[%s7048_s6 + $0x90] ss:$8 sps:$4 sm:$0xff]  }
 0x16c   :  { %vm1289_vm4 = vcmp.eq.f32.partialorder %v5370_v52, %v5064_v24  ;;  %v1233_v6 = vpack.c.bf16 %v3644_v26, %v3642_v23  ;;  %vm1060_vm3 = vcmp.gt.f32.partialorder %v5331_v45, %v5060_v15  ;;  %vm1292_vm2 = vcmp.eq.f32.partialorder %v5440_v12, %v5060_v15  ;;  %v5794_v26 = vld [vmem:[%s7048_s6 + $0xa4] ss:$8 sps:$4 sm:$0xff]  }
 0x16d   :  { %7133 = vst [vmem:[#allocation19_spill] sm:$0xff] %v5738_v17  ;;  %1711 = vmatpush1.bf16.msra.mxu1 %v5738_v17  ;;  %2233 = vperm.xlu1 %4259, %v5425_v40   ;;  %v1649_v28 = vmul.bf16 %v5731_v58, %v1457_v10  ;;  %v3641_v2 = vsel %vm1058_vm0, 1.0, %v4498_v30  ;;  %v3707_v23 = vsel %vm1284_vm15, 1.0, %v4498_v30  ;;  %vm1063_vm6 = vcmp.gt.f32.partialorder %v954_v7, %v5064_v24 }
 0x16e   :  { %vm1293_vm7 = vcmp.eq.f32.partialorder %v5440_v12, %v5064_v24  ;;  %v1456_v27 = vpack.c.bf16 %v3707_v23, %v3705_v35  ;;  %vm1065_vm8 = vcmp.gt.f32.partialorder %v5370_v52, %v5064_v24  ;;  %v3710_v40 = vsel %vm1287_vm13, 1.0, %v4498_v30 }
 0x16f   :  { %vm1286_vm9 = vcmp.eq.f32.partialorder %v954_v7, %v5060_v15  ;;  %v5783_v29 = vadd.bf16 %v1649_v28, %v1233_v6  ;;  %v3643_v46 = vsel %vm1060_vm3, 1.0, %v4498_v30  ;;  %v5789_v10 = vpop.permute.xlu1 %973  ;;  %vm1062_vm10 = vcmp.gt.f32.partialorder %v954_v7, %v5060_v15 }
 0x170   :  { %v1232_v35 = vpack.c.bf16 %v3643_v46, %v3641_v2  ;;  %v1648_v23 = vmul.bf16 %v5758_v3, %v1456_v27  ;;  %v3646_v6 = vsel %vm1063_vm6, 1.0, %v4498_v30  ;;  %v3712_v45 = vsel %vm1289_vm4, 1.0, %v4498_v30  ;;  %v5812_v27 = vld [vmem:[%s7048_s6 + $0xa0] ss:$8 sps:$4 sm:$0xff]  }
 0x171   :  { %7134 = vst [vmem:[#allocation20_spill] sm:$0xff] %v5783_v29  ;;  %vm1291_vm11 = vcmp.eq.f32.partialorder %v5740_v61, %v5064_v24  ;;  %1712 = vmatprep.subr.bf16.mxu1 %v5783_v29  ;;  %2243 = vperm.xlu1 %4259, %v5438_v14   ;;  %v3648_v28 = vsel %vm1065_vm8, 1.0, %v4498_v30  ;;  %v1459_v62 = vpack.c.bf16 %v3712_v45, %v3710_v40  ;;  %v3645_v2 = vsel %vm1062_vm10, 1.0, %v4498_v30  ;;  %v5825_v40 = vpop.permute.xlu0 %385 }
 0x172   :  { %v5814_v46 = vadd.bf16 %v1648_v23, %v1232_v35  ;;  %vm1064_vm12 = vcmp.gt.f32.partialorder %v5370_v52, %v5060_v15  ;;  %v3709_v29 = vsel %vm1286_vm9, 1.0, %v4498_v30  ;;  %v3711_v14 = vsel %vm1288_vm1, 1.0, %v4498_v30  ;;  %v5849_v23 = vld [vmem:[%s7048_s6 + $0xb4] ss:$8 sps:$4 sm:$0xff]  }
 0x173   :  { %v1235_v45 = vpack.c.bf16 %v3648_v28, %v3646_v6  ;;  %v1651_v17 = vmul.bf16 %v5794_v26, %v1459_v62  ;;  %v1458_v54 = vpack.c.bf16 %v3711_v14, %v3709_v29  ;;  %v5828_v35 = vpop.permute.xlu1 %983  ;;  %vm1067_vm5 = vcmp.gt.f32.partialorder %v5740_v61, %v5064_v24  ;;  %v5871_v14 = vld [vmem:[%s7048_s6 + $0xb0] ss:$8 sps:$4 sm:$0xff]  }
 0x174   :  { %7135 = vst [vmem:[#allocation21_spill] sm:$0xff] %v5814_v46  ;;  %vm1296_vm14 = vcmp.eq.f32.partialorder %v5490_v60, %v5060_v15  ;;  %vm1297_vm15 = vcmp.eq.f32.partialorder %v5490_v60, %v5064_v24  ;;  %vm1290_vm0 = vcmp.eq.f32.partialorder %v5740_v61, %v5060_v15  ;;  %1713 = vmatpush1.bf16.msra.mxu1 %v5814_v46  ;;  %v3647_v52 = vsel %vm1064_vm12, 1.0, %v4498_v30 }
 0x175   :  { %v5840_v62 = vadd.bf16 %v1651_v17, %v1235_v45  ;;  %v1234_v7 = vpack.c.bf16 %v3647_v52, %v3645_v2  ;;  %v1650_v29 = vmul.bf16 %v5812_v27, %v1458_v54  ;;  %2253 = vperm.xlu1 %4259, %v5450_v19   ;;  %vm1069_vm13 = vcmp.gt.f32.partialorder %v5440_v12, %v5064_v24 }
 0x176   :  { %vm1295_vm1 = vcmp.eq.f32.partialorder %v5789_v10, %v5064_v24  ;;  %v3650_v6 = vsel %vm1067_vm5, 1.0, %v4498_v30  ;;  %v3714_v54 = vsel %vm1291_vm11, 1.0, %v4498_v30  ;;  %v3716_v19 = vsel %vm1293_vm7, 1.0, %v4498_v30 }
 0x177   :  { %7136 = vst [vmem:[#allocation22_spill] sm:$0xff] %v5840_v62  ;;  %1714 = vmatprep.subr.bf16.mxu1 %v5840_v62  ;;  %v5863_v17 = vadd.bf16 %v1650_v29, %v1234_v7  ;;  %v3652_v28 = vsel %vm1069_vm13, 1.0, %v4498_v30  ;;  %v1461_v2 = vpack.c.bf16 %v3716_v19, %v3714_v54  ;;  %vm1066_vm4 = vcmp.gt.f32.partialorder %v5740_v61, %v5060_v15  ;;  %v5873_v45 = vpop.permute.xlu1 %993  ;;  %v5886_v54 = vpop.permute.xlu0 %395 }
 0x178   :  { %vm1068_vm3 = vcmp.gt.f32.partialorder %v5440_v12, %v5060_v15  ;;  %v3649_v52 = vsel %vm1066_vm4, 1.0, %v4498_v30  ;;  %v3713_v7 = vsel %vm1290_vm0, 1.0, %v4498_v30  ;;  %v3715_v29 = vsel %vm1292_vm2, 1.0, %v4498_v30 }
 0x179   :  { %7137 = vst [vmem:[#allocation23_spill] sm:$0xff] %v5863_v17  ;;  %1715 = vmatpush1.bf16.msra.mxu1 %v5863_v17  ;;  %v1237_v19 = vpack.c.bf16 %v3652_v28, %v3650_v6  ;;  %v1653_v62 = vmul.bf16 %v5849_v23, %v1461_v2  ;;  %v3651_v46 = vsel %vm1068_vm3, 1.0, %v4498_v30  ;;  %v1460_v59 = vpack.c.bf16 %v3715_v29, %v3713_v7  ;;  %v5932_v29 = vld [vmem:[%s7048_s6 + $0xc0] ss:$8 sps:$4 sm:$0xff]  }
 0x17a   :  { %2263 = vperm.xlu1 %4259, %v5452_v53   ;;  %vm1300_vm6 = vcmp.eq.f32.partialorder %v5551_v43, %v5060_v15  ;;  %vm1301_vm7 = vcmp.eq.f32.partialorder %v5551_v43, %v5064_v24  ;;  %vm1294_vm2 = vcmp.eq.f32.partialorder %v5789_v10, %v5060_v15  ;;  %v1236_v12 = vpack.c.bf16 %v3651_v46, %v3649_v52  ;;  %v5908_v53 = vld [vmem:[%s7048_s6 + $0xc4] ss:$8 sps:$4 sm:$0xff]  }
 0x17b   :  { %v5898_v61 = vadd.bf16 %v1653_v62, %v1237_v19  ;;  %v1652_v6 = vmul.bf16 %v5871_v14, %v1460_v59  ;;  %vm1071_vm8 = vcmp.gt.f32.partialorder %v5789_v10, %v5064_v24  ;;  %vm1073_vm9 = vcmp.gt.f32.partialorder %v5490_v60, %v5064_v24  ;;  %v5910_v28 = vpop.permute.xlu1 %1003 }
 0x17c   :  { %vm1299_vm10 = vcmp.eq.f32.partialorder %v5828_v35, %v5064_v24  ;;  %v3654_v46 = vsel %vm1071_vm8, 1.0, %v4498_v30  ;;  %v3718_v59 = vsel %vm1295_vm1, 1.0, %v4498_v30  ;;  %v3720_v62 = vsel %vm1297_vm15, 1.0, %v4498_v30 }
 0x17d   :  { %7138 = vst [vmem:[#allocation24_spill] sm:$0xff] %v5898_v61  ;;  %1716 = vmatprep.subr.bf16.mxu1 %v5898_v61  ;;  %v5924_v2 = vadd.bf16 %v1652_v6, %v1236_v12  ;;  %v3656_v52 = vsel %vm1073_vm9, 1.0, %v4498_v30  ;;  %v1463_v7 = vpack.c.bf16 %v3720_v62, %v3718_v59  ;;  %vm1070_vm11 = vcmp.gt.f32.partialorder %v5789_v10, %v5060_v15  ;;  %v5946_v59 = vpop.permute.xlu0 %405 }
 0x17e   :  { %vm1072_vm12 = vcmp.gt.f32.partialorder %v5490_v60, %v5060_v15  ;;  %v3653_v19 = vsel %vm1070_vm11, 1.0, %v4498_v30  ;;  %v3717_v12 = vsel %vm1294_vm2, 1.0, %v4498_v30  ;;  %v3719_v6 = vsel %vm1296_vm14, 1.0, %v4498_v30  ;;  %2273 = vperm.xlu1 %4259, %v5715_v4  }
 0x17f   :  { %7139 = vst [vmem:[#allocation25_spill] sm:$0xff] %v5924_v2  ;;  %1717 = vmatpush1.bf16.msra.mxu1 %v5924_v2  ;;  %v1239_v62 = vpack.c.bf16 %v3656_v52, %v3654_v46  ;;  %v1655_v61 = vmul.bf16 %v5908_v53, %v1463_v7  ;;  %v3655_v17 = vsel %vm1072_vm12, 1.0, %v4498_v30  ;;  %v1462_v50 = vpack.c.bf16 %v3719_v6, %v3717_v12  ;;  %v5951_v22 = vpop.permute.xlu1 %360  ;;  %v5969_v46 = vld [vmem:[%s7048_s6 + $0xd4] ss:$8 sps:$4 sm:$0xff]   ;;  %v5993_v12 = vld [vmem:[%s7048_s6 + $0xd0] ss:$8 sps:$4 sm:$0xff]  }
 0x180   :  { %vm1304_vm5 = vcmp.eq.f32.partialorder %v5592_v41, %v5060_v15  ;;  %vm1305_vm14 = vcmp.eq.f32.partialorder %v5592_v41, %v5064_v24  ;;  %vm1298_vm15 = vcmp.eq.f32.partialorder %v5828_v35, %v5060_v15  ;;  %v1238_v4 = vpack.c.bf16 %v3655_v17, %v3653_v19 }
 0x181   :  { %v5959_v60 = vadd.bf16 %v1655_v61, %v1239_v62  ;;  %v1654_v10 = vmul.bf16 %v5932_v29, %v1462_v50  ;;  %vm1075_vm0 = vcmp.gt.f32.partialorder %v5828_v35, %v5064_v24  ;;  %vm1077_vm13 = vcmp.gt.f32.partialorder %v5551_v43, %v5064_v24 }
 0x182   :  { %vm1302_vm1 = vcmp.eq.f32.partialorder %v5873_v45, %v5060_v15  ;;  %v3658_v17 = vsel %vm1075_vm0, 1.0, %v4498_v30  ;;  %v3722_v50 = vsel %vm1299_vm10, 1.0, %v4498_v30  ;;  %v3724_v61 = vsel %vm1301_vm7, 1.0, %v4498_v30 }
 0x183   :  { %7140 = vst [vmem:[#allocation26_spill] sm:$0xff] %v5959_v60  ;;  %vm1309_vm4 = vcmp.eq.f32.partialorder %v5642_v49, %v5064_v24  ;;  %1718 = vmatprep.subr.bf16.mxu1 %v5959_v60  ;;  %v5985_v52 = vadd.bf16 %v1654_v10, %v1238_v4  ;;  %v3660_v7 = vsel %vm1077_vm13, 1.0, %v4498_v30  ;;  %v1465_v19 = vpack.c.bf16 %v3724_v61, %v3722_v50  ;;  %v5995_v6 = vpop.permute.xlu1 %370  ;;  %v6010_v50 = vpop.permute.xlu0 %415 }
 0x184   :  { %vm1074_vm3 = vcmp.gt.f32.partialorder %v5828_v35, %v5060_v15  ;;  %vm536_vm7 = vcmp.gt.f32.partialorder %v5762_v31, %v5087_v1  ;;  %vm1076_vm2 = vcmp.gt.f32.partialorder %v5551_v43, %v5060_v15  ;;  %v3721_v4 = vsel %vm1298_vm15, 1.0, %v4498_v30 }
 0x185   :  { %7141 = vst [vmem:[#allocation27_spill] sm:$0xff] %v5985_v52  ;;  %v3657_v62 = vsel %vm1074_vm3, 1.0, %v4498_v30  ;;  %v3723_v10 = vsel %vm1300_vm6, 1.0, %v4498_v30  ;;  %vm1303_vm8 = vcmp.eq.f32.partialorder %v5873_v45, %v5064_v24  ;;  %1719 = vmatpush1.bf16.msra.mxu1 %v5985_v52  ;;  %v1241_v61 = vpack.c.bf16 %v3660_v7, %v3658_v17 }
 0x186   :  { %v1657_v60 = vmul.bf16 %v5969_v46, %v1465_v19  ;;  %v1464_v2 = vpack.c.bf16 %v3723_v10, %v3721_v4  ;;  %vm1308_vm9 = vcmp.eq.f32.partialorder %v5642_v49, %v5060_v15  ;;  %vm1307_vm10 = vcmp.eq.f32.partialorder %v5910_v28, %v5064_v24  ;;  %v6032_v4 = vld [vmem:[%s7048_s6 + $0xe4] ss:$8 sps:$4 sm:$0xff]  }
 0x187   :  { %v3659_v43 = vsel %vm1076_vm2, 1.0, %v4498_v30  ;;  %vm1079_vm6 = vcmp.gt.f32.partialorder %v5873_v45, %v5064_v24  ;;  %vm1081_vm11 = vcmp.gt.f32.partialorder %v5592_v41, %v5064_v24  ;;  %v6034_v10 = vpop.permute.xlu1 %380  ;;  %vm1078_vm12 = vcmp.gt.f32.partialorder %v5873_v45, %v5060_v15 }
 0x188   :  { %v6025_v35 = vadd.bf16 %v1657_v60, %v1241_v61  ;;  %v1240_v17 = vpack.c.bf16 %v3659_v43, %v3657_v62  ;;  %v1656_v7 = vmul.bf16 %v5993_v12, %v1464_v2  ;;  %v3662_v19 = vsel %vm1079_vm6, 1.0, %v4498_v30 }
 0x189   :  { %v3664_v52 = vsel %vm1081_vm11, 1.0, %v4498_v30  ;;  %v3726_v60 = vsel %vm1303_vm8, 1.0, %v4498_v30  ;;  %v3728_v2 = vsel %vm1305_vm14, 1.0, %v4498_v30  ;;  %vm1080_vm15 = vcmp.gt.f32.partialorder %v5592_v41, %v5060_v15 }
 0x18a   :  { %1720 = vmatprep.subr.bf16.mxu1 %v6025_v35  ;;  %v6048_v62 = vadd.bf16 %v1656_v7, %v1240_v17  ;;  %v1467_v61 = vpack.c.bf16 %v3728_v2, %v3726_v60  ;;  %v3661_v43 = vsel %vm1078_vm12, 1.0, %v4498_v30  ;;  %v1243_v32 = vpack.c.bf16 %v3664_v52, %v3662_v19  ;;  %v6068_v7 = vpop.permute.xlu0 %425 }
 0x18b   :  { %v3725_v21 = vsel %vm1302_vm1, 1.0, %v4498_v30  ;;  %v3727_v17 = vsel %vm1304_vm5, 1.0, %v4498_v30  ;;  %vm530_vm14 = vcmp.gt.f32.partialorder %v5951_v22, %v5087_v1  ;;  %v3663_v52 = vsel %vm1080_vm15, 1.0, %v4498_v30  ;;  %v6075_v45 = vpop.permute.xlu1 %390 }
 0x18c   :  { %7142 = vst [vmem:[#allocation28_spill] sm:$0xff] %v6048_v62  ;;  %1721 = vmatpush1.bf16.msra.mxu1 %v6048_v62  ;;  %v1659_v60 = vmul.bf16 %v6032_v4, %v1467_v61  ;;  %v1466_v19 = vpack.c.bf16 %v3727_v17, %v3725_v21  ;;  %vm532_vm0 = vcmp.gt.f32.partialorder %v5701_v36, %v5087_v1  ;;  %v7088_v61 = vmov 1.0|1.0  }
 0x18d   :  { %vm1306_vm5 = vcmp.eq.f32.partialorder %v5910_v28, %v5060_v15  ;;  %v1242_v41 = vpack.c.bf16 %v3663_v52, %v3661_v43  ;;  %vm3541_vm13 = vmpackc.low %vm532_vm0, %vm530_vm14  ;;  %vm533_vm1 = vcmp.gt.f32.partialorder %v5995_v6, %v5069_v63  ;;  %vm534_vm3 = vcmp.gt.f32.partialorder %v5995_v6, %v5087_v1  ;;  %v6094_v43 = vld [vmem:[%s7048_s6 + $0xf4] ss:$8 sps:$4 sm:$0xff]  }
 0x18e   :  { %v6083_v2 = vadd.bf16 %v1659_v60, %v1243_v32  ;;  %v1658_v21 = vmul.bf16 %v6056_v5, %v1466_v19  ;;  %3542 = vmatprep.subr.msk.bf16.mxu0 %vm3541_vm13, %v7088_v61  ;;  %vm529_vm2 = vcmp.gt.f32.partialorder %v5951_v22, %v5069_v63  ;;  %vm531_vm8 = vcmp.gt.f32.partialorder %v5701_v36, %v5069_v63  ;;  %vm6099_vm6 = vmpackc.low %vm536_vm7, %vm534_vm3 }
 0x18f   :  { %vm3543_vm11 = vmpackc.low %vm531_vm8, %vm529_vm2  ;;  %vm1083_vm12 = vcmp.gt.f32.partialorder %v5910_v28, %v5064_v24  ;;  %vm1085_vm15 = vcmp.gt.f32.partialorder %v5642_v49, %v5064_v24  ;;  %v3730_v22 = vsel %vm1307_vm10, 1.0, %v4498_v30  ;;  %v3732_v36 = vsel %vm1309_vm4, 1.0, %v4498_v30  ;;  %v401_v19 = vpop.permute.xlu1 %400 }
 0x190   :  { %vm535_vm7 = vcmp.gt.f32.partialorder %v5762_v31, %v5069_v63  ;;  %1722 = vmatprep.subr.bf16.mxu1 %v6083_v2  ;;  %v6118_v17 = vadd.bf16 %v1658_v21, %v1242_v41  ;;  %3544 = vmatpush1.bf16.msk.msra.mxu0 %vm3543_vm11, %v7088_v61  ;;  %v3666_v60 = vsel %vm1083_vm12, 1.0, %v4498_v30  ;;  %v1469_v52 = vpack.c.bf16 %v3732_v36, %v3730_v22  ;;  %v6134_v31 = vld [vmem:[%s7048_s6 + $0xf0] ss:$8 sps:$4 sm:$0xff]   ;;  %v6142_v41 = vpop.permute.xlu0 %435 }
 0x191   :  { %v3668_v62 = vsel %vm1085_vm15, 1.0, %v4498_v30  ;;  %vm1082_vm10 = vcmp.gt.f32.partialorder %v5910_v28, %v5060_v15  ;;  %vm1084_vm4 = vcmp.gt.f32.partialorder %v5642_v49, %v5060_v15  ;;  %v3729_v24 = vsel %vm1306_vm5, 1.0, %v4498_v30  ;;  %3546 = vmatprep.subr.msk.bf16.mxu0 %vm6099_vm6, %v7088_v61  ;;  %vm3547_vm14 = vmpackc.low %vm535_vm7, %vm533_vm1 }
 0x192   :  { %1723 = vmatpush1.bf16.msra.mxu1 %v6118_v17  ;;  %v1245_v21 = vpack.c.bf16 %v3668_v62, %v3666_v60  ;;  %v1661_v28 = vmul.bf16 %v6094_v43, %v1469_v52  ;;  %v3665_v22 = vsel %vm1082_vm10, 1.0, %v4498_v30  ;;  %v3731_v36 = vsel %vm1308_vm9, 1.0, %v4498_v30  ;;  %v4443_v52 = vld [vmem:[%s7048_s6] ss:$8 sps:$4 sm:$0xff]  }
 0x193   :  { %vm540_vm0 = vcmp.gt.f32.partialorder %v5825_v40, %v5087_v1  ;;  %v1468_v32 = vpack.c.bf16 %v3731_v36, %v3729_v24  ;;  %v3667_v61 = vsel %vm1084_vm4, 1.0, %v4498_v30  ;;  %vm537_vm5 = vcmp.gt.f32.partialorder %v6034_v10, %v5069_v63  ;;  %v411_v60 = vpop.permute.xlu1 %410  ;;  %v4447_v36 = vld [vmem:[%s7048_s6 + $0x20] ss:$8 sps:$4 sm:$0xff]  }
 0x194   :  { %v6153_v6 = vadd.bf16 %v1661_v28, %v1245_v21  ;;  %vm538_vm13 = vcmp.gt.f32.partialorder %v6034_v10, %v5087_v1  ;;  %v7145_v62 = vmov 1.0|1.0   ;;  %vm539_vm9 = vcmp.gt.f32.partialorder %v5825_v40, %v5069_v63  ;;  %v6177_v40 = vpop.permute.xlu0 %445  ;;  %v4445_v21 = vld [vmem:[%s7048_s6 + $0x10] ss:$8 sps:$4 sm:$0xff]  }
 0x195   :  { %3548 = vmatpush1.bf16.msk.msra.mxu0 %vm3547_vm14, %v7145_v62  ;;  %v1244_v15 = vpack.c.bf16 %v3667_v61, %v3665_v22  ;;  %v1660_v49 = vmul.bf16 %v6134_v31, %v1468_v32  ;;  %vm3549_vm1 = vmpackc.low %vm540_vm0, %vm538_vm13  ;;  %vm542_vm3 = vcmp.gt.f32.partialorder %v6075_v45, %v5087_v1  ;;  %vm544_vm2 = vcmp.gt.f32.partialorder %v5886_v54, %v5087_v1 }
 0x196   :  { %1724 = vmatprep.subr.bf16.mxu1 %v6153_v6  ;;  %3550 = vmatprep.subr.msk.bf16.mxu0 %vm3549_vm1, %v7145_v62  ;;  %vm541_vm8 = vcmp.gt.f32.partialorder %v6075_v45, %v5069_v63  ;;  %vm3551_vm6 = vmpackc.low %vm539_vm9, %vm537_vm5  ;;  %vm546_vm12 = vcmp.gt.f32.partialorder %v401_v19, %v5087_v1  ;;  %vm543_vm15 = vcmp.gt.f32.partialorder %v5886_v54, %v5069_v63  ;;  %v4442_v54 = vld [vmem:[%s7048_s6 + $0x4] ss:$8 sps:$4 sm:$0xff]   ;;  %v7146_v45 = vmov 1065369472  }
 0x197   :  { %v6172_v30 = vadd.bf16 %v1660_v49, %v1244_v15  ;;  %vm3553_vm11 = vmpackc.low %vm544_vm2, %vm542_vm3  ;;  %v421_v10 = vpop.permute.xlu1 %420  ;;  %vm548_vm7 = vcmp.gt.f32.partialorder %v5946_v59, %v5087_v1  ;;  %vm545_vm4 = vcmp.gt.f32.partialorder %v401_v19, %v5069_v63  ;;  %vm550_vm0 = vcmp.gt.f32.partialorder %v411_v60, %v5087_v1 }
 0x198   :  { %vm3555_vm10 = vmpackc.low %vm543_vm15, %vm541_vm8  ;;  %vm547_vm5 = vcmp.gt.f32.partialorder %v5946_v59, %v5069_v63  ;;  %vm552_vm13 = vcmp.gt.f32.partialorder %v6010_v50, %v5087_v1  ;;  %v456_v19 = vpop.permute.xlu0 %455  ;;  %vm549_vm1 = vcmp.gt.f32.partialorder %v411_v60, %v5069_v63  ;;  %v4444_v59 = vld [vmem:[%s7048_s6 + $0x14] ss:$8 sps:$4 sm:$0xff]   ;;  %vm554_vm2 = vcmp.gt.f32.partialorder %v421_v10, %v5087_v1 }
 0x199   :  { %3552 = vmatpush1.bf16.msk.msra.mxu0 %vm3551_vm6, %v7145_v62  ;;  %1725 = vmatpush1.bf16.msra.mxu1 %v6172_v30  ;;  %vm3557_vm14 = vmpackc.low %vm548_vm7, %vm546_vm12  ;;  %vm551_vm8 = vcmp.gt.f32.partialorder %v6010_v50, %v5069_v63  ;;  %vm556_vm6 = vcmp.gt.f32.partialorder %v6068_v7, %v5087_v1  ;;  %vm553_vm12 = vcmp.gt.f32.partialorder %v421_v10, %v5069_v63  ;;  %v4446_v50 = vld [vmem:[%s7048_s6 + $0x24] ss:$8 sps:$4 sm:$0xff]  }
 0x19a   :  { %3554 = vmatprep.subr.msk.bf16.mxu0 %vm3553_vm11, %v7145_v62  ;;  %1968 = vmatprep.subr.bf16.mxu1 %v4442_v54  ;;  %vm3559_vm9 = vmpackc.low %vm547_vm5, %vm545_vm4  ;;  %vm560_vm4 = vcmp.gt.f32.partialorder %v6142_v41, %v5087_v1 }
 0x19b   :  { %v431_v61 = vpop.permute.xlu1 %430  ;;  %vm3561_vm3 = vmpackc.low %vm552_vm13, %vm550_vm0 }
 0x19c   :  { %1727 = vmatmul.mubr.bf16.vlgmr.msra.gmra.mrb[0].mxu1 %v7146_v45  ;;  %vm3563_vm11 = vmpackc.low %vm551_vm8, %vm549_vm1  ;;  %vm558_vm7 = vcmp.gt.f32.partialorder %v431_v61, %v5087_v1  ;;  %v466_v28 = vpop.permute.xlu0 %465  ;;  %vm557_vm0 = vcmp.gt.f32.partialorder %v431_v61, %v5069_v63  ;;  %vm564_vm1 = vcmp.gt.f32.partialorder %v6177_v40, %v5087_v1 }
 0x19d   :  { %3556 = vmatpush1.bf16.msk.msra.mxu0 %vm3555_vm10, %v7145_v62  ;;  %1969 = vmatpush1.bf16.msra.mxu1 %v4443_v52  ;;  %vm3565_vm15 = vmpackc.low %vm556_vm6, %vm554_vm2  ;;  %vm555_vm10 = vcmp.gt.f32.partialorder %v6068_v7, %v5069_v63 }
 0x19e   :  { %3558 = vmatprep.subr.msk.bf16.mxu0 %vm3557_vm14, %v7145_v62  ;;  %1970 = vmatprep.subr.bf16.mxu1 %v4444_v59  ;;  %vm3567_vm14 = vmpackc.low %vm555_vm10, %vm553_vm12  ;;  %vm568_vm12 = vcmp.gt.f32.partialorder %v456_v19, %v5087_v1  ;;  %v7167_v59 = vmov 0  }
 0x19f   :  { %v441_v24 = vpop.permute.xlu1 %440  ;;  %vm3569_vm5 = vmpackc.low %vm560_vm4, %vm558_vm7 }
 0x1a0   :  { %vm562_vm13 = vcmp.gt.f32.partialorder %v441_v24, %v5087_v1  ;;  %v476_v32 = vpop.permute.xlu0 %475  ;;  %vm561_vm2 = vcmp.gt.f32.partialorder %v441_v24, %v5069_v63 }
 0x1a1   :  { %3560 = vmatpush1.bf16.msk.msra.mxu0 %vm3559_vm9, %v7145_v62  ;;  %1971 = vmatpush1.bf16.msra.mxu1 %v4445_v21  ;;  %vm559_vm9 = vcmp.gt.f32.partialorder %v6142_v41, %v5069_v63  ;;  %vm3573_vm8 = vmpackc.low %vm564_vm1, %vm562_vm13 }
 0x1a2   :  { %3562 = vmatprep.subr.msk.bf16.mxu0 %vm3561_vm3, %v7145_v62  ;;  %1972 = vmatprep.subr.bf16.mxu1 %v4446_v50  ;;  %vm3571_vm3 = vmpackc.low %vm559_vm9, %vm557_vm0  ;;  %vm572_vm0 = vcmp.gt.f32.partialorder %v466_v28, %v5087_v1 }
 0x1a3   :  { %v451_v22 = vpop.permute.xlu1 %450 }
 0x1a4   :  { %vm566_vm6 = vcmp.gt.f32.partialorder %v451_v22, %v5087_v1  ;;  %vm565_vm7 = vcmp.gt.f32.partialorder %v451_v22, %v5069_v63 }
 0x1a5   :  { %3564 = vmatpush1.bf16.msk.msra.mxu0 %vm3563_vm11, %v7145_v62  ;;  %1973 = vmatpush1.bf16.msra.mxu1 %v4447_v36  ;;  %vm563_vm11 = vcmp.gt.f32.partialorder %v6177_v40, %v5069_v63  ;;  %vm3577_vm10 = vmpackc.low %vm568_vm12, %vm566_vm6 }
 0x1a6   :  { %3566 = vmatprep.subr.msk.bf16.mxu0 %vm3565_vm15, %v7145_v62  ;;  %1974 = vmatprep.subr.bf16.mxu1 %v5406_v18  ;;  %vm3575_vm15 = vmpackc.low %vm563_vm11, %vm561_vm2  ;;  %vm576_vm2 = vcmp.gt.f32.partialorder %v476_v32, %v5087_v1 }
 0x1a7   :  { %v461_v7 = vpop.permute.xlu1 %460 }
 0x1a8   :  { %vm570_vm4 = vcmp.gt.f32.partialorder %v461_v7, %v5087_v1  ;;  %vm569_vm13 = vcmp.gt.f32.partialorder %v461_v7, %v5069_v63 }
 0x1a9   :  { %3568 = vmatpush1.bf16.msk.msra.mxu0 %vm3567_vm14, %v7145_v62  ;;  %1975 = vmatpush1.bf16.msra.mxu1 %v5413_v11  ;;  %vm567_vm14 = vcmp.gt.f32.partialorder %v456_v19, %v5069_v63  ;;  %v486_v11 = vpop.permute.xlu0 %485  ;;  %vm3581_vm9 = vmpackc.low %vm572_vm0, %vm570_vm4 }
 0x1aa   :  { %3570 = vmatprep.subr.msk.bf16.mxu0 %vm3569_vm5, %v7145_v62  ;;  %1976 = vmatprep.subr.bf16.mxu1 %v5478_v51  ;;  %vm3579_vm5 = vmpackc.low %vm567_vm14, %vm565_vm7  ;;  %vm580_vm7 = vcmp.gt.f32.partialorder %v486_v11, %v5087_v1 }
 0x1ab   :  { %v471_v18 = vpop.permute.xlu1 %470 }
 0x1ac   :  { %vm574_vm1 = vcmp.gt.f32.partialorder %v471_v18, %v5087_v1  ;;  %vm573_vm6 = vcmp.gt.f32.partialorder %v471_v18, %v5069_v63 }
 0x1ad   :  { %3572 = vmatpush1.bf16.msk.msra.mxu0 %vm3571_vm3, %v7145_v62  ;;  %1977 = vmatpush1.bf16.msra.mxu1 %v5485_v55  ;;  %vm571_vm3 = vcmp.gt.f32.partialorder %v466_v28, %v5069_v63  ;;  %vm3585_vm11 = vmpackc.low %vm576_vm2, %vm574_vm1 }
 0x1ae   :  { %3574 = vmatprep.subr.msk.bf16.mxu0 %vm3573_vm8, %v7145_v62  ;;  %1978 = vmatprep.subr.bf16.mxu1 %v5538_v8  ;;  %vm3583_vm8 = vmpackc.low %vm571_vm3, %vm569_vm13  ;;  %v496_v8 = vpop.permute.xlu0 %495 }
 0x1af   :  { %v481_v51 = vpop.permute.xlu1 %480  ;;  %vm584_vm13 = vcmp.gt.f32.partialorder %v496_v8, %v5087_v1 }
 0x1b0   :  { %vm578_vm12 = vcmp.gt.f32.partialorder %v481_v51, %v5087_v1  ;;  %vm577_vm4 = vcmp.gt.f32.partialorder %v481_v51, %v5069_v63 }
 0x1b1   :  { %3576 = vmatpush1.bf16.msk.msra.mxu0 %vm3575_vm15, %v7145_v62  ;;  %1979 = vmatpush1.bf16.msra.mxu1 %v5547_v34  ;;  %vm575_vm15 = vcmp.gt.f32.partialorder %v476_v32, %v5069_v63  ;;  %vm3589_vm14 = vmpackc.low %vm580_vm7, %vm578_vm12 }
 0x1b2   :  { %3578 = vmatprep.subr.msk.bf16.mxu0 %vm3577_vm10, %v7145_v62  ;;  %1980 = vmatprep.subr.bf16.mxu1 %v5578_v42  ;;  %vm3587_vm10 = vmpackc.low %vm575_vm15, %vm573_vm6  ;;  %v506_v42 = vpop.permute.xlu0 %505 }
 0x1b3   :  { %v491_v55 = vpop.permute.xlu1 %490  ;;  %vm588_vm6 = vcmp.gt.f32.partialorder %v506_v42, %v5087_v1 }
 0x1b4   :  { %vm582_vm0 = vcmp.gt.f32.partialorder %v491_v55, %v5087_v1  ;;  %vm581_vm1 = vcmp.gt.f32.partialorder %v491_v55, %v5069_v63 }
 0x1b5   :  { %3580 = vmatpush1.bf16.msk.msra.mxu0 %vm3579_vm5, %v7145_v62  ;;  %1981 = vmatpush1.bf16.msra.mxu1 %v5585_v33  ;;  %vm579_vm5 = vcmp.gt.f32.partialorder %v486_v11, %v5069_v63  ;;  %vm3593_vm3 = vmpackc.low %vm584_vm13, %vm582_vm0  ;;  %v4500_v11 = vmov 1966171168  }
 0x1b6   :  { %3582 = vmatprep.subr.msk.bf16.mxu0 %vm3581_vm9, %v7145_v62  ;;  %1982 = vmatprep.subr.bf16.mxu1 %v5618_v9  ;;  %vm3591_vm9 = vmpackc.low %vm579_vm5, %vm577_vm4  ;;  %v516_v9 = vpop.permute.xlu0 %515  ;;  %v800_v51 = vunpack.c.l.s4 %v4500_v11 }
 0x1b7   :  { %vm592_vm4 = vcmp.gt.f32.partialorder %v516_v9, %v5087_v1  ;;  %vm591_vm13 = vcmp.gt.f32.partialorder %v516_v9, %v5069_v63 }
 0x1b8   :  { %v501_v34 = vpop.permute.xlu1 %500  ;;  %v801_v55 = vunpack.c.0.s8 %v800_v51 }
 0x1b9   :  { %3584 = vmatpush1.bf16.msk.msra.mxu0 %vm3583_vm8, %v7145_v62  ;;  %1983 = vmatpush1.bf16.msra.mxu1 %v5651_v56  ;;  %vm586_vm2 = vcmp.gt.f32.partialorder %v501_v34, %v5087_v1  ;;  %vm583_vm8 = vcmp.gt.f32.partialorder %v496_v8, %v5069_v63  ;;  %vm585_vm12 = vcmp.gt.f32.partialorder %v501_v34, %v5069_v63  ;;  %v7160_v56 = vld [vmem:[#allocation25_spill] sm:$0xff] }
 0x1ba   :  { %3586 = vmatprep.subr.msk.bf16.mxu0 %vm3585_vm11, %v7145_v62  ;;  %1984 = vmatprep.subr.bf16.mxu1 %v5657_v20  ;;  %vm3595_vm11 = vmpackc.low %vm583_vm8, %vm581_vm1  ;;  %v7161_v20 = vld [vmem:[#allocation26_spill] sm:$0xff] }
 0x1bb   :  { %vm3597_vm15 = vmpackc.low %vm588_vm6, %vm586_vm2 }
 0x1bc   :  { %v511_v33 = vpop.permute.xlu1 %510 }
 0x1bd   :  { %3588 = vmatpush1.bf16.msk.msra.mxu0 %vm3587_vm10, %v7145_v62  ;;  %1985 = vmatpush1.bf16.msra.mxu1 %v5688_v47  ;;  %vm590_vm7 = vcmp.gt.f32.partialorder %v511_v33, %v5087_v1  ;;  %vm587_vm10 = vcmp.gt.f32.partialorder %v506_v42, %v5069_v63  ;;  %vm589_vm0 = vcmp.gt.f32.partialorder %v511_v33, %v5069_v63  ;;  %v7147_v63 = vld [vmem:[#allocation12_spill] sm:$0xff]  ;;  %v7148_v1 = vld [vmem:[#allocation13_spill] sm:$0xff]  ;;  %v7162_v47 = vld [vmem:[#allocation27_spill] sm:$0xff] }
 0x1be   :  { %3590 = vmatprep.subr.msk.bf16.mxu0 %vm3589_vm14, %v7145_v62  ;;  %1986 = vmatprep.subr.bf16.mxu1 %v5731_v58  ;;  %vm3599_vm14 = vmpackc.low %vm587_vm10, %vm585_vm12  ;;  %v7163_v58 = vld [vmem:[#allocation28_spill] sm:$0xff] }
 0x1bf   :  { %vm3601_vm5 = vmpackc.low %vm592_vm4, %vm590_vm7  ;;  %v7168_v42 = vld [vmem:[#allocation8_spill] sm:$0xff] }
 0x1c0   :  { %v2124_v41 = vpop.permute.xlu1 %2123  ;;  %v6445_v33 = vsub.s32 %v801_v55, %v7168_v42 }
 0x1c1   :  { %3592 = vmatpush1.bf16.msk.msra.mxu0 %vm3591_vm9, %v7145_v62  ;;  %1987 = vmatpush1.bf16.msra.mxu1 %v5758_v3  ;;  %vm3603_vm9 = vmpackc.low %vm591_vm13, %vm589_vm0  ;;  %v7164_v3 = vld [vmem:[#allocation11_spill] sm:$0xff] }
 0x1c2   :  { %3594 = vmatprep.subr.msk.bf16.mxu0 %vm3593_vm3, %v7145_v62  ;;  %1988 = vmatprep.subr.bf16.mxu1 %v5794_v26  ;;  %4440 = vlog2.f32 %v7164_v3 }
 0x1c5   :  { %3596 = vmatpush1.bf16.msk.msra.mxu0 %vm3595_vm11, %v7145_v62  ;;  %1989 = vmatpush1.bf16.msra.mxu1 %v5812_v27 }
 0x1c6   :  { %3598 = vmatprep.subr.msk.bf16.mxu0 %vm3597_vm15, %v7145_v62  ;;  %1990 = vmatprep.subr.bf16.mxu1 %v5849_v23 }
 0x1c9   :  { %3600 = vmatpush1.bf16.msk.msra.mxu0 %vm3599_vm14, %v7145_v62  ;;  %1991 = vmatpush1.bf16.msra.mxu1 %v5871_v14 }
 0x1ca   :  { %3602 = vmatprep.subr.msk.bf16.mxu0 %vm3601_vm5, %v7145_v62  ;;  %1992 = vmatprep.subr.bf16.mxu1 %v5908_v53 }
 0x1cc   :  { %v4441_v26 = vpop.eup %4440 }
 0x1cd   :  { %3604 = vmatpush1.bf16.msk.msra.mxu0 %vm3603_vm9, %v7145_v62  ;;  %1993 = vmatpush1.bf16.msra.mxu1 %v5932_v29  ;;  %v2010_v14 = vmul.f32 0.6931472, %v4441_v26  ;;  %v34_v29 = vld [vmem:[%s7044_s2] sm:$0x3]  ;;  %s4501_s2 = smov [#allocation2]  }
 0x1ce   :  { %4027 = vmatprep.subr.bf16.mxu0 %v7146_v45  ;;  %1994 = vmatprep.subr.bf16.mxu1 %v5969_v46  ;;  %s3455_s27 = sshll.u32 %s4501_s2, 4  ;;  %s3456_s27 = int_to_ptr.vmem [resolvable:$true] %s3455_s27 }
 0x1cf   :  { %s4448_s28 = scalar_lea.vmem %s3456_s27, 32  ;;  %p4453_p1 = scmp.lt.s32.totalorder %s3456_s27, %s3456_s27 }
 0x1d0   :  { %786 = vmatmul.mubr.bf16.vlgmr.msra.gmra.mrb[0].mxu0 %v7146_v45  ;;  %p4449_p0 = scmp.ne.s32.totalorder %s3456_s27, %s4448_s28  ;;  %p4454_p2 = scmp.lt.s32.totalorder %s4448_s28, %s4448_s28 }
 0x1d1   :  { %4028 = vmatpush3.bf16.msra.mxu0 %v7146_v45  ;;  %1767 = vmatprep.mubr.bf16.mxu0 %v5255_v37  ;;  %v7149_v37 = vld [vmem:[#allocation14_spill] sm:$0xff] }
 0x1d2   :  { %4029 = vmatprep.subr.bf16.mxu0 %v7146_v45  ;;  %1995 = vmatpush1.bf16.msra.mxu1 %v5993_v12  ;;  %v2011_v12 = vadd.f32 %v2010_v14, %v34_v29  ;;  %p4455_p3 = por %p4454_p2, %p4453_p1 }
 0x1d3   :  { %1996 = vmatprep.subr.bf16.mxu1 %v6032_v4 }
 0x1d4   :  { %p4456_p4 = pnand %p4455_p3, %p4449_p0 }
 0x1d5   :  { %4030 = vmatpush3.bf16.msra.mxu0 %v7146_v45 }
 0x1d6   :  { %4031 = vmatprep.subr.bf16.mxu0 %v7146_v45  ;;  %1997 = vmatpush1.bf16.msra.mxu1 %v6056_v5  ;;  %v7159_v5 = vld [vmem:[#allocation24_spill] sm:$0xff] }
 0x1d7   :  { %1998 = vmatprep.subr.bf16.mxu1 %v6094_v43  ;;  %v7166_v43 = vld [vmem:[#allocation9_spill] sm:$0xff] }
 0x1d9   :  { %4032 = vmatpush3.bf16.msra.mxu0 %v7146_v45 }
 0x1da   :  { %4033 = vmatprep.subr.bf16.mxu0 %v7146_v45  ;;  %1999 = vmatpush1.bf16.msra.mxu1 %v6134_v31  ;;  %v2129_v31 = vpop.permute.xlu0 %2128 }
 0x1db   :  { %4139 = vmatprep.subr.bf16.mxu1 %v7146_v45 }
 0x1dd   :  { %4034 = vmatpush3.bf16.msra.mxu0 %v7146_v45 }
 0x1de   :  { %4035 = vmatprep.subr.bf16.mxu0 %v7146_v45  ;;  %v2139_v49 = vpop.permute.xlu0 %2138 }
 0x1e1   :  { %4036 = vmatpush3.bf16.msra.mxu0 %v7146_v45 }
 0x1e2   :  { %4037 = vmatprep.subr.bf16.mxu0 %v7146_v45  ;;  %v2149_v40 = vpop.permute.xlu0 %2148 }
 0x1e5   :  { %4038 = vmatpush3.bf16.msra.mxu0 %v7146_v45 }
 0x1e6   :  { %4039 = vmatprep.subr.bf16.mxu0 %v7146_v45  ;;  %v2159_v54 = vpop.permute.xlu0 %2158 }
 0x1e9   :  { %4040 = vmatpush3.bf16.msra.mxu0 %v7146_v45 }
 0x1ea   :  { %4041 = vmatprep.subr.bf16.mxu0 %v7146_v45  ;;  %v2169_v36 = vpop.permute.xlu0 %2168 }
 0x1ed   :  { %4042 = vmatpush3.bf16.msra.mxu0 %v7146_v45 }
 0x1ee   :  { %v2179_v32 = vpop.permute.xlu0 %2178 }
 0x1f0   :  { %1768 = vmatmul.mubr.bf16.vlgmr.msra.gmra.mrb[4].mxu0 %v5283_v39  ;;  %v7150_v39 = vld [vmem:[#allocation15_spill] sm:$0xff] }
 0x1f1   :  { %1775 = vmatprep.mubr.bf16.mxu0 %v5318_v48  ;;  %v7151_v48 = vld [vmem:[#allocation16_spill] sm:$0xff] }
 0x1f2   :  { %v2189_v8 = vpop.permute.xlu0 %2188 }
 0x1f8   :  { %1776 = vmatmul.mubr.bf16.gmra.mrb[8].mxu0 %v5334_v38  ;;  %v7152_v38 = vld [vmem:[#allocation17_spill] sm:$0xff] }
 0x1f9   :  { %1783 = vmatprep.mubr.bf16.mxu0 %v5372_v16  ;;  %v7153_v16 = vld [vmem:[#allocation18_spill] sm:$0xff] }
 0x200   :  { %1784 = vmatmul.mubr.bf16.gmra.mrb[12].mxu0 %v5374_v13  ;;  %v7154_v13 = vld [vmem:[#allocation19_spill] sm:$0xff] }
 0x201   :  { %1791 = vmatprep.mubr.bf16.mxu0 %v5454_v0  ;;  %v7155_v0 = vld [vmem:[#allocation20_spill] sm:$0xff] }
 0x208   :  { %1792 = vmatmul.mubr.bf16.gmra.mrb[16].mxu0 %v5456_v57  ;;  %v7156_v57 = vld [vmem:[#allocation21_spill] sm:$0xff] }
 0x209   :  { %1799 = vmatprep.mubr.bf16.mxu0 %v5524_v25  ;;  %v7157_v25 = vld [vmem:[#allocation22_spill] sm:$0xff] }
 0x210   :  { %1800 = vmatmul.mubr.bf16.gmra.mrb[20].mxu0 %v5526_v44  ;;  %v7158_v44 = vld [vmem:[#allocation23_spill] sm:$0xff] }
 0x211   :  { %1807 = vmatprep.mubr.bf16.mxu0 %v7147_v63 }
 0x218   :  { %1808 = vmatmul.mubr.bf16.gmra.mrb[24].mxu0 %v7148_v1  ;;  %v7169_v1 = vlaneseq }
 0x219   :  { %1815 = vmatprep.mubr.bf16.mxu0 %v7149_v37 }
 0x220   :  { %1816 = vmatmul.mubr.bf16.gmra.mrb[28].mxu0 %v7150_v39  ;;  %v2199_v39 = vpop.permute.xlu0 %2198 }
 0x221   :  { %1823 = vmatprep.mubr.bf16.mxu0 %v7151_v48 }
 0x228   :  { %1824 = vmatmul.mubr.bf16.gmra.mrb[32].mxu0 %v7152_v38 }
 0x229   :  { %1831 = vmatprep.mubr.bf16.mxu0 %v7153_v16 }
 0x230   :  { %1832 = vmatmul.mubr.bf16.gmra.mrb[36].mxu0 %v7154_v13 }
 0x231   :  { %1839 = vmatprep.mubr.bf16.mxu0 %v7155_v0 }
 0x238   :  { %1840 = vmatmul.mubr.bf16.gmra.mrb[40].mxu0 %v7156_v57 }
 0x239   :  { %1847 = vmatprep.mubr.bf16.mxu0 %v7157_v25 }
 0x240   :  { %1848 = vmatmul.mubr.bf16.gmra.mrb[44].mxu0 %v7158_v44 }
 0x241   :  { %1855 = vmatprep.mubr.bf16.mxu0 %v7159_v5  ;;  %v2209_v5 = vpop.permute.xlu0 %2208 }
 0x248   :  { %1856 = vmatmul.mubr.bf16.gmra.mrb[48].mxu0 %v7160_v56 }
 0x249   :  { %1863 = vmatprep.mubr.bf16.mxu0 %v7161_v20 }
 0x250   :  { %1864 = vmatmul.mubr.bf16.gmra.mrb[52].mxu0 %v7162_v47 }
 0x251   :  { %1871 = vmatprep.mubr.bf16.mxu0 %v6025_v35  ;;  %v7165_v35 = vld [vmem:[#allocation10_spill] sm:$0xff] }
 0x252   :  { %v2020_v4 = vrot.slane %v2011_v12, %v7165_v35 }
 0x258   :  { %1872 = vmatmul.mubr.bf16.gmra.mrb[56].mxu0 %v7163_v58 }
 0x259   :  { %1879 = vmatprep.mubr.bf16.mxu0 %v6083_v2 }
 0x260   :  { %1880 = vmatmul.mubr.bf16.gmra.mrb[60].mxu0 %v6118_v17 }
 0x261   :  { %1887 = vmatprep.mubr.bf16.mxu0 %v6153_v6  ;;  %v2016_v6 = vrot.slane %v2011_v12, %v7166_v43 }
 0x268   :  { %1888 = vmatmul.mubr.bf16.gmra.mrb[64].mxu0 %v6172_v30  ;;  %v2134_v30 = vpop.permute.xlu1 %2133 }
 0x269   :  { %3418 = vmatprep.mubr.bf16.mxu0 %v7146_v45 }
 0x26c   :  { %v2144_v10 = vpop.permute.xlu1 %2143 }
 0x26f   :  { %v6361_v27 = vpop.f32.mrb[0].mxu1 }
 0x270   :  { %vm1928_vm1 = vcmp.lt.f32.partialorder %v6361_v27, 64.0  ;;  %v6364_v23 = vpop.f32.mrb[1].mxu1  ;;  %v2154_v61 = vpop.permute.xlu1 %2153 }
 0x271   :  { %vm7111_vm3 = vcmp.lt.f32.partialorder %v6364_v23, 64.0  ;;  %v1732_v53 = vpop.f32.mrb[2].mxu1  ;;  %vm3769_vm8 = vmpackc.low %vm1928_vm1, %vm1928_vm1  ;;  %v2023_v60 = vsel %vm1928_vm1, %v2016_v6, -1e+30 }
 0x272   :  { %vm3767_vm2 = vmpackc.low %vm7111_vm3, %vm7111_vm3  ;;  %v1733_v46 = vpop.f32.mrb[3].mxu1  ;;  %v2024_v2 = vsel %vm7111_vm3, %v2020_v4, -1e+30  ;;  %v6403_v15 = vrot.slane %v2023_v60, %v7166_v43 }
 0x273   :  { %3768 = vmatprep.mubr.msk.bf16.mxu1 %vm3767_vm2, %v7145_v62  ;;  %v6387_v17 = vrot.slane %v2024_v2, %v7166_v43  ;;  %v2219_v46 = vpop.permute.xlu0 %2218 }
 0x274   :  { %3770 = vmatmul.mubr.msk.bf16.vlgmr.msra.gmra.mrb[4].mxu1 %vm3769_vm8, %v7145_v62  ;;  %vm2289_vm15 = vcmp.gt.f32.partialorder %v2124_v41, %v6403_v15  ;;  %vm2291_vm7 = vcmp.gt.f32.partialorder %v2129_v31, %v6403_v15  ;;  %vm2293_vm5 = vcmp.gt.f32.partialorder %v2134_v30, %v6403_v15  ;;  %vm2295_vm13 = vcmp.gt.f32.partialorder %v2139_v49, %v6403_v15  ;;  %v2164_v7 = vpop.permute.xlu1 %2163 }
 0x275   :  { %4140 = vmatpush3.bf16.msra.mxu1 %v7146_v45  ;;  %vm2290_vm6 = vcmp.gt.f32.partialorder %v2124_v41, %v6387_v17  ;;  %vm2292_vm11 = vcmp.gt.f32.partialorder %v2129_v31, %v6387_v17  ;;  %vm2294_vm10 = vcmp.gt.f32.partialorder %v2134_v30, %v6387_v17  ;;  %vm2296_vm4 = vcmp.gt.f32.partialorder %v2139_v49, %v6387_v17  ;;  %vm3837_vm14 = vmpackc.low %vm2291_vm7, %vm2289_vm15 }
 0x276   :  { %4141 = vmatprep.subr.bf16.mxu1 %v7146_v45  ;;  %vm3835_vm12 = vmpackc.low %vm2292_vm11, %vm2290_vm6  ;;  %vm2298_vm9 = vcmp.gt.f32.partialorder %v2144_v10, %v6387_v17  ;;  %vm2300_vm2 = vcmp.gt.f32.partialorder %v2149_v40, %v6387_v17  ;;  %vm2297_vm11 = vcmp.gt.f32.partialorder %v2144_v10, %v6403_v15  ;;  %vm2302_vm15 = vcmp.gt.f32.partialorder %v2154_v61, %v6387_v17 }
 0x277   :  { %3836 = vmatprep.mubr.msk.bf16.mxu1 %vm3835_vm12, %v7145_v62  ;;  %vm3839_vm0 = vmpackc.low %vm2296_vm4, %vm2294_vm10  ;;  %vm2299_vm12 = vcmp.gt.f32.partialorder %v2149_v40, %v6403_v15  ;;  %vm2304_vm7 = vcmp.gt.f32.partialorder %v2159_v54, %v6387_v17  ;;  %v2229_v30 = vpop.permute.xlu0 %2228 }
 0x278   :  { %vm3841_vm8 = vmpackc.low %vm2295_vm13, %vm2293_vm5  ;;  %vm2301_vm5 = vcmp.gt.f32.partialorder %v2154_v61, %v6403_v15  ;;  %vm2303_vm13 = vcmp.gt.f32.partialorder %v2159_v54, %v6403_v15  ;;  %v2174_v18 = vpop.permute.xlu1 %2173 }
 0x279   :  { %4142 = vmatpush3.bf16.msra.mxu1 %v7146_v45  ;;  %vm3843_vm6 = vmpackc.low %vm2300_vm2, %vm2298_vm9  ;;  %vm2306_vm9 = vcmp.gt.f32.partialorder %v2164_v7, %v6387_v17  ;;  %vm2308_vm2 = vcmp.gt.f32.partialorder %v2169_v36, %v6387_v17 }
 0x27a   :  { %4143 = vmatprep.subr.bf16.mxu1 %v7146_v45  ;;  %vm3845_vm10 = vmpackc.low %vm2299_vm12, %vm2297_vm11  ;;  %vm2305_vm11 = vcmp.gt.f32.partialorder %v2164_v7, %v6403_v15  ;;  %vm2307_vm12 = vcmp.gt.f32.partialorder %v2169_v36, %v6403_v15 }
 0x27c   :  { %v2184_v34 = vpop.permute.xlu1 %2183 }
 0x27d   :  { %4144 = vmatpush3.bf16.msra.mxu1 %v7146_v45 }
 0x27e   :  { %4145 = vmatprep.subr.bf16.mxu1 %v7146_v45 }
 0x280   :  { %v2194_v48 = vpop.permute.xlu1 %2193 }
 0x281   :  { %4146 = vmatpush3.bf16.msra.mxu1 %v7146_v45 }
 0x282   :  { %4147 = vmatprep.subr.bf16.mxu1 %v7146_v45 }
 0x284   :  { %v2204_v56 = vpop.permute.xlu1 %2203 }
 0x285   :  { %4148 = vmatpush3.bf16.msra.mxu1 %v7146_v45 }
 0x286   :  { %4149 = vmatprep.subr.bf16.mxu1 %v7146_v45 }
 0x288   :  { %v2214_v12 = vpop.permute.xlu1 %2213 }
 0x289   :  { %4150 = vmatpush3.bf16.msra.mxu1 %v7146_v45 }
 0x28a   :  { %4151 = vmatprep.subr.bf16.mxu1 %v7146_v45 }
 0x28c   :  { %v2224_v40 = vpop.permute.xlu1 %2223 }
 0x28d   :  { %4152 = vmatpush3.bf16.msra.mxu1 %v7146_v45 }
 0x28e   :  { %4153 = vmatprep.subr.bf16.mxu1 %v7146_v45 }
 0x291   :  { %4154 = vmatpush3.bf16.msra.mxu1 %v7146_v45 }
 0x294   :  { %3838 = vmatmul.mubr.msk.bf16.vlgmr.msra.gmra.mrb[8].mxu1 %vm3837_vm14, %v7145_v62  ;;  %vm3847_vm14 = vmpackc.low %vm2304_vm7, %vm2302_vm15  ;;  %vm2310_vm15 = vcmp.gt.f32.partialorder %v2174_v18, %v6387_v17  ;;  %vm2312_vm7 = vcmp.gt.f32.partialorder %v2179_v32, %v6387_v17 }
 0x295   :  { %3840 = vmatprep.mubr.msk.bf16.mxu1 %vm3839_vm0, %v7145_v62 }
 0x29c   :  { %3842 = vmatmul.mubr.msk.bf16.gmra.mrb[12].mxu1 %vm3841_vm8, %v7145_v62  ;;  %vm3849_vm8 = vmpackc.low %vm2303_vm13, %vm2301_vm5  ;;  %vm2314_vm5 = vcmp.gt.f32.partialorder %v2184_v34, %v6387_v17  ;;  %vm2316_vm13 = vcmp.gt.f32.partialorder %v2189_v8, %v6387_v17 }
 0x29d   :  { %3844 = vmatprep.mubr.msk.bf16.mxu1 %vm3843_vm6, %v7145_v62  ;;  %vm3851_vm6 = vmpackc.low %vm2308_vm2, %vm2306_vm9 }
 0x29e   :  { %vm3859_vm2 = vmpackc.low %vm2316_vm13, %vm2314_vm5  ;;  %vm2324_vm5 = vcmp.gt.f32.partialorder %v2209_v5, %v6387_v17 }
 0x2a3   :  { %v787_v52 = vpop.f32.mrb[0].mxu0 }
 0x2a4   :  { %vm794_vm4 = vcmp.lt.f32.partialorder %v787_v52, 5.0  ;;  %v789_v19 = vpop.f32.mrb[1].mxu0  ;;  %3846 = vmatmul.mubr.msk.bf16.gmra.mrb[16].mxu1 %vm3845_vm10, %v7145_v62  ;;  %vm3853_vm10 = vmpackc.low %vm2307_vm12, %vm2305_vm11  ;;  %vm2315_vm11 = vcmp.gt.f32.partialorder %v2189_v8, %v6403_v15  ;;  %vm2318_vm12 = vcmp.gt.f32.partialorder %v2194_v48, %v6387_v17 }
 0x2a5   :  { %v796_v24 = vsel %vm794_vm4, 1, %v7167_v59  ;;  %vm795_vm0 = vcmp.lt.f32.partialorder %v789_v19, 5.0  ;;  %v791_v21 = vpop.f32.mrb[2].mxu0  ;;  %3848 = vmatprep.mubr.msk.bf16.mxu1 %vm3847_vm14, %v7145_v62  ;;  %vm3855_vm4 = vmpackc.low %vm2312_vm7, %vm2310_vm15  ;;  %vm2309_vm14 = vcmp.gt.f32.partialorder %v2174_v18, %v6403_v15  ;;  %vm2320_vm15 = vcmp.gt.f32.partialorder %v2199_v39, %v6387_v17 }
 0x2a6   :  { %v797_v50 = vsel %vm795_vm0, 1, %v7167_v59  ;;  %v792_v28 = vpop.f32.mrb[3].mxu0  ;;  %vm2311_vm0 = vcmp.gt.f32.partialorder %v2179_v32, %v6403_v15 }
 0x2a7   :  { %v798_v22 = vcombine.low %v796_v24, %v797_v50  ;;  %vm3857_vm9 = vmpackc.low %vm2311_vm0, %vm2309_vm14  ;;  %vm2319_vm14 = vcmp.gt.f32.partialorder %v2199_v39, %v6403_v15  ;;  %vm2322_vm0 = vcmp.gt.f32.partialorder %v2204_v56, %v6387_v17  ;;  %v2239_v28 = vpop.permute.xlu0 %2238 }
 0x2a9   :  { %v805_v9 = vrot.slane %v798_v22, %v6445_v33  ;;  %v2234_v22 = vpop.permute.xlu1 %2233 }
 0x2ab   :  { %v812_v63 = vrot.slane %v805_v9, %v6445_v33 }
 0x2ac   :  { %3850 = vmatmul.mubr.msk.bf16.gmra.mrb[20].mxu1 %vm3849_vm8, %v7145_v62  ;;  %vm6452_vm8 = vcmp.lt.s32.totalorder %v7169_v1, 256 }
 0x2ad   :  { %3852 = vmatprep.mubr.msk.bf16.mxu1 %vm3851_vm6, %v7145_v62  ;;  %817 = vst.msk [vmem:[#allocation2] sm:$0x3] %vm6452_vm8, %v812_v63  ;;  %vm2313_vm6 = vcmp.gt.f32.partialorder %v2184_v34, %v6403_v15  ;;  %v2249_v34 = vpop.permute.xlu0 %2248  ;;  %v2244_v42 = vpop.permute.xlu1 %2243 }
 0x2ae   :  { %vm3861_vm7 = vmpackc.low %vm2315_vm11, %vm2313_vm6  ;;  %vm2323_vm6 = vcmp.gt.f32.partialorder %v2209_v5, %v6403_v15  ;;  %vm2326_vm11 = vcmp.gt.f32.partialorder %v2214_v12, %v6387_v17 }
 0x2b1   :  { %v2254_v5 = vpop.permute.xlu1 %2253 }
 0x2b4   :  { %3854 = vmatmul.mubr.msk.bf16.gmra.mrb[24].mxu1 %vm3853_vm10, %v7145_v62  ;;  %vm3863_vm10 = vmpackc.low %vm2320_vm15, %vm2318_vm12  ;;  %vm2328_vm12 = vcmp.gt.f32.partialorder %v2219_v46, %v6387_v17 }
 0x2b5   :  { %3856 = vmatprep.mubr.msk.bf16.mxu1 %vm3855_vm4, %v7145_v62  ;;  %vm2317_vm4 = vcmp.gt.f32.partialorder %v2194_v48, %v6403_v15 }
 0x2b6   :  { %vm3865_vm13 = vmpackc.low %vm2319_vm14, %vm2317_vm4  ;;  %vm2327_vm4 = vcmp.gt.f32.partialorder %v2219_v46, %v6403_v15  ;;  %vm2330_vm14 = vcmp.gt.f32.partialorder %v2224_v40, %v6387_v17 }
 0x2bc   :  { %3858 = vmatmul.mubr.msk.bf16.gmra.mrb[28].mxu1 %vm3857_vm9, %v7145_v62  ;;  %vm3867_vm9 = vmpackc.low %vm2324_vm5, %vm2322_vm0  ;;  %vm2332_vm0 = vcmp.gt.f32.partialorder %v2229_v30, %v6387_v17 }
 0x2bd   :  { %3860 = vmatprep.mubr.msk.bf16.mxu1 %vm3859_vm2, %v7145_v62  ;;  %vm2321_vm2 = vcmp.gt.f32.partialorder %v2204_v56, %v6403_v15 }
 0x2be   :  { %vm3869_vm15 = vmpackc.low %vm2323_vm6, %vm2321_vm2  ;;  %vm2331_vm2 = vcmp.gt.f32.partialorder %v2229_v30, %v6403_v15  ;;  %vm2334_vm6 = vcmp.gt.f32.partialorder %v2234_v22, %v6387_v17 }
 0x2c3   :  { %v4043_v38 = vpop.f32.mrb[4].mxu0 }
 0x2c4   :  { %v4044_v16 = vpop.f32.mrb[5].mxu0  ;;  %3862 = vmatmul.mubr.msk.bf16.gmra.mrb[32].mxu1 %vm3861_vm7, %v7145_v62  ;;  %vm3871_vm7 = vmpackc.low %vm2328_vm12, %vm2326_vm11  ;;  %vm2336_vm11 = vcmp.gt.f32.partialorder %v2239_v28, %v6387_v17 }
 0x2c5   :  { %v6463_v13 = vadd.f32 %v4044_v16, %v4043_v38  ;;  %v4046_v0 = vpop.f32.mrb[6].mxu0  ;;  %3864 = vmatprep.mubr.msk.bf16.mxu1 %vm3863_vm10, %v7145_v62  ;;  %vm2325_vm10 = vcmp.gt.f32.partialorder %v2214_v12, %v6403_v15 }
 0x2c6   :  { %v4047_v57 = vpop.f32.mrb[7].mxu0  ;;  %vm3873_vm5 = vmpackc.low %vm2327_vm4, %vm2325_vm10  ;;  %vm2335_vm10 = vcmp.gt.f32.partialorder %v2239_v28, %v6403_v15  ;;  %vm2338_vm4 = vcmp.gt.f32.partialorder %v2244_v42, %v6387_v17 }
 0x2c7   :  { %v1896_v25 = vsub.f32 255.0, %v6463_v13  ;;  %v6467_v44 = vadd.f32 %v4047_v57, %v4046_v0  ;;  %v2259_v57 = vpop.permute.xlu0 %2258 }
 0x2c9   :  { %v1897_v20 = vsub.f32 255.0, %v6467_v44  ;;  %2772 = vperm.xlu1 %4259, %v1896_v25  }
 0x2cb   :  { %v4049_v47 = vpop.f32.mrb[8].mxu0  ;;  %2777 = vperm.xlu0 %4258, %v1897_v20  }
 0x2cc   :  { %v4050_v58 = vpop.f32.mrb[9].mxu0  ;;  %3866 = vmatmul.mubr.msk.bf16.gmra.mrb[36].mxu1 %vm3865_vm13, %v7145_v62  ;;  %vm3875_vm13 = vmpackc.low %vm2332_vm0, %vm2330_vm14  ;;  %vm2340_vm14 = vcmp.gt.f32.partialorder %v2249_v34, %v6387_v17 }
 0x2cd   :  { %v6479_v3 = vadd.f32 %v4050_v58, %v4049_v47  ;;  %v4052_v26 = vpop.f32.mrb[10].mxu0  ;;  %3868 = vmatprep.mubr.msk.bf16.mxu1 %vm3867_vm9, %v7145_v62  ;;  %vm2329_vm9 = vcmp.gt.f32.partialorder %v2224_v40, %v6403_v15 }
 0x2ce   :  { %v4053_v14 = vpop.f32.mrb[11].mxu0  ;;  %vm3877_vm12 = vmpackc.low %vm2331_vm2, %vm2329_vm9  ;;  %vm2339_vm9 = vcmp.gt.f32.partialorder %v2249_v34, %v6403_v15  ;;  %vm2342_vm2 = vcmp.gt.f32.partialorder %v2254_v5, %v6387_v17 }
 0x2cf   :  { %v1898_v53 = vsub.f32 255.0, %v6479_v3  ;;  %v6483_v29 = vadd.f32 %v4053_v14, %v4052_v26 }
 0x2d1   :  { %v1899_v35 = vsub.f32 255.0, %v6483_v29  ;;  %2782 = vperm.xlu1 %4259, %v1898_v53  }
 0x2d3   :  { %v4055_v4 = vpop.f32.mrb[12].mxu0  ;;  %2787 = vperm.xlu0 %4258, %v1899_v35  }
 0x2d4   :  { %v4056_v2 = vpop.f32.mrb[13].mxu0  ;;  %3870 = vmatmul.mubr.msk.bf16.gmra.mrb[40].mxu1 %vm3869_vm15, %v7145_v62  ;;  %vm3879_vm15 = vmpackc.low %vm2336_vm11, %vm2334_vm6  ;;  %vm2344_vm6 = vcmp.gt.f32.partialorder %v2259_v57, %v6387_v17 }
 0x2d5   :  { %v6495_v31 = vadd.f32 %v4056_v2, %v4055_v4  ;;  %v4058_v41 = vpop.f32.mrb[14].mxu0  ;;  %3872 = vmatprep.mubr.msk.bf16.mxu1 %vm3871_vm7, %v7145_v62  ;;  %vm2333_vm7 = vcmp.gt.f32.partialorder %v2234_v22, %v6403_v15  ;;  %v2269_v2 = vpop.permute.xlu0 %2268 }
 0x2d6   :  { %v4059_v6 = vpop.f32.mrb[15].mxu0  ;;  %vm3881_vm0 = vmpackc.low %vm2335_vm10, %vm2333_vm7  ;;  %vm2343_vm7 = vcmp.gt.f32.partialorder %v2259_v57, %v6403_v15 }
 0x2d7   :  { %v1900_v60 = vsub.f32 255.0, %v6495_v31  ;;  %v6499_v49 = vadd.f32 %v4059_v6, %v4058_v41  ;;  %v2264_v41 = vpop.permute.xlu1 %2263 }
 0x2d8   :  { %vm2346_vm10 = vcmp.gt.f32.partialorder %v2264_v41, %v6387_v17 }
 0x2d9   :  { %v1901_v10 = vsub.f32 255.0, %v6499_v49  ;;  %2792 = vperm.xlu1 %4259, %v1900_v60   ;;  %v2279_v22 = vpop.permute.xlu0 %2278 }
 0x2db   :  { %v4061_v54 = vpop.f32.mrb[16].mxu0  ;;  %2797 = vperm.xlu0 %4258, %v1901_v10  }
 0x2dc   :  { %v4062_v61 = vpop.f32.mrb[17].mxu0  ;;  %3874 = vmatmul.mubr.msk.bf16.gmra.mrb[44].mxu1 %vm3873_vm5, %v7145_v62  ;;  %vm3883_vm5 = vmpackc.low %vm2340_vm14, %vm2338_vm4  ;;  %vm2348_vm4 = vcmp.gt.f32.partialorder %v2269_v2, %v6387_v17 }
 0x2dd   :  { %v6511_v52 = vadd.f32 %v4062_v61, %v4061_v54  ;;  %v4064_v19 = vpop.f32.mrb[18].mxu0  ;;  %3876 = vmatprep.mubr.msk.bf16.mxu1 %vm3875_vm13, %v7145_v62  ;;  %vm2337_vm13 = vcmp.gt.f32.partialorder %v2244_v42, %v6403_v15 }
 0x2de   :  { %v4065_v24 = vpop.f32.mrb[19].mxu0  ;;  %vm3885_vm11 = vmpackc.low %vm2339_vm9, %vm2337_vm13  ;;  %vm2347_vm13 = vcmp.gt.f32.partialorder %v2269_v2, %v6403_v15 }
 0x2df   :  { %v1902_v21 = vsub.f32 255.0, %v6511_v52  ;;  %v6515_v50 = vadd.f32 %v4065_v24, %v4064_v19 }
 0x2e1   :  { %v1903_v36 = vsub.f32 255.0, %v6515_v50  ;;  %2802 = vperm.xlu1 %4259, %v1902_v21  }
 0x2e3   :  { %v4067_v7 = vpop.f32.mrb[20].mxu0  ;;  %2807 = vperm.xlu0 %4258, %v1903_v36  }
 0x2e4   :  { %v4068_v32 = vpop.f32.mrb[21].mxu0  ;;  %3878 = vmatmul.mubr.msk.bf16.gmra.mrb[48].mxu1 %vm3877_vm12, %v7145_v62  ;;  %vm3887_vm12 = vmpackc.low %vm2344_vm6, %vm2342_vm2  ;;  %vm2352_vm2 = vcmp.gt.f32.partialorder %v2279_v22, %v6387_v17 }
 0x2e5   :  { %v6527_v18 = vadd.f32 %v4068_v32, %v4067_v7  ;;  %v4070_v11 = vpop.f32.mrb[22].mxu0  ;;  %3880 = vmatprep.mubr.msk.bf16.mxu1 %vm3879_vm15, %v7145_v62  ;;  %vm2341_vm15 = vcmp.gt.f32.partialorder %v2254_v5, %v6403_v15  ;;  %v2274_v7 = vpop.permute.xlu1 %2273 }
 0x2e6   :  { %v4071_v51 = vpop.f32.mrb[23].mxu0  ;;  %vm3889_vm14 = vmpackc.low %vm2343_vm7, %vm2341_vm15  ;;  %vm2350_vm9 = vcmp.gt.f32.partialorder %v2274_v7, %v6387_v17  ;;  %vm2351_vm15 = vcmp.gt.f32.partialorder %v2279_v22, %v6403_v15 }
 0x2e7   :  { %v1904_v55 = vsub.f32 255.0, %v6527_v18  ;;  %v6531_v8 = vadd.f32 %v4071_v51, %v4070_v11 }
 0x2e9   :  { %v1905_v9 = vsub.f32 255.0, %v6531_v8  ;;  %2812 = vperm.xlu1 %4259, %v1904_v55  }
 0x2eb   :  { %v4073_v63 = vpop.f32.mrb[24].mxu0  ;;  %2817 = vperm.xlu0 %4258, %v1905_v9  }
 0x2ec   :  { %v4074_v1 = vpop.f32.mrb[25].mxu0  ;;  %3882 = vmatmul.mubr.msk.bf16.gmra.mrb[52].mxu1 %vm3881_vm0, %v7145_v62  ;;  %vm3891_vm0 = vmpackc.low %vm2348_vm4, %vm2346_vm10  ;;  %vm1930_vm10 = vcmp.lt.f32.partialorder %v1896_v25, 64.0 }
 0x2ed   :  { %v6543_v39 = vadd.f32 %v4074_v1, %v4073_v63  ;;  %v4076_v48 = vpop.f32.mrb[26].mxu0  ;;  %3884 = vmatprep.mubr.msk.bf16.mxu1 %vm3883_vm5, %v7145_v62  ;;  %vm2345_vm5 = vcmp.gt.f32.partialorder %v2264_v41, %v6403_v15 }
 0x2ee   :  { %v4077_v38 = vpop.f32.mrb[27].mxu0  ;;  %vm3893_vm6 = vmpackc.low %vm2347_vm13, %vm2345_vm5 }
 0x2ef   :  { %v1906_v16 = vsub.f32 255.0, %v6543_v39  ;;  %v6547_v0 = vadd.f32 %v4077_v38, %v4076_v48 }
 0x2f1   :  { %v7108_v56 = vsub.f32 255.0, %v6547_v0  ;;  %2822 = vperm.xlu1 %4259, %v1906_v16  }
 0x2f3   :  { %v4079_v47 = vpop.f32.mrb[28].mxu0  ;;  %2827 = vperm.xlu0 %4258, %v7108_v56  }
 0x2f4   :  { %v4080_v58 = vpop.f32.mrb[29].mxu0  ;;  %3886 = vmatmul.mubr.msk.bf16.gmra.mrb[56].mxu1 %vm3885_vm11, %v7145_v62  ;;  %vm3895_vm11 = vmpackc.low %vm2352_vm2, %vm2350_vm9  ;;  %vm1932_vm9 = vcmp.lt.f32.partialorder %v1898_v53, 64.0 }
 0x2f5   :  { %v6559_v26 = vadd.f32 %v4080_v58, %v4079_v47  ;;  %v4082_v14 = vpop.f32.mrb[30].mxu0  ;;  %3888 = vmatprep.mubr.msk.bf16.mxu1 %vm3887_vm12, %v7145_v62  ;;  %vm2349_vm12 = vcmp.gt.f32.partialorder %v2274_v7, %v6403_v15 }
 0x2f6   :  { %v4083_v46 = vpop.f32.mrb[31].mxu0  ;;  %vm3897_vm7 = vmpackc.low %vm2351_vm15, %vm2349_vm12 }
 0x2f7   :  { %v7107_v12 = vsub.f32 255.0, %v6559_v26  ;;  %v6563_v4 = vadd.f32 %v4083_v46, %v4082_v14 }
 0x2f9   :  { %v7106_v6 = vsub.f32 255.0, %v6563_v4  ;;  %2832 = vperm.xlu1 %4259, %v7107_v12  }
 0x2fb   :  { %v4085_v30 = vpop.f32.mrb[32].mxu0  ;;  %2837 = vperm.xlu0 %4258, %v7106_v6  }
 0x2fc   :  { %v4086_v40 = vpop.f32.mrb[33].mxu0  ;;  %3890 = vmatmul.mubr.msk.bf16.gmra.mrb[60].mxu1 %vm3889_vm14, %v7145_v62 }
 0x2fd   :  { %v6575_v54 = vadd.f32 %v4086_v40, %v4085_v30  ;;  %v4088_v61 = vpop.f32.mrb[34].mxu0  ;;  %3892 = vmatprep.mubr.msk.bf16.mxu1 %vm3891_vm0, %v7145_v62  ;;  %vm1931_vm0 = vcmp.lt.f32.partialorder %v1897_v20, 64.0 }
 0x2fe   :  { %v4089_v19 = vpop.f32.mrb[35].mxu0 }
 0x2ff   :  { %v7105_v24 = vsub.f32 255.0, %v6575_v54  ;;  %v6579_v28 = vadd.f32 %v4089_v19, %v4088_v61 }
 0x301   :  { %v7102_v32 = vsub.f32 255.0, %v6579_v28  ;;  %2842 = vperm.xlu1 %4259, %v7105_v24  }
 0x303   :  { %v4091_v11 = vpop.f32.mrb[36].mxu0  ;;  %2847 = vperm.xlu0 %4258, %v7102_v32  }
 0x304   :  { %v4092_v51 = vpop.f32.mrb[37].mxu0  ;;  %3894 = vmatmul.mubr.msk.bf16.gmra.mrb[64].mxu1 %vm3893_vm6, %v7145_v62 }
 0x305   :  { %v6591_v34 = vadd.f32 %v4092_v51, %v4091_v11  ;;  %v4094_v42 = vpop.f32.mrb[38].mxu0  ;;  %3896 = vmatprep.mubr.msk.bf16.mxu1 %vm3895_vm11, %v7145_v62  ;;  %vm1933_vm11 = vcmp.lt.f32.partialorder %v1899_v35, 64.0 }
 0x306   :  { %v4095_v63 = vpop.f32.mrb[39].mxu0 }
 0x307   :  { %v7101_v1 = vsub.f32 255.0, %v6591_v34  ;;  %v6595_v48 = vadd.f32 %v4095_v63, %v4094_v42 }
 0x309   :  { %v7098_v17 = vsub.f32 255.0, %v6595_v48  ;;  %2852 = vperm.xlu1 %4259, %v7101_v1  }
 0x30b   :  { %v4097_v38 = vpop.f32.mrb[40].mxu0  ;;  %2857 = vperm.xlu0 %4258, %v7098_v17  }
 0x30c   :  { %v4098_v57 = vpop.f32.mrb[41].mxu0  ;;  %3898 = vmatmul.mubr.msk.bf16.gmra.mrb[68].mxu1 %vm3897_vm7, %v7145_v62  ;;  %vm1934_vm7 = vcmp.lt.f32.partialorder %v1900_v60, 64.0 }
 0x30d   :  { %v6605_v5 = vadd.f32 %v4098_v57, %v4097_v38  ;;  %v4100_v47 = vpop.f32.mrb[42].mxu0 }
 0x30e   :  { %v4101_v58 = vpop.f32.mrb[43].mxu0 }
 0x30f   :  { %v7097_v14 = vsub.f32 255.0, %v6605_v5  ;;  %v6608_v15 = vadd.f32 %v4101_v58, %v4100_v47 }
 0x311   :  { %v7094_v46 = vsub.f32 255.0, %v6608_v15  ;;  %2862 = vperm.xlu1 %4259, %v7097_v14  }
 0x313   :  { %v4103_v2 = vpop.f32.mrb[44].mxu0  ;;  %2867 = vperm.xlu0 %4258, %v7094_v46  }
 0x314   :  { %v4104_v41 = vpop.f32.mrb[45].mxu0 }
 0x315   :  { %v6615_v30 = vadd.f32 %v4104_v41, %v4103_v2  ;;  %v4106_v40 = vpop.f32.mrb[46].mxu0 }
 0x316   :  { %v4107_v61 = vpop.f32.mrb[47].mxu0 }
 0x317   :  { %v7093_v19 = vsub.f32 255.0, %v6615_v30  ;;  %v6618_v22 = vadd.f32 %v4107_v61, %v4106_v40 }
 0x319   :  { %v7090_v7 = vsub.f32 255.0, %v6618_v22  ;;  %2872 = vperm.xlu1 %4259, %v7093_v19  }
 0x31b   :  { %v4109_v11 = vpop.f32.mrb[48].mxu0  ;;  %2877 = vperm.xlu0 %4258, %v7090_v7  }
 0x31c   :  { %v4110_v51 = vpop.f32.mrb[49].mxu0 }
 0x31d   :  { %v6625_v42 = vadd.f32 %v4110_v51, %v4109_v11  ;;  %v4112_v63 = vpop.f32.mrb[50].mxu0 }
 0x31e   :  { %v4113_v38 = vpop.f32.mrb[51].mxu0 }
 0x31f   :  { %v7091_v57 = vsub.f32 255.0, %v6625_v42  ;;  %v6628_v47 = vadd.f32 %v4113_v38, %v4112_v63 }
 0x321   :  { %v7092_v58 = vsub.f32 255.0, %v6628_v47  ;;  %2882 = vperm.xlu1 %4259, %v7091_v57  }
 0x323   :  { %v4115_v2 = vpop.f32.mrb[52].mxu0  ;;  %2887 = vperm.xlu0 %4258, %v7092_v58  }
 0x324   :  { %v4116_v41 = vpop.f32.mrb[53].mxu0 }
 0x325   :  { %v6635_v40 = vadd.f32 %v4116_v41, %v4115_v2  ;;  %v4118_v61 = vpop.f32.mrb[54].mxu0 }
 0x326   :  { %v4119_v11 = vpop.f32.mrb[55].mxu0 }
 0x327   :  { %v7095_v51 = vsub.f32 255.0, %v6635_v40  ;;  %v6638_v7 = vadd.f32 %v4119_v11, %v4118_v61 }
 0x329   :  { %v7096_v63 = vsub.f32 255.0, %v6638_v7  ;;  %2892 = vperm.xlu1 %4259, %v7095_v51  }
 0x32b   :  { %v4121_v38 = vpop.f32.mrb[56].mxu0  ;;  %2897 = vperm.xlu0 %4258, %v7096_v63  }
 0x32c   :  { %v4122_v57 = vpop.f32.mrb[57].mxu0 }
 0x32d   :  { %v6645_v58 = vadd.f32 %v4122_v57, %v4121_v38  ;;  %v4124_v2 = vpop.f32.mrb[58].mxu0 }
 0x32e   :  { %v4125_v41 = vpop.f32.mrb[59].mxu0 }
 0x32f   :  { %v7099_v19 = vsub.f32 255.0, %v6645_v58  ;;  %v6648_v46 = vadd.f32 %v4125_v41, %v4124_v2 }
 0x331   :  { %v7100_v61 = vsub.f32 255.0, %v6648_v46  ;;  %2902 = vperm.xlu1 %4259, %v7099_v19  }
 0x333   :  { %v4127_v11 = vpop.f32.mrb[60].mxu0  ;;  %2907 = vperm.xlu0 %4258, %v7100_v61  }
 0x334   :  { %v4128_v51 = vpop.f32.mrb[61].mxu0 }
 0x335   :  { %v6655_v63 = vadd.f32 %v4128_v51, %v4127_v11  ;;  %v4130_v57 = vpop.f32.mrb[62].mxu0 }
 0x336   :  { %v4131_v38 = vpop.f32.mrb[63].mxu0 }
 0x337   :  { %v7104_v14 = vsub.f32 255.0, %v6655_v63  ;;  %v6658_v17 = vadd.f32 %v4131_v38, %v4130_v57 }
 0x339   :  { %v7103_v2 = vsub.f32 255.0, %v6658_v17  ;;  %2912 = vperm.xlu1 %4259, %v7104_v14  }
 0x33b   :  { %v4133_v41 = vpop.f32.mrb[64].mxu0  ;;  %2917 = vperm.xlu0 %4258, %v7103_v2  }
 0x33c   :  { %v4134_v19 = vpop.f32.mrb[65].mxu0 }
 0x33d   :  { %v6665_v61 = vadd.f32 %v4134_v19, %v4133_v41  ;;  %v4136_v51 = vpop.f32.mrb[66].mxu0 }
 0x33e   :  { %v4137_v11 = vpop.f32.mrb[67].mxu0 }
 0x33f   :  { %v7109_v1 = vsub.f32 255.0, %v6665_v61  ;;  %v6668_v32 = vadd.f32 %v4137_v11, %v4136_v51 }
 0x341   :  { %v7110_v57 = vsub.f32 255.0, %v6668_v32  ;;  %2922 = vperm.xlu1 %4259, %v7109_v1  }
 0x343   :  { %2927 = vperm.xlu0 %4258, %v7110_v57  }
 0x347   :  { %v6675_v38 = vpop.f32.mrb[4].mxu1 }
 0x348   :  { %v6677_v2 = vpop.f32.mrb[5].mxu1 }
 0x349   :  { %v2006_v19 = vpop.f32.mrb[6].mxu1 }
 0x34a   :  { %v2007_v41 = vpop.f32.mrb[7].mxu1 }
 0x367   :  { %v4155_v14 = vpop.f32.mrb[8].mxu1 }
 0x368   :  { %v4156_v24 = vpop.f32.mrb[9].mxu1 }
 0x369   :  { %v4157_v6 = vadd.f32 %v4156_v24, %v4155_v14  ;;  %v4158_v12 = vpop.f32.mrb[10].mxu1 }
 0x36a   :  { %v4159_v51 = vpop.f32.mrb[11].mxu1 }
 0x36b   :  { %v2674_v11 = vsub.f32 255.0, %v4157_v6  ;;  %v4160_v56 = vadd.f32 %v4159_v51, %v4158_v12 }
 0x36d   :  { %vm2706_vm4 = vcmp.lt.f32.partialorder %v2674_v11, 3.0  ;;  %v2675_v1 = vsub.f32 255.0, %v4160_v56 }
 0x36e   :  { %vm2738_vm14 = vmand %vm1930_vm10, %vm2706_vm4 }
 0x36f   :  { %vm2707_vm5 = vcmp.lt.f32.partialorder %v2675_v1, 3.0  ;;  %v4161_v57 = vpop.f32.mrb[12].mxu1  ;;  %v3002_v19 = vsel %vm2738_vm14, 1, %v7167_v59  ;;  %vm1935_vm14 = vcmp.lt.f32.partialorder %v1901_v10, 64.0 }
 0x370   :  { %vm2739_vm13 = vmand %vm1931_vm0, %vm2707_vm5  ;;  %v4162_v41 = vpop.f32.mrb[13].mxu1  ;;  %3035 = vperm.xlu1 %4259, %v3002_v19  }
 0x371   :  { %v4163_v24 = vadd.f32 %v4162_v41, %v4161_v57  ;;  %v4164_v14 = vpop.f32.mrb[14].mxu1  ;;  %v3003_v12 = vsel %vm2739_vm13, 1, %v7167_v59  ;;  %vm1936_vm13 = vcmp.lt.f32.partialorder %v1902_v21, 64.0 }
 0x372   :  { %v4165_v6 = vpop.f32.mrb[15].mxu1  ;;  %3038 = vperm.xlu0 %4258, %v3003_v12  }
 0x373   :  { %v2676_v13 = vsub.f32 255.0, %v4163_v24  ;;  %v4166_v25 = vadd.f32 %v4165_v6, %v4164_v14 }
 0x375   :  { %vm2708_vm2 = vcmp.lt.f32.partialorder %v2676_v13, 3.0  ;;  %v2677_v44 = vsub.f32 255.0, %v4166_v25 }
 0x376   :  { %vm2740_vm6 = vmand %vm1932_vm9, %vm2708_vm2 }
 0x377   :  { %vm2709_vm12 = vcmp.lt.f32.partialorder %v2677_v44, 3.0  ;;  %v4167_v20 = vpop.f32.mrb[16].mxu1  ;;  %v3004_v56 = vsel %vm2740_vm6, 1, %v7167_v59  ;;  %vm1937_vm6 = vcmp.lt.f32.partialorder %v1903_v36, 64.0 }
 0x378   :  { %vm2741_vm15 = vmand %vm1933_vm11, %vm2709_vm12  ;;  %v4168_v1 = vpop.f32.mrb[17].mxu1  ;;  %3041 = vperm.xlu1 %4259, %v3004_v56  }
 0x379   :  { %v4169_v57 = vadd.f32 %v4168_v1, %v4167_v20  ;;  %v4170_v51 = vpop.f32.mrb[18].mxu1  ;;  %v3005_v11 = vsel %vm2741_vm15, 1, %v7167_v59  ;;  %vm1938_vm15 = vcmp.lt.f32.partialorder %v1904_v55, 64.0 }
 0x37a   :  { %v4171_v19 = vpop.f32.mrb[19].mxu1  ;;  %3044 = vperm.xlu0 %4258, %v3005_v11  }
 0x37b   :  { %v2678_v3 = vsub.f32 255.0, %v4169_v57  ;;  %v4172_v53 = vadd.f32 %v4171_v19, %v4170_v51 }
 0x37d   :  { %vm2710_vm10 = vcmp.lt.f32.partialorder %v2678_v3, 3.0  ;;  %v2679_v29 = vsub.f32 255.0, %v4172_v53 }
 0x37e   :  { %vm2742_vm4 = vmand %vm1934_vm7, %vm2710_vm10 }
 0x37f   :  { %vm2711_vm0 = vcmp.lt.f32.partialorder %v2679_v29, 3.0  ;;  %v4173_v35 = vpop.f32.mrb[20].mxu1  ;;  %v3006_v41 = vsel %vm2742_vm4, 1, %v7167_v59  ;;  %vm1939_vm4 = vcmp.lt.f32.partialorder %v1905_v9, 64.0  ;;  %v7172_v9 = vsub.f32 255.0, %v6547_v0 }
 0x380   :  { %vm2743_vm5 = vmand %vm1935_vm14, %vm2711_vm0  ;;  %v4174_v24 = vpop.f32.mrb[21].mxu1  ;;  %3047 = vperm.xlu1 %4259, %v3006_v41  }
 0x381   :  { %v4175_v14 = vadd.f32 %v4174_v24, %v4173_v35  ;;  %v4176_v12 = vpop.f32.mrb[22].mxu1  ;;  %v3007_v6 = vsel %vm2743_vm5, 1, %v7167_v59  ;;  %vm1940_vm5 = vcmp.lt.f32.partialorder %v1906_v16, 64.0 }
 0x382   :  { %v4177_v13 = vpop.f32.mrb[23].mxu1  ;;  %3050 = vperm.xlu0 %4258, %v3007_v6  }
 0x383   :  { %v2680_v31 = vsub.f32 255.0, %v4175_v14  ;;  %v4178_v60 = vadd.f32 %v4177_v13, %v4176_v12 }
 0x385   :  { %vm2712_vm9 = vcmp.lt.f32.partialorder %v2680_v31, 3.0  ;;  %v2681_v49 = vsub.f32 255.0, %v4178_v60  ;;  %v7173_v31 = vsub.f32 255.0, %v6559_v26  ;;  %v7174_v60 = vsub.f32 255.0, %v6563_v4 }
 0x386   :  { %vm2744_vm2 = vmand %vm1936_vm13, %vm2712_vm9 }
 0x387   :  { %vm2713_vm11 = vcmp.lt.f32.partialorder %v2681_v49, 3.0  ;;  %v4179_v10 = vpop.f32.mrb[24].mxu1  ;;  %v3008_v25 = vsel %vm2744_vm2, 1, %v7167_v59  ;;  %vm1941_vm2 = vcmp.lt.f32.partialorder %v7172_v9, 64.0 }
 0x388   :  { %vm2745_vm12 = vmand %vm1937_vm6, %vm2713_vm11  ;;  %v4180_v44 = vpop.f32.mrb[25].mxu1  ;;  %3053 = vperm.xlu1 %4259, %v3008_v25  }
 0x389   :  { %v4181_v20 = vadd.f32 %v4180_v44, %v4179_v10  ;;  %v4182_v56 = vpop.f32.mrb[26].mxu1  ;;  %v3009_v1 = vsel %vm2745_vm12, 1, %v7167_v59  ;;  %vm1942_vm12 = vcmp.lt.f32.partialorder %v7173_v31, 64.0 }
 0x38a   :  { %v4183_v57 = vpop.f32.mrb[27].mxu1  ;;  %3056 = vperm.xlu0 %4258, %v3009_v1  }
 0x38b   :  { %v2682_v52 = vsub.f32 255.0, %v4181_v20  ;;  %v4184_v21 = vadd.f32 %v4183_v57, %v4182_v56 }
 0x38d   :  { %vm2714_vm7 = vcmp.lt.f32.partialorder %v2682_v52, 3.0  ;;  %v2683_v50 = vsub.f32 255.0, %v4184_v21  ;;  %v7175_v52 = vsub.f32 255.0, %v6575_v54  ;;  %v7176_v21 = vsub.f32 255.0, %v6579_v28 }
 0x38e   :  { %vm2746_vm10 = vmand %vm1938_vm15, %vm2714_vm7 }
 0x38f   :  { %vm2715_vm14 = vcmp.lt.f32.partialorder %v2683_v50, 3.0  ;;  %v4185_v36 = vpop.f32.mrb[28].mxu1  ;;  %v3010_v51 = vsel %vm2746_vm10, 1, %v7167_v59  ;;  %vm1943_vm10 = vcmp.lt.f32.partialorder %v7174_v60, 64.0  ;;  %v7180_v60 = vsub.f32 255.0, %v6608_v15 }
 0x390   :  { %vm2747_vm0 = vmand %vm1939_vm4, %vm2715_vm14  ;;  %v4186_v11 = vpop.f32.mrb[29].mxu1  ;;  %3059 = vperm.xlu1 %4259, %v3010_v51  }
 0x391   :  { %v4187_v19 = vadd.f32 %v4186_v11, %v4185_v36  ;;  %v4188_v3 = vpop.f32.mrb[30].mxu1  ;;  %v3011_v53 = vsel %vm2747_vm0, 1, %v7167_v59  ;;  %vm1944_vm0 = vcmp.lt.f32.partialorder %v7175_v52, 64.0 }
 0x392   :  { %v4189_v29 = vpop.f32.mrb[31].mxu1  ;;  %3062 = vperm.xlu0 %4258, %v3011_v53  }
 0x393   :  { %v2684_v18 = vsub.f32 255.0, %v4187_v19  ;;  %v4190_v55 = vadd.f32 %v4189_v29, %v4188_v3 }
 0x395   :  { %vm2716_vm13 = vcmp.lt.f32.partialorder %v2684_v18, 3.0  ;;  %v2685_v8 = vsub.f32 255.0, %v4190_v55  ;;  %v7177_v18 = vsub.f32 255.0, %v6591_v34  ;;  %v7178_v55 = vsub.f32 255.0, %v6595_v48 }
 0x396   :  { %vm2748_vm9 = vmand %vm1940_vm5, %vm2716_vm13 }
 0x397   :  { %vm2717_vm6 = vcmp.lt.f32.partialorder %v2685_v8, 3.0  ;;  %v4191_v35 = vpop.f32.mrb[32].mxu1  ;;  %v3012_v41 = vsel %vm2748_vm9, 1, %v7167_v59  ;;  %vm1945_vm9 = vcmp.lt.f32.partialorder %v7176_v21, 64.0  ;;  %v6731_v8 = vpop.permute.xlu1 %2772 }
 0x398   :  { %vm2749_vm11 = vmand %vm1941_vm2, %vm2717_vm6  ;;  %v4192_v24 = vpop.f32.mrb[33].mxu1  ;;  %3065 = vperm.xlu1 %4259, %v3012_v41  }
 0x399   :  { %v4193_v14 = vadd.f32 %v4192_v24, %v4191_v35  ;;  %v4194_v12 = vpop.f32.mrb[34].mxu1  ;;  %v3013_v6 = vsel %vm2749_vm11, 1, %v7167_v59  ;;  %vm1946_vm11 = vcmp.lt.f32.partialorder %v7177_v18, 64.0  ;;  %v6734_v24 = vpop.permute.xlu0 %2777 }
 0x39a   :  { %v4195_v13 = vpop.f32.mrb[35].mxu1  ;;  %3068 = vperm.xlu0 %4258, %v3013_v6  }
 0x39b   :  { %v2686_v39 = vsub.f32 255.0, %v4193_v14  ;;  %v4196_v16 = vadd.f32 %v4195_v13, %v4194_v12  ;;  %v6737_v13 = vpop.permute.xlu1 %2782 }
 0x39d   :  { %vm2718_vm15 = vcmp.lt.f32.partialorder %v2686_v39, 3.0  ;;  %v2687_v0 = vsub.f32 255.0, %v4196_v16  ;;  %v7179_v16 = vsub.f32 255.0, %v6605_v5  ;;  %v6741_v31 = vpop.permute.xlu0 %2787 }
 0x39e   :  { %vm2750_vm7 = vmand %vm1942_vm12, %vm2718_vm15 }
 0x39f   :  { %vm2719_vm4 = vcmp.lt.f32.partialorder %v2687_v0, 3.0  ;;  %v4197_v49 = vpop.f32.mrb[36].mxu1  ;;  %v3014_v10 = vsel %vm2750_vm7, 1, %v7167_v59  ;;  %vm1947_vm7 = vcmp.lt.f32.partialorder %v7178_v55, 64.0 }
 0x3a0   :  { %vm2751_vm14 = vmand %vm1943_vm10, %vm2719_vm4  ;;  %v4198_v25 = vpop.f32.mrb[37].mxu1  ;;  %3071 = vperm.xlu1 %4259, %v3014_v10  }
 0x3a1   :  { %v4199_v44 = vadd.f32 %v4198_v25, %v4197_v49  ;;  %v4200_v20 = vpop.f32.mrb[38].mxu1  ;;  %v3015_v56 = vsel %vm2751_vm14, 1, %v7167_v59  ;;  %vm1948_vm14 = vcmp.lt.f32.partialorder %v7179_v16, 64.0  ;;  %v6745_v49 = vpop.permute.xlu1 %2792 }
 0x3a2   :  { %v4201_v1 = vpop.f32.mrb[39].mxu1  ;;  %3074 = vperm.xlu0 %4258, %v3015_v56  }
 0x3a3   :  { %v2688_v26 = vsub.f32 255.0, %v4199_v44  ;;  %v4202_v57 = vadd.f32 %v4201_v1, %v4200_v20  ;;  %v6748_v20 = vpop.permute.xlu0 %2797 }
 0x3a5   :  { %vm2720_vm5 = vcmp.lt.f32.partialorder %v2688_v26, 3.0  ;;  %v2689_v4 = vsub.f32 255.0, %v4202_v57  ;;  %v6751_v57 = vpop.permute.xlu1 %2802 }
 0x3a6   :  { %vm2752_vm13 = vmand %vm1944_vm0, %vm2720_vm5 }
 0x3a7   :  { %vm2721_vm2 = vcmp.lt.f32.partialorder %v2689_v4, 3.0  ;;  %v4203_v50 = vpop.f32.mrb[40].mxu1  ;;  %v3016_v36 = vsel %vm2752_vm13, 1, %v7167_v59  ;;  %vm1949_vm13 = vcmp.lt.f32.partialorder %v7180_v60, 64.0  ;;  %v7181_v4 = vsub.f32 255.0, %v6615_v30  ;;  %v6755_v21 = vpop.permute.xlu0 %2807 }
 0x3a8   :  { %vm2753_vm6 = vmand %vm1945_vm9, %vm2721_vm2  ;;  %v4204_v51 = vpop.f32.mrb[41].mxu1  ;;  %3077 = vperm.xlu1 %4259, %v3016_v36   ;;  %v7182_v36 = vsub.f32 255.0, %v6618_v22 }
 0x3a9   :  { %v4205_v11 = vadd.f32 %v4204_v51, %v4203_v50  ;;  %v4206_v19 = vpop.f32.mrb[42].mxu1  ;;  %v3017_v3 = vsel %vm2753_vm6, 1, %v7167_v59  ;;  %vm1950_vm6 = vcmp.lt.f32.partialorder %v7181_v4, 64.0  ;;  %v6759_v51 = vpop.permute.xlu1 %2812 }
 0x3aa   :  { %v4207_v53 = vpop.f32.mrb[43].mxu1  ;;  %3080 = vperm.xlu0 %4258, %v3017_v3  }
 0x3ab   :  { %v2690_v54 = vsub.f32 255.0, %v4205_v11  ;;  %v4208_v29 = vadd.f32 %v4207_v53, %v4206_v19  ;;  %v6762_v53 = vpop.permute.xlu0 %2817 }
 0x3ad   :  { %vm2722_vm12 = vcmp.lt.f32.partialorder %v2690_v54, 3.0  ;;  %v2691_v28 = vsub.f32 255.0, %v4208_v29 }
 0x3ae   :  { %vm2754_vm15 = vmand %vm1946_vm11, %vm2722_vm12 }
 0x3af   :  { %vm2723_vm10 = vcmp.lt.f32.partialorder %v2691_v28, 3.0  ;;  %v4209_v9 = vpop.f32.mrb[44].mxu1  ;;  %v3018_v35 = vsel %vm2754_vm15, 1, %v7167_v59  ;;  %vm1951_vm15 = vcmp.lt.f32.partialorder %v7182_v36, 64.0  ;;  %v6765_v28 = vpop.permute.xlu1 %2822 }
 0x3b0   :  { %vm2755_vm4 = vmand %vm1947_vm7, %vm2723_vm10  ;;  %v4210_v41 = vpop.f32.mrb[45].mxu1  ;;  %3083 = vperm.xlu1 %4259, %v3018_v35   ;;  %v6769_v35 = vpop.permute.xlu0 %2827 }
 0x3b1   :  { %v4211_v14 = vadd.f32 %v4210_v41, %v4209_v9  ;;  %v4212_v34 = vpop.f32.mrb[46].mxu1  ;;  %v3019_v12 = vsel %vm2755_vm4, 1, %v7167_v59  ;;  %v7183_v9 = vsub.f32 255.0, %v6625_v42 }
 0x3b2   :  { %v4213_v6 = vpop.f32.mrb[47].mxu1  ;;  %3086 = vperm.xlu0 %4258, %v3019_v12  }
 0x3b3   :  { %v2692_v48 = vsub.f32 255.0, %v4211_v14  ;;  %v4214_v39 = vadd.f32 %v4213_v6, %v4212_v34  ;;  %vm1952_vm4 = vcmp.lt.f32.partialorder %v7183_v9, 64.0  ;;  %v7184_v14 = vsub.f32 255.0, %v6628_v47  ;;  %v6773_v34 = vpop.permute.xlu1 %2832 }
 0x3b5   :  { %vm2724_vm0 = vcmp.lt.f32.partialorder %v2692_v48, 3.0  ;;  %v2693_v0 = vsub.f32 255.0, %v4214_v39  ;;  %v6776_v39 = vpop.permute.xlu0 %2837 }
 0x3b6   :  { %vm2756_vm5 = vmand %vm1948_vm14, %vm2724_vm0 }
 0x3b7   :  { %vm2725_vm9 = vcmp.lt.f32.partialorder %v2693_v0, 3.0  ;;  %v4215_v10 = vpop.f32.mrb[48].mxu1  ;;  %v3020_v25 = vsel %vm2756_vm5, 1, %v7167_v59  ;;  %vm1953_vm5 = vcmp.lt.f32.partialorder %v7184_v14, 64.0 }
 0x3b8   :  { %vm2757_vm2 = vmand %vm1949_vm13, %vm2725_vm9  ;;  %v4216_v44 = vpop.f32.mrb[49].mxu1  ;;  %3089 = vperm.xlu1 %4259, %v3020_v25  }
 0x3b9   :  { %v4217_v5 = vadd.f32 %v4216_v44, %v4215_v10  ;;  %v4218_v56 = vpop.f32.mrb[50].mxu1  ;;  %v3021_v1 = vsel %vm2757_vm2, 1, %v7167_v59  ;;  %v6779_v10 = vpop.permute.xlu1 %2842  ;;  %v7185_v44 = vsub.f32 255.0, %v6635_v40 }
 0x3ba   :  { %v4219_v26 = vpop.f32.mrb[51].mxu1  ;;  %3092 = vperm.xlu0 %4258, %v3021_v1   ;;  %v7186_v1 = vsub.f32 255.0, %v6638_v7 }
 0x3bb   :  { %v2694_v15 = vsub.f32 255.0, %v4217_v5  ;;  %v4220_v52 = vadd.f32 %v4219_v26, %v4218_v56  ;;  %vm1954_vm2 = vcmp.lt.f32.partialorder %v7185_v44, 64.0  ;;  %v6783_v5 = vpop.permute.xlu0 %2847  ;;  %v7190_v44 = vsub.f32 255.0, %v6658_v17 }
 0x3bd   :  { %vm2726_vm11 = vcmp.lt.f32.partialorder %v2694_v15, 3.0  ;;  %v2695_v50 = vsub.f32 255.0, %v4220_v52  ;;  %v6787_v26 = vpop.permute.xlu1 %2852 }
 0x3be   :  { %vm2758_vm12 = vmand %vm1950_vm6, %vm2726_vm11 }
 0x3bf   :  { %vm2727_vm7 = vcmp.lt.f32.partialorder %v2695_v50, 3.0  ;;  %v4221_v11 = vpop.f32.mrb[52].mxu1  ;;  %v3022_v19 = vsel %vm2758_vm12, 1, %v7167_v59  ;;  %vm1955_vm12 = vcmp.lt.f32.partialorder %v7186_v1, 64.0  ;;  %v6790_v50 = vpop.permute.xlu0 %2857 }
 0x3c0   :  { %vm2759_vm10 = vmand %vm1951_vm15, %vm2727_vm7  ;;  %v4222_v3 = vpop.f32.mrb[53].mxu1  ;;  %3095 = vperm.xlu1 %4259, %v3022_v19  }
 0x3c1   :  { %v4223_v30 = vadd.f32 %v4222_v3, %v4221_v11  ;;  %v4224_v54 = vpop.f32.mrb[54].mxu1  ;;  %v3023_v29 = vsel %vm2759_vm10, 1, %v7167_v59  ;;  %v6793_v3 = vpop.permute.xlu1 %2862 }
 0x3c2   :  { %v4225_v18 = vpop.f32.mrb[55].mxu1  ;;  %3098 = vperm.xlu0 %4258, %v3023_v29  }
 0x3c3   :  { %v2696_v22 = vsub.f32 255.0, %v4223_v30  ;;  %v4226_v55 = vadd.f32 %v4225_v18, %v4224_v54  ;;  %v7187_v54 = vsub.f32 255.0, %v6645_v58  ;;  %v6797_v29 = vpop.permute.xlu0 %2867 }
 0x3c5   :  { %vm2728_vm14 = vcmp.lt.f32.partialorder %v2696_v22, 3.0  ;;  %v2697_v41 = vsub.f32 255.0, %v4226_v55  ;;  %vm1956_vm10 = vcmp.lt.f32.partialorder %v7187_v54, 64.0  ;;  %v7188_v22 = vsub.f32 255.0, %v6648_v46  ;;  %v6801_v55 = vpop.permute.xlu1 %2872 }
 0x3c6   :  { %vm2760_vm0 = vmand %vm1952_vm4, %vm2728_vm14 }
 0x3c7   :  { %vm2729_vm13 = vcmp.lt.f32.partialorder %v2697_v41, 3.0  ;;  %v4227_v12 = vpop.f32.mrb[56].mxu1  ;;  %v3024_v6 = vsel %vm2760_vm0, 1, %v7167_v59  ;;  %vm1957_vm0 = vcmp.lt.f32.partialorder %v7188_v22, 64.0  ;;  %v7192_v22 = vsub.f32 255.0, %v6668_v32 }
 0x3c8   :  { %vm2761_vm9 = vmand %vm1953_vm5, %vm2729_vm13  ;;  %v4228_v48 = vpop.f32.mrb[57].mxu1  ;;  %3101 = vperm.xlu1 %4259, %v3024_v6   ;;  %v6841_v32 = vrot.slane %v6675_v38, %v7166_v43 }
 0x3c9   :  { %v4229_v42 = vadd.f32 %v4228_v48, %v4227_v12  ;;  %v4230_v16 = vpop.f32.mrb[58].mxu1  ;;  %v3025_v0 = vsel %vm2761_vm9, 1, %v7167_v59  ;;  %v6804_v12 = vpop.permute.xlu0 %2877 }
 0x3ca   :  { %v4231_v60 = vpop.f32.mrb[59].mxu1  ;;  %3104 = vperm.xlu0 %4258, %v3025_v0  }
 0x3cb   :  { %v2698_v47 = vsub.f32 255.0, %v4229_v42  ;;  %v4232_v25 = vadd.f32 %v4231_v60, %v4230_v16  ;;  %v6807_v16 = vpop.permute.xlu1 %2882  ;;  %v7189_v60 = vsub.f32 255.0, %v6655_v63 }
 0x3cd   :  { %vm2730_vm6 = vcmp.lt.f32.partialorder %v2698_v47, 3.0  ;;  %v2699_v56 = vsub.f32 255.0, %v4232_v25  ;;  %vm1958_vm9 = vcmp.lt.f32.partialorder %v7189_v60, 64.0  ;;  %v6811_v47 = vpop.permute.xlu0 %2887 }
 0x3ce   :  { %vm2762_vm11 = vmand %vm1954_vm2, %vm2730_vm6 }
 0x3cf   :  { %vm2731_vm15 = vcmp.lt.f32.partialorder %v2699_v56, 3.0  ;;  %v4233_v15 = vpop.f32.mrb[60].mxu1  ;;  %v3026_v52 = vsel %vm2762_vm11, 1, %v7167_v59  ;;  %vm1959_vm11 = vcmp.lt.f32.partialorder %v7190_v44, 64.0  ;;  %v6815_v56 = vpop.permute.xlu1 %2892 }
 0x3d0   :  { %vm2763_vm7 = vmand %vm1955_vm12, %vm2731_vm15  ;;  %v4234_v4 = vpop.f32.mrb[61].mxu1  ;;  %3107 = vperm.xlu1 %4259, %v3026_v52  }
 0x3d1   :  { %v4235_v40 = vadd.f32 %v4234_v4, %v4233_v15  ;;  %v4236_v36 = vpop.f32.mrb[62].mxu1  ;;  %v3027_v11 = vsel %vm2763_vm7, 1, %v7167_v59  ;;  %v6818_v4 = vpop.permute.xlu0 %2897 }
 0x3d2   :  { %v4237_v19 = vpop.f32.mrb[63].mxu1  ;;  %3110 = vperm.xlu0 %4258, %v3027_v11  }
 0x3d3   :  { %v2700_v7 = vsub.f32 255.0, %v4235_v40  ;;  %v4238_v30 = vadd.f32 %v4237_v19, %v4236_v36  ;;  %v6821_v19 = vpop.permute.xlu1 %2902 }
 0x3d5   :  { %vm2732_vm4 = vcmp.lt.f32.partialorder %v2700_v7, 3.0  ;;  %v2701_v18 = vsub.f32 255.0, %v4238_v30  ;;  %v7191_v30 = vsub.f32 255.0, %v6665_v61  ;;  %v6825_v54 = vpop.permute.xlu0 %2907 }
 0x3d6   :  { %vm2764_vm14 = vmand %vm1956_vm10, %vm2732_vm4 }
 0x3d7   :  { %vm2733_vm5 = vcmp.lt.f32.partialorder %v2701_v18, 3.0  ;;  %v4239_v9 = vpop.f32.mrb[64].mxu1  ;;  %v3028_v41 = vsel %vm2764_vm14, 1, %v7167_v59  ;;  %vm1960_vm7 = vcmp.lt.f32.partialorder %v7191_v30, 64.0  ;;  %vm1961_vm14 = vcmp.lt.f32.partialorder %v7192_v22, 64.0 }
 0x3d8   :  { %vm2765_vm13 = vmand %vm1957_vm0, %vm2733_vm5  ;;  %v4240_v14 = vpop.f32.mrb[65].mxu1  ;;  %3113 = vperm.xlu1 %4259, %v3028_v41  }
 0x3d9   :  { %v4241_v58 = vadd.f32 %v4240_v14, %v4239_v9  ;;  %v4242_v6 = vpop.f32.mrb[66].mxu1  ;;  %v3029_v48 = vsel %vm2765_vm13, 1, %v7167_v59  ;;  %v6829_v9 = vpop.permute.xlu1 %2912  ;;  %vm2938_vm13 = vcmp.eq.f32.partialorder %v6731_v8, %v6841_v32 }
 0x3da   :  { %v4243_v42 = vpop.f32.mrb[67].mxu1  ;;  %3116 = vperm.xlu0 %4258, %v3029_v48   ;;  %v6832_v14 = vpop.permute.xlu0 %2917  ;;  %v6845_v48 = vrot.slane %v6677_v2, %v7166_v43 }
 0x3db   :  { %v2702_v46 = vsub.f32 255.0, %v4241_v58  ;;  %v4244_v0 = vadd.f32 %v4243_v42, %v4242_v6 }
 0x3dd   :  { %vm2734_vm2 = vcmp.lt.f32.partialorder %v2702_v46, 3.0  ;;  %v2703_v25 = vsub.f32 255.0, %v4244_v0  ;;  %v6835_v58 = vpop.permute.xlu1 %2922 }
 0x3de   :  { %vm2766_vm6 = vmand %vm1958_vm9, %vm2734_vm2  ;;  %v6837_v6 = vpop.permute.xlu0 %2927  ;;  %vm2939_vm2 = vcmp.eq.f32.partialorder %v6731_v8, %v6845_v48 }
 0x3df   :  { %vm2735_vm12 = vcmp.lt.f32.partialorder %v2703_v25, 3.0  ;;  %v4245_v1 = vpop.f32.mrb[68].mxu1  ;;  %v3030_v15 = vsel %vm2766_vm6, 1, %v7167_v59 }
 0x3e0   :  { %vm2767_vm15 = vmand %vm1959_vm11, %vm2735_vm12  ;;  %v4246_v52 = vpop.f32.mrb[69].mxu1  ;;  %3119 = vperm.xlu1 %4259, %v3030_v15   ;;  %vm2940_vm11 = vcmp.eq.f32.partialorder %v6734_v24, %v6841_v32 }
 0x3e1   :  { %v4247_v63 = vadd.f32 %v4246_v52, %v4245_v1  ;;  %v4248_v40 = vpop.f32.mrb[70].mxu1  ;;  %v3031_v36 = vsel %vm2767_vm15, 1, %v7167_v59 }
 0x3e2   :  { %v4249_v11 = vpop.f32.mrb[71].mxu1  ;;  %3122 = vperm.xlu0 %4258, %v3031_v36  }
 0x3e3   :  { %v2704_v17 = vsub.f32 255.0, %v4247_v63  ;;  %v4250_v7 = vadd.f32 %v4249_v11, %v4248_v40 }
 0x3e5   :  { %vm2736_vm10 = vcmp.lt.f32.partialorder %v2704_v17, 3.0  ;;  %v2705_v18 = vsub.f32 255.0, %v4250_v7 }
 0x3e6   :  { %vm2768_vm4 = vmand %vm1960_vm7, %vm2736_vm10  ;;  %vm2941_vm7 = vcmp.eq.f32.partialorder %v6734_v24, %v6845_v48 }
 0x3e7   :  { %vm2737_vm0 = vcmp.lt.f32.partialorder %v2705_v18, 3.0  ;;  %v3032_v41 = vsel %vm2768_vm4, 1, %v7167_v59 }
 0x3e8   :  { %vm2769_vm5 = vmand %vm1961_vm14, %vm2737_vm0  ;;  %3125 = vperm.xlu1 %4259, %v3032_v41  }
 0x3e9   :  { %v3033_v61 = vsel %vm2769_vm5, 1, %v7167_v59  ;;  %vm2942_vm5 = vcmp.eq.f32.partialorder %v6737_v13, %v6841_v32 }
 0x3ea   :  { %3128 = vperm.xlu0 %4258, %v3033_v61  }
 0x3ef   :  { %v3036_v42 = vpop.permute.xlu1 %3035 }
 0x3f0   :  { %vm3130_vm9 = vcmp.eq.s32.totalorder %v3036_v42, 1 }
 0x3f1   :  { %vm3162_vm6 = vmand %vm3130_vm9, %vm2938_vm13  ;;  %v3039_v46 = vpop.permute.xlu0 %3038 }
 0x3f2   :  { %vm3163_vm12 = vmand %vm3130_vm9, %vm2939_vm2  ;;  %vm3131_vm15 = vcmp.eq.s32.totalorder %v3039_v46, 1  ;;  %vm2943_vm9 = vcmp.eq.f32.partialorder %v6737_v13, %v6845_v48 }
 0x3f3   :  { %vm3164_vm10 = vmand %vm3131_vm15, %vm2940_vm11  ;;  %vm2944_vm11 = vcmp.eq.f32.partialorder %v6741_v31, %v6841_v32 }
 0x3f4   :  { %vm3165_vm4 = vmand %vm3131_vm15, %vm2941_vm7 }
 0x3f5   :  { %vm3963_vm14 = vmpackc.low %vm3165_vm4, %vm3163_vm12 }
 0x3f6   :  { %vm3965_vm0 = vmpackc.low %vm3164_vm10, %vm3162_vm6  ;;  %3964 = vmatprep.subr.msk.bf16.mxu0 %vm3963_vm14, %v7145_v62  ;;  %vm2945_vm6 = vcmp.eq.f32.partialorder %v6741_v31, %v6845_v48 }
 0x3f7   :  { %3966 = vmatpush1.bf16.msk.msra.mxu0 %vm3965_vm0, %v7145_v62  ;;  %v3042_v43 = vpop.permute.xlu1 %3041  ;;  %vm2946_vm0 = vcmp.eq.f32.partialorder %v6745_v49, %v6841_v32 }
 0x3f8   :  { %vm3132_vm13 = vcmp.eq.s32.totalorder %v3042_v43, 1 }
 0x3f9   :  { %vm3166_vm2 = vmand %vm3132_vm13, %vm2942_vm5  ;;  %v3045_v2 = vpop.permute.xlu0 %3044 }
 0x3fa   :  { %vm3167_vm15 = vmand %vm3132_vm13, %vm2943_vm9  ;;  %vm3133_vm12 = vcmp.eq.s32.totalorder %v3045_v2, 1  ;;  %vm2947_vm13 = vcmp.eq.f32.partialorder %v6745_v49, %v6845_v48 }
 0x3fb   :  { %vm3168_vm7 = vmand %vm3133_vm12, %vm2944_vm11  ;;  %vm2948_vm11 = vcmp.eq.f32.partialorder %v6748_v20, %v6841_v32 }
 0x3fc   :  { %vm3169_vm10 = vmand %vm3133_vm12, %vm2945_vm6 }
 0x3fd   :  { %vm3967_vm4 = vmpackc.low %vm3169_vm10, %vm3167_vm15 }
 0x3fe   :  { %vm3969_vm14 = vmpackc.low %vm3168_vm7, %vm3166_vm2  ;;  %3968 = vmatprep.subr.msk.bf16.mxu0 %vm3967_vm4, %v7145_v62  ;;  %vm2949_vm2 = vcmp.eq.f32.partialorder %v6748_v20, %v6845_v48 }
 0x3ff   :  { %3970 = vmatpush1.bf16.msk.msra.mxu0 %vm3969_vm14, %v7145_v62  ;;  %v3048_v38 = vpop.permute.xlu1 %3047  ;;  %vm2950_vm14 = vcmp.eq.f32.partialorder %v6751_v57, %v6841_v32 }
 0x400   :  { %vm3134_vm5 = vcmp.eq.s32.totalorder %v3048_v38, 1 }
 0x401   :  { %vm3170_vm9 = vmand %vm3134_vm5, %vm2946_vm0  ;;  %v3051_v8 = vpop.permute.xlu0 %3050 }
 0x402   :  { %vm3171_vm12 = vmand %vm3134_vm5, %vm2947_vm13  ;;  %vm3135_vm15 = vcmp.eq.s32.totalorder %v3051_v8, 1  ;;  %vm2951_vm5 = vcmp.eq.f32.partialorder %v6751_v57, %v6845_v48 }
 0x403   :  { %vm3172_vm6 = vmand %vm3135_vm15, %vm2948_vm11  ;;  %vm2952_vm11 = vcmp.eq.f32.partialorder %v6755_v21, %v6841_v32 }
 0x404   :  { %vm3173_vm7 = vmand %vm3135_vm15, %vm2949_vm2 }
 0x405   :  { %vm3971_vm10 = vmpackc.low %vm3173_vm7, %vm3171_vm12 }
 0x406   :  { %vm3973_vm4 = vmpackc.low %vm3172_vm6, %vm3170_vm9  ;;  %3972 = vmatprep.subr.msk.bf16.mxu0 %vm3971_vm10, %v7145_v62  ;;  %vm2953_vm9 = vcmp.eq.f32.partialorder %v6755_v21, %v6845_v48 }
 0x407   :  { %3974 = vmatpush1.bf16.msk.msra.mxu0 %vm3973_vm4, %v7145_v62  ;;  %v3054_v24 = vpop.permute.xlu1 %3053  ;;  %vm2954_vm4 = vcmp.eq.f32.partialorder %v6759_v51, %v6841_v32 }
 0x408   :  { %vm3136_vm0 = vcmp.eq.s32.totalorder %v3054_v24, 1 }
 0x409   :  { %vm3174_vm13 = vmand %vm3136_vm0, %vm2950_vm14  ;;  %v3057_v13 = vpop.permute.xlu0 %3056 }
 0x40a   :  { %vm3175_vm15 = vmand %vm3136_vm0, %vm2951_vm5  ;;  %vm3137_vm12 = vcmp.eq.s32.totalorder %v3057_v13, 1  ;;  %vm2955_vm0 = vcmp.eq.f32.partialorder %v6759_v51, %v6845_v48 }
 0x40b   :  { %vm3176_vm2 = vmand %vm3137_vm12, %vm2952_vm11  ;;  %vm2956_vm11 = vcmp.eq.f32.partialorder %v6762_v53, %v6841_v32 }
 0x40c   :  { %vm3177_vm6 = vmand %vm3137_vm12, %vm2953_vm9 }
 0x40d   :  { %vm3975_vm7 = vmpackc.low %vm3177_vm6, %vm3175_vm15 }
 0x40e   :  { %vm3977_vm10 = vmpackc.low %vm3176_vm2, %vm3174_vm13  ;;  %3976 = vmatprep.subr.msk.bf16.mxu0 %vm3975_vm7, %v7145_v62  ;;  %vm2957_vm13 = vcmp.eq.f32.partialorder %v6762_v53, %v6845_v48 }
 0x40f   :  { %3978 = vmatpush1.bf16.msk.msra.mxu0 %vm3977_vm10, %v7145_v62  ;;  %v3060_v31 = vpop.permute.xlu1 %3059  ;;  %vm2958_vm10 = vcmp.eq.f32.partialorder %v6765_v28, %v6841_v32 }
 0x410   :  { %vm3138_vm14 = vcmp.eq.s32.totalorder %v3060_v31, 1 }
 0x411   :  { %vm3178_vm5 = vmand %vm3138_vm14, %vm2954_vm4  ;;  %v3063_v49 = vpop.permute.xlu0 %3062 }
 0x412   :  { %vm3179_vm12 = vmand %vm3138_vm14, %vm2955_vm0  ;;  %vm3139_vm15 = vcmp.eq.s32.totalorder %v3063_v49, 1  ;;  %vm2959_vm14 = vcmp.eq.f32.partialorder %v6765_v28, %v6845_v48 }
 0x413   :  { %vm3180_vm9 = vmand %vm3139_vm15, %vm2956_vm11  ;;  %vm2960_vm11 = vcmp.eq.f32.partialorder %v6769_v35, %v6841_v32 }
 0x414   :  { %vm3181_vm2 = vmand %vm3139_vm15, %vm2957_vm13 }
 0x415   :  { %vm3979_vm6 = vmpackc.low %vm3181_vm2, %vm3179_vm12 }
 0x416   :  { %vm3981_vm7 = vmpackc.low %vm3180_vm9, %vm3178_vm5  ;;  %3980 = vmatprep.subr.msk.bf16.mxu0 %vm3979_vm6, %v7145_v62  ;;  %vm2961_vm5 = vcmp.eq.f32.partialorder %v6769_v35, %v6845_v48 }
 0x417   :  { %3982 = vmatpush1.bf16.msk.msra.mxu0 %vm3981_vm7, %v7145_v62  ;;  %v3066_v20 = vpop.permute.xlu1 %3065  ;;  %vm2962_vm7 = vcmp.eq.f32.partialorder %v6773_v34, %v6841_v32 }
 0x418   :  { %vm3140_vm4 = vcmp.eq.s32.totalorder %v3066_v20, 1 }
 0x419   :  { %vm3182_vm0 = vmand %vm3140_vm4, %vm2958_vm10  ;;  %v3069_v57 = vpop.permute.xlu0 %3068 }
 0x41a   :  { %vm3183_vm15 = vmand %vm3140_vm4, %vm2959_vm14  ;;  %vm3141_vm12 = vcmp.eq.s32.totalorder %v3069_v57, 1  ;;  %vm2963_vm4 = vcmp.eq.f32.partialorder %v6773_v34, %v6845_v48 }
 0x41b   :  { %vm3184_vm13 = vmand %vm3141_vm12, %vm2960_vm11  ;;  %vm2964_vm11 = vcmp.eq.f32.partialorder %v6776_v39, %v6841_v32 }
 0x41c   :  { %vm3185_vm9 = vmand %vm3141_vm12, %vm2961_vm5 }
 0x41d   :  { %vm3983_vm2 = vmpackc.low %vm3185_vm9, %vm3183_vm15 }
 0x41e   :  { %vm3985_vm6 = vmpackc.low %vm3184_vm13, %vm3182_vm0  ;;  %3984 = vmatprep.subr.msk.bf16.mxu0 %vm3983_vm2, %v7145_v62  ;;  %vm2965_vm0 = vcmp.eq.f32.partialorder %v6776_v39, %v6845_v48 }
 0x41f   :  { %3986 = vmatpush1.bf16.msk.msra.mxu0 %vm3985_vm6, %v7145_v62  ;;  %v3072_v21 = vpop.permute.xlu1 %3071  ;;  %vm2966_vm6 = vcmp.eq.f32.partialorder %v6779_v10, %v6841_v32 }
 0x420   :  { %vm3142_vm10 = vcmp.eq.s32.totalorder %v3072_v21, 1 }
 0x421   :  { %vm3186_vm14 = vmand %vm3142_vm10, %vm2962_vm7  ;;  %v3075_v51 = vpop.permute.xlu0 %3074 }
 0x422   :  { %vm3187_vm12 = vmand %vm3142_vm10, %vm2963_vm4  ;;  %vm3143_vm15 = vcmp.eq.s32.totalorder %v3075_v51, 1  ;;  %vm2967_vm10 = vcmp.eq.f32.partialorder %v6779_v10, %v6845_v48 }
 0x423   :  { %vm3188_vm5 = vmand %vm3143_vm15, %vm2964_vm11  ;;  %vm2968_vm11 = vcmp.eq.f32.partialorder %v6783_v5, %v6841_v32 }
 0x424   :  { %vm3189_vm13 = vmand %vm3143_vm15, %vm2965_vm0 }
 0x425   :  { %vm3987_vm9 = vmpackc.low %vm3189_vm13, %vm3187_vm12 }
 0x426   :  { %vm3989_vm2 = vmpackc.low %vm3188_vm5, %vm3186_vm14  ;;  %3988 = vmatprep.subr.msk.bf16.mxu0 %vm3987_vm9, %v7145_v62  ;;  %vm2969_vm14 = vcmp.eq.f32.partialorder %v6783_v5, %v6845_v48 }
 0x427   :  { %3990 = vmatpush1.bf16.msk.msra.mxu0 %vm3989_vm2, %v7145_v62  ;;  %v3078_v53 = vpop.permute.xlu1 %3077  ;;  %vm2970_vm2 = vcmp.eq.f32.partialorder %v6787_v26, %v6841_v32 }
 0x428   :  { %vm3144_vm7 = vcmp.eq.s32.totalorder %v3078_v53, 1 }
 0x429   :  { %vm3190_vm4 = vmand %vm3144_vm7, %vm2966_vm6  ;;  %v3081_v28 = vpop.permute.xlu0 %3080 }
 0x42a   :  { %vm3191_vm15 = vmand %vm3144_vm7, %vm2967_vm10  ;;  %vm3145_vm12 = vcmp.eq.s32.totalorder %v3081_v28, 1  ;;  %vm2971_vm7 = vcmp.eq.f32.partialorder %v6787_v26, %v6845_v48 }
 0x42b   :  { %vm3192_vm0 = vmand %vm3145_vm12, %vm2968_vm11  ;;  %vm2972_vm11 = vcmp.eq.f32.partialorder %v6790_v50, %v6841_v32 }
 0x42c   :  { %vm3193_vm5 = vmand %vm3145_vm12, %vm2969_vm14 }
 0x42d   :  { %vm3991_vm13 = vmpackc.low %vm3193_vm5, %vm3191_vm15 }
 0x42e   :  { %vm3993_vm9 = vmpackc.low %vm3192_vm0, %vm3190_vm4  ;;  %3992 = vmatprep.subr.msk.bf16.mxu0 %vm3991_vm13, %v7145_v62  ;;  %vm2973_vm4 = vcmp.eq.f32.partialorder %v6790_v50, %v6845_v48 }
 0x42f   :  { %3994 = vmatpush1.bf16.msk.msra.mxu0 %vm3993_vm9, %v7145_v62  ;;  %v3084_v35 = vpop.permute.xlu1 %3083  ;;  %vm2974_vm9 = vcmp.eq.f32.partialorder %v6793_v3, %v6841_v32 }
 0x430   :  { %vm3146_vm6 = vcmp.eq.s32.totalorder %v3084_v35, 1 }
 0x431   :  { %vm3194_vm10 = vmand %vm3146_vm6, %vm2970_vm2  ;;  %v3087_v34 = vpop.permute.xlu0 %3086 }
 0x432   :  { %vm3195_vm12 = vmand %vm3146_vm6, %vm2971_vm7  ;;  %vm3147_vm15 = vcmp.eq.s32.totalorder %v3087_v34, 1  ;;  %vm2975_vm6 = vcmp.eq.f32.partialorder %v6793_v3, %v6845_v48 }
 0x433   :  { %vm3196_vm14 = vmand %vm3147_vm15, %vm2972_vm11  ;;  %vm2976_vm11 = vcmp.eq.f32.partialorder %v6797_v29, %v6841_v32 }
 0x434   :  { %vm3197_vm0 = vmand %vm3147_vm15, %vm2973_vm4 }
 0x435   :  { %vm3995_vm5 = vmpackc.low %vm3197_vm0, %vm3195_vm12 }
 0x436   :  { %vm3997_vm13 = vmpackc.low %vm3196_vm14, %vm3194_vm10  ;;  %3996 = vmatprep.subr.msk.bf16.mxu0 %vm3995_vm5, %v7145_v62  ;;  %vm2977_vm10 = vcmp.eq.f32.partialorder %v6797_v29, %v6845_v48 }
 0x437   :  { %3998 = vmatpush1.bf16.msk.msra.mxu0 %vm3997_vm13, %v7145_v62  ;;  %v3090_v39 = vpop.permute.xlu1 %3089  ;;  %vm2978_vm13 = vcmp.eq.f32.partialorder %v6801_v55, %v6841_v32 }
 0x438   :  { %vm3148_vm2 = vcmp.eq.s32.totalorder %v3090_v39, 1 }
 0x439   :  { %vm3198_vm7 = vmand %vm3148_vm2, %vm2974_vm9  ;;  %v3093_v10 = vpop.permute.xlu0 %3092 }
 0x43a   :  { %vm3199_vm15 = vmand %vm3148_vm2, %vm2975_vm6  ;;  %vm3149_vm12 = vcmp.eq.s32.totalorder %v3093_v10, 1  ;;  %vm2979_vm2 = vcmp.eq.f32.partialorder %v6801_v55, %v6845_v48 }
 0x43b   :  { %vm3200_vm4 = vmand %vm3149_vm12, %vm2976_vm11  ;;  %vm2980_vm11 = vcmp.eq.f32.partialorder %v6804_v12, %v6841_v32 }
 0x43c   :  { %vm3201_vm14 = vmand %vm3149_vm12, %vm2977_vm10 }
 0x43d   :  { %vm3999_vm0 = vmpackc.low %vm3201_vm14, %vm3199_vm15 }
 0x43e   :  { %vm4001_vm5 = vmpackc.low %vm3200_vm4, %vm3198_vm7  ;;  %4000 = vmatprep.subr.msk.bf16.mxu0 %vm3999_vm0, %v7145_v62  ;;  %vm2981_vm7 = vcmp.eq.f32.partialorder %v6804_v12, %v6845_v48 }
 0x43f   :  { %4002 = vmatpush1.bf16.msk.msra.mxu0 %vm4001_vm5, %v7145_v62  ;;  %v3096_v5 = vpop.permute.xlu1 %3095  ;;  %vm2982_vm5 = vcmp.eq.f32.partialorder %v6807_v16, %v6841_v32 }
 0x440   :  { %vm3150_vm9 = vcmp.eq.s32.totalorder %v3096_v5, 1 }
 0x441   :  { %vm3202_vm6 = vmand %vm3150_vm9, %vm2978_vm13  ;;  %v3099_v26 = vpop.permute.xlu0 %3098 }
 0x442   :  { %vm3203_vm12 = vmand %vm3150_vm9, %vm2979_vm2  ;;  %vm3151_vm15 = vcmp.eq.s32.totalorder %v3099_v26, 1  ;;  %vm2983_vm9 = vcmp.eq.f32.partialorder %v6807_v16, %v6845_v48 }
 0x443   :  { %vm3204_vm10 = vmand %vm3151_vm15, %vm2980_vm11  ;;  %vm2984_vm11 = vcmp.eq.f32.partialorder %v6811_v47, %v6841_v32 }
 0x444   :  { %vm3205_vm4 = vmand %vm3151_vm15, %vm2981_vm7 }
 0x445   :  { %vm4003_vm14 = vmpackc.low %vm3205_vm4, %vm3203_vm12 }
 0x446   :  { %vm4005_vm0 = vmpackc.low %vm3204_vm10, %vm3202_vm6  ;;  %4004 = vmatprep.subr.msk.bf16.mxu0 %vm4003_vm14, %v7145_v62  ;;  %vm2985_vm6 = vcmp.eq.f32.partialorder %v6811_v47, %v6845_v48 }
 0x447   :  { %4006 = vmatpush1.bf16.msk.msra.mxu0 %vm4005_vm0, %v7145_v62  ;;  %v3102_v50 = vpop.permute.xlu1 %3101  ;;  %vm2986_vm0 = vcmp.eq.f32.partialorder %v6815_v56, %v6841_v32 }
 0x448   :  { %vm3152_vm13 = vcmp.eq.s32.totalorder %v3102_v50, 1 }
 0x449   :  { %vm3206_vm2 = vmand %vm3152_vm13, %vm2982_vm5  ;;  %v3105_v3 = vpop.permute.xlu0 %3104 }
 0x44a   :  { %vm3207_vm15 = vmand %vm3152_vm13, %vm2983_vm9  ;;  %vm3153_vm12 = vcmp.eq.s32.totalorder %v3105_v3, 1  ;;  %vm2987_vm13 = vcmp.eq.f32.partialorder %v6815_v56, %v6845_v48 }
 0x44b   :  { %vm3208_vm7 = vmand %vm3153_vm12, %vm2984_vm11  ;;  %vm2988_vm11 = vcmp.eq.f32.partialorder %v6818_v4, %v6841_v32 }
 0x44c   :  { %vm3209_vm10 = vmand %vm3153_vm12, %vm2985_vm6 }
 0x44d   :  { %vm4007_vm4 = vmpackc.low %vm3209_vm10, %vm3207_vm15 }
 0x44e   :  { %vm4009_vm14 = vmpackc.low %vm3208_vm7, %vm3206_vm2  ;;  %4008 = vmatprep.subr.msk.bf16.mxu0 %vm4007_vm4, %v7145_v62  ;;  %vm2989_vm2 = vcmp.eq.f32.partialorder %v6818_v4, %v6845_v48 }
 0x44f   :  { %4010 = vmatpush1.bf16.msk.msra.mxu0 %vm4009_vm14, %v7145_v62  ;;  %v3108_v29 = vpop.permute.xlu1 %3107  ;;  %vm2990_vm14 = vcmp.eq.f32.partialorder %v6821_v19, %v6841_v32 }
 0x450   :  { %vm3154_vm5 = vcmp.eq.s32.totalorder %v3108_v29, 1 }
 0x451   :  { %vm3210_vm9 = vmand %vm3154_vm5, %vm2986_vm0  ;;  %v3111_v55 = vpop.permute.xlu0 %3110 }
 0x452   :  { %vm3211_vm12 = vmand %vm3154_vm5, %vm2987_vm13  ;;  %vm3155_vm15 = vcmp.eq.s32.totalorder %v3111_v55, 1  ;;  %vm2991_vm5 = vcmp.eq.f32.partialorder %v6821_v19, %v6845_v48 }
 0x453   :  { %vm3212_vm6 = vmand %vm3155_vm15, %vm2988_vm11  ;;  %vm2992_vm11 = vcmp.eq.f32.partialorder %v6825_v54, %v6841_v32 }
 0x454   :  { %vm3213_vm7 = vmand %vm3155_vm15, %vm2989_vm2 }
 0x455   :  { %vm4011_vm10 = vmpackc.low %vm3213_vm7, %vm3211_vm12 }
 0x456   :  { %vm4013_vm4 = vmpackc.low %vm3212_vm6, %vm3210_vm9  ;;  %4012 = vmatprep.subr.msk.bf16.mxu0 %vm4011_vm10, %v7145_v62  ;;  %vm2993_vm9 = vcmp.eq.f32.partialorder %v6825_v54, %v6845_v48 }
 0x457   :  { %4014 = vmatpush1.bf16.msk.msra.mxu0 %vm4013_vm4, %v7145_v62  ;;  %v3114_v12 = vpop.permute.xlu1 %3113  ;;  %vm2994_vm4 = vcmp.eq.f32.partialorder %v6829_v9, %v6841_v32 }
 0x458   :  { %vm3156_vm0 = vcmp.eq.s32.totalorder %v3114_v12, 1 }
 0x459   :  { %vm3214_vm13 = vmand %vm3156_vm0, %vm2990_vm14  ;;  %v3117_v16 = vpop.permute.xlu0 %3116 }
 0x45a   :  { %vm3215_vm15 = vmand %vm3156_vm0, %vm2991_vm5  ;;  %vm3157_vm12 = vcmp.eq.s32.totalorder %v3117_v16, 1  ;;  %vm2995_vm0 = vcmp.eq.f32.partialorder %v6829_v9, %v6845_v48 }
 0x45b   :  { %vm3216_vm2 = vmand %vm3157_vm12, %vm2992_vm11  ;;  %vm2996_vm11 = vcmp.eq.f32.partialorder %v6832_v14, %v6841_v32 }
 0x45c   :  { %vm3217_vm6 = vmand %vm3157_vm12, %vm2993_vm9 }
 0x45d   :  { %vm4015_vm7 = vmpackc.low %vm3217_vm6, %vm3215_vm15 }
 0x45e   :  { %vm4017_vm10 = vmpackc.low %vm3216_vm2, %vm3214_vm13  ;;  %4016 = vmatprep.subr.msk.bf16.mxu0 %vm4015_vm7, %v7145_v62  ;;  %vm2997_vm13 = vcmp.eq.f32.partialorder %v6832_v14, %v6845_v48 }
 0x45f   :  { %4018 = vmatpush1.bf16.msk.msra.mxu0 %vm4017_vm10, %v7145_v62  ;;  %v3120_v0 = vpop.permute.xlu1 %3119  ;;  %vm2998_vm10 = vcmp.eq.f32.partialorder %v6835_v58, %v6841_v32 }
 0x460   :  { %vm3158_vm14 = vcmp.eq.s32.totalorder %v3120_v0, 1 }
 0x461   :  { %vm3218_vm5 = vmand %vm3158_vm14, %vm2994_vm4  ;;  %v3123_v60 = vpop.permute.xlu0 %3122 }
 0x462   :  { %vm3219_vm12 = vmand %vm3158_vm14, %vm2995_vm0  ;;  %vm3159_vm15 = vcmp.eq.s32.totalorder %v3123_v60, 1  ;;  %vm2999_vm14 = vcmp.eq.f32.partialorder %v6835_v58, %v6845_v48 }
 0x463   :  { %vm3220_vm9 = vmand %vm3159_vm15, %vm2996_vm11  ;;  %vm3000_vm11 = vcmp.eq.f32.partialorder %v6837_v6, %v6841_v32 }
 0x464   :  { %vm3221_vm2 = vmand %vm3159_vm15, %vm2997_vm13 }
 0x465   :  { %vm4019_vm6 = vmpackc.low %vm3221_vm2, %vm3219_vm12 }
 0x466   :  { %vm4021_vm7 = vmpackc.low %vm3220_vm9, %vm3218_vm5  ;;  %4020 = vmatprep.subr.msk.bf16.mxu0 %vm4019_vm6, %v7145_v62  ;;  %vm3001_vm5 = vcmp.eq.f32.partialorder %v6837_v6, %v6845_v48 }
 0x467   :  { %4022 = vmatpush1.bf16.msk.msra.mxu0 %vm4021_vm7, %v7145_v62  ;;  %v3126_v47 = vpop.permute.xlu1 %3125 }
 0x468   :  { %vm3160_vm4 = vcmp.eq.s32.totalorder %v3126_v47, 1 }
 0x469   :  { %vm3222_vm0 = vmand %vm3160_vm4, %vm2998_vm10  ;;  %v3129_v25 = vpop.permute.xlu0 %3128 }
 0x46a   :  { %vm3223_vm3 = vmand %vm3160_vm4, %vm2999_vm14  ;;  %vm3161_vm12 = vcmp.eq.s32.totalorder %v3129_v25, 1 }
 0x46b   :  { %vm3224_vm15 = vmand %vm3161_vm12, %vm3000_vm11 }
 0x46c   :  { %vm3225_vm13 = vmand %vm3161_vm12, %vm3001_vm5 }
 0x46d   :  { %vm4023_vm9 = vmpackc.low %vm3225_vm13, %vm3223_vm3 }
 0x46e   :  { %vm4025_vm2 = vmpackc.low %vm3224_vm15, %vm3222_vm0  ;;  %4024 = vmatprep.subr.msk.bf16.mxu0 %vm4023_vm9, %v7145_v62 }
 0x46f   :  { %4026 = vmatpush1.bf16.msk.msra.mxu0 %vm4025_vm2, %v7145_v62 }
 0x472   :  { %3419 = vmatmul.mubr.bf16.vlgmr.msra.gmra.mrb[68].mxu0 %v7146_v45 }
 0x473   :  { %4459 = shalt.err (!%p4456_p4)
}
 0x474   :  { %s4460_s29 = scalar_lea.hbm %s7049_s7, 32 }
 0x475   :  { %p4461_p5 = scmp.ne.s32.totalorder %s7049_s7, %s4460_s29  ;;  %p4464_p6 = scmp.lt.u32.totalorder %s4460_s29, %s7049_s7 }
 0x477   :  { %p4466_p7 = pnand %p4464_p6, %p4461_p5 }
 0x479   :  { %4469 = shalt.err (!%p4466_p7)
}
 0x47a   :  { %3458 = dma.vmem_to_hbm [thread:$0]  %s3456_s27, 32, %s7049_s7, [#allocation3]   ;;  %vm7193_vm10 = vcmp.lt.f32.partialorder %v6364_v23, 64.0 }
 0x47b   :  { %s4502_s14 = smov [#allocation4]  }
 0x47c   :  { %s3465_s15 = sshll.u32 %s4502_s14, 4  ;;  %s3466_s15 = int_to_ptr.vmem [resolvable:$true] %s3465_s15 }
 0x47d   :  { %s4470_s7 = scalar_lea.vmem %s3466_s15, 32  ;;  %p4475_p9 = scmp.lt.s32.totalorder %s3466_s15, %s3466_s15 }
 0x47e   :  { %p4471_p8 = scmp.ne.s32.totalorder %s3466_s15, %s4470_s7  ;;  %p4476_p10 = scmp.lt.s32.totalorder %s4470_s7, %s4470_s7 }
 0x480   :  { %p4477_p11 = por %p4476_p10, %p4475_p9 }
 0x482   :  { %p4478_p12 = pnand %p4477_p11, %p4471_p8 }
 0x545   :  { %v3420_v62 = vpop.f32.mrb[68].mxu0 }
 0x546   :  { %vm3427_vm3 = vcmp.gt.f32.partialorder %v3420_v62, 0.5  ;;  %v3422_v45 = vpop.f32.mrb[69].mxu0 }
 0x547   :  { %vm3429_vm6 = vmand %vm1928_vm1, %vm3427_vm3  ;;  %vm3428_vm7 = vcmp.gt.f32.partialorder %v3422_v45, 0.5  ;;  %v3424_v44 = vpop.f32.mrb[70].mxu0 }
 0x548   :  { %v3431_v56 = vsel %vm3429_vm6, 1, %v7167_v59  ;;  %vm3430_vm4 = vmand %vm7193_vm10, %vm3428_vm7  ;;  %v3425_v1 = vpop.f32.mrb[71].mxu0 }
 0x549   :  { %v3432_v15 = vsel %vm3430_vm4, 1, %v7167_v59 }
 0x54a   :  { %v3433_v52 = vcombine.low %v3431_v56, %v3432_v15 }
 0x54c   :  { %v3440_v4 = vrot.slane %v3433_v52, %v6445_v33 }
 0x54e   :  { %v3447_v63 = vrot.slane %v3440_v4, %v6445_v33 }
 0x550   :  { %3448 = vst.msk [vmem:[#allocation4] sm:$0x3] %vm6452_vm8, %v3447_v63 }
 0x551   :  { %4481 = shalt.err (!%p4478_p12)
}
 0x552   :  { %s4482_s3 = scalar_lea.hbm %s7050_s8, 32 }
 0x553   :  { %p4483_p13 = scmp.ne.s32.totalorder %s7050_s8, %s4482_s3  ;;  %p4486_p0 = scmp.lt.u32.totalorder %s4482_s3, %s7050_s8 }
 0x555   :  { %p4488_p1 = pnand %p4486_p0, %p4483_p13 }
 0x557   :  { %4491 = shalt.err (!%p4488_p1)
}
 0x558   :  { %3468 = dma.vmem_to_hbm [thread:$0]  %s3466_s15, 32, %s7050_s8, [#allocation5]  }
 0x559   :  { %4492 = dma.done.wait [#allocation3], 32  }
 0x55a   :  { %4493 = vsyncadd [#allocation3], 4294967264 }
 0x55b   :  { %4494 = dma.done.wait [#allocation5], 32  }
 0x55c   :  { %4495 = vsyncadd [#allocation5], 4294967264 }
 0x55d   :  { %3475 = vsyncpa [#allocation3], 1 }
 0x55e   :  { %3476 = vsyncpa [#allocation5], 1 }

</bundles_post_ra>
